<compile_context>
chip_gen: v7x
topology: tpu7x:2x2x1
jax: 0.10.0
libtpu: 0.0.40
codegen_flags: <defaults>
</compile_context>

<pallas_src>
import functools

import jax
import jax.numpy as jnp
from jax.experimental import pallas as pl
from jax.experimental.pallas import tpu as pltpu

_BN_EPS = 1e-5


def _round_up(x, m):
    return (x + m - 1) // m * m


# -----------------------------------------------------------------------------
# Pallas kernel: tap-accumulated GEMM with fused per-channel shift (+ ReLU)
# -----------------------------------------------------------------------------
def _tap_gemm_kernel(x_ref, w_ref, b_ref, o_ref, acc_ref,
                     *, offsets, cin, tm, relu):
    """o[i, j] = act( (sum_t x[i*tm+off_t : i*tm+off_t+tm, :] @ w[t]) + b ).

    x_ref   : (rows, cin)      whole flattened padded input (resident in VMEM)
    w_ref   : (ntaps*cin, tn)  per-tap [cin, tn] slabs stacked along rows (bf16,
                               BN scale already folded in)
    b_ref   : (1, tn)          per-channel shift (f32)
    o_ref   : (tm, tn)         acc_ref : (tm, tn) f32 scratch
    """
    base = pl.multiple_of(pl.program_id(1) * tm, 8)
    for t, off in enumerate(offsets):                    # static k^3 loop
        xs = x_ref[pl.ds(base + off, tm), :]             # row-shifted window
        ws = w_ref[pl.ds(t * cin, cin), :]               # static weight slab
        part = jnp.dot(xs, ws, preferred_element_type=jnp.float32)
        if t == 0:
            acc_ref[...] = part                          # no zero-fill pass
        else:
            acc_ref[...] += part
    y = acc_ref[...] + b_ref[...]
    if relu:
        y = jnp.maximum(y, 0.0)
    o_ref[...] = y.astype(o_ref.dtype)


def _fused_tap_gemm(xflat, wmat, shift, offsets, relu, out_dtype):
    """Fused conv GEMM.  xflat:[R, cin] (flattened padded input), wmat:
    [ntaps*cin, cout] (tap-major, bf16), shift:[1, cout].  Returns [R, cout]."""
    R, cin = xflat.shape
    ktot, cout = wmat.shape
    ntaps = len(offsets)
    assert ktot == ntaps * cin

    # pad the per-tap K to a multiple of 8 (only needed for the 7^3 stem)
    cin_p = _round_up(cin, 8)
    if cin_p != cin:
        xflat = jnp.pad(xflat, ((0, 0), (0, cin_p - cin)))
        wmat = jnp.pad(wmat.reshape(ntaps, cin, cout),
                       ((0, 0), (0, cin_p - cin), (0, 0))
                       ).reshape(ntaps * cin_p, cout)

    # adaptive tiles: big M tiles for small channel counts (few grid steps),
    # capped so the working set stays well inside the scoped VMEM budget.
    if cin_p <= 128:
        cap = 4096
    elif cin_p <= 256:
        cap = 2048
    else:
        cap = 1024
    tm = min(_round_up(R, 8), cap)
    mtiles = -(-R // tm)
    tn = cout if cout <= 256 else 256
    assert cout % tn == 0
    ntiles = cout // tn

    rows = _round_up(mtiles * tm + max(offsets), 8)
    xpad = jnp.pad(xflat.astype(jnp.bfloat16), ((0, rows - R), (0, 0)))
    wb = wmat.astype(jnp.bfloat16)          # no-op (pre-cast at build time)
    bb = shift.reshape(1, cout).astype(jnp.float32)

    kernel = functools.partial(
        _tap_gemm_kernel, offsets=tuple(int(o) for o in offsets),
        cin=cin_p, tm=tm, relu=relu)

    out = pl.pallas_call(
        kernel,
        out_shape=jax.ShapeDtypeStruct((mtiles * tm, cout), out_dtype),
        grid_spec=pltpu.PrefetchScalarGridSpec(
            num_scalar_prefetch=0,
            # n-tiles outer, m-tiles inner: each weight slab is fetched once.
            grid=(ntiles, mtiles),
            in_specs=[
                pl.BlockSpec((rows, cin_p), lambda j, i: (0, 0)),      # resident
                pl.BlockSpec((ntaps * cin_p, tn), lambda j, i: (0, j)),
                pl.BlockSpec((1, tn), lambda j, i: (0, j)),
            ],
            out_specs=pl.BlockSpec((tm, tn), lambda j, i: (i, j)),
            scratch_shapes=[pltpu.VMEM((tm, tn), jnp.float32)],
        ),
        compiler_params=pltpu.CompilerParams(
            dimension_semantics=("parallel", "parallel"),
            vmem_limit_bytes=40 * 1024 * 1024),
    )(xpad, wb, bb)
    return out[:R]


# -----------------------------------------------------------------------------
# Conv3d wrappers (channels-last)
# -----------------------------------------------------------------------------
@functools.partial(jax.jit, static_argnames=("relu", "out_f32"))
def conv3d_s1(x, wmat, shift, *, relu, out_f32=False):
    """3x3x3 / stride-1 / pad-1 Conv3d + folded BN/bias (+ReLU), channels-last.
    The 27 taps are accumulated inside one Pallas GEMM as row-shifted reads of
    the spatially padded input — no im2col matrix in HBM."""
    N, D, H, W, C = x.shape
    Dp, Hp, Wp = D + 2, H + 2, W + 2
    xp = jnp.pad(x, ((0, 0), (1, 1), (1, 1), (1, 1), (0, 0)))
    xflat = xp.reshape(N * Dp * Hp * Wp, C)
    offsets = [dz * Hp * Wp + dy * Wp + dx
               for dz in range(3) for dy in range(3) for dx in range(3)]
    cout = wmat.shape[1]
    out_dtype = jnp.float32 if out_f32 else jnp.bfloat16
    y = _fused_tap_gemm(xflat, wmat, shift, offsets, relu, out_dtype)
    # valid conv outputs live at padded coords (d<D, h<H, w<W)
    return y.reshape(N, Dp, Hp, Wp, cout)[:, :D, :H, :W, :]


@functools.partial(jax.jit, static_argnames=("ksize", "stride", "padding", "relu"))
def conv3d_general(x, wmat, shift, *, ksize, stride, padding, relu):
    """General Conv3d (+folded BN/bias, +ReLU) via a small im2col GEMM.
    Only used for the 7^3/s2 stem and the 3^3/s2 / 1x1/s2 downsample convs,
    whose patch matrices are tiny at those depths/channel counts."""
    N, D, H, W, C = x.shape
    k, s, p = ksize, stride, padding
    xp = jnp.pad(x, ((0, 0), (p, p), (p, p), (p, p), (0, 0))) if p else x
    Do = (D + 2 * p - k) // s + 1
    Ho = (H + 2 * p - k) // s + 1
    Wo = (W + 2 * p - k) // s + 1
    cols = []
    for dz in range(k):
        for dy in range(k):
            for dx in range(k):
                cols.append(xp[:, dz:dz + s * (Do - 1) + 1:s,
                               dy:dy + s * (Ho - 1) + 1:s,
                               dx:dx + s * (Wo - 1) + 1:s, :])
    pat = cols[0] if len(cols) == 1 else jnp.concatenate(cols, axis=-1)
    xflat = pat.reshape(N * Do * Ho * Wo, k * k * k * C)
    cout = wmat.shape[1]
    y = _fused_tap_gemm(xflat, wmat, shift, [0], relu, jnp.bfloat16)
    return y.reshape(N, Do, Ho, Wo, cout)


# -----------------------------------------------------------------------------
# MaxPool3d / upsample / residual add+ReLU
# -----------------------------------------------------------------------------
@jax.jit
def maxpool3d_k3s2(x):
    """MaxPool3d(kernel=3, stride=2, padding=1), channels-last.
    Running max over the 27 shifted strided views (no 27x stack in HBM)."""
    N, D, H, W, C = x.shape
    xp = jnp.pad(x, ((0, 0), (1, 1), (1, 1), (1, 1), (0, 0)),
                 constant_values=-jnp.inf)
    Do, Ho, Wo = D // 2, H // 2, W // 2
    out = None
    for dz in range(3):
        for dy in range(3):
            for dx in range(3):
                sl = xp[:, dz:dz + 2 * Do - 1:2,
                        dy:dy + 2 * Ho - 1:2,
                        dx:dx + 2 * Wo - 1:2, :]
                out = sl if out is None else jnp.maximum(out, sl)
    return out


def upsample_nearest_2x(x):
    """Nearest-neighbour x2 upsample via a single broadcast (no triple repeat).
    decoder_exact=True resizes to the skip's size; with the power-of-two shapes
    used here that is exactly nearest x2."""
    N, D, H, W, C = x.shape
    y = jnp.broadcast_to(x[:, :, None, :, None, :, None, :],
                         (N, D, 2, H, 2, W, 2, C))
    return y.reshape(N, 2 * D, 2 * H, 2 * W, C)


def _add_relu_kernel(a_ref, b_ref, o_ref):
    o_ref[...] = jnp.maximum(a_ref[...] + b_ref[...], 0).astype(o_ref.dtype)


@jax.jit
def add_relu(a, b):
    """Residual add + ReLU as a tiled Pallas elementwise kernel over a
    lane-dense (rows, 128) flat view (full-width stores regardless of C)."""
    shape = a.shape
    total = a.size
    LANE = 128
    rows = -(-total // LANE)
    rows_p = _round_up(rows, 8)
    tr = min(rows_p, 2048)
    rows_p = _round_up(rows_p, tr)
    pad = rows_p * LANE - total
    af = jnp.pad(a.reshape(-1), (0, pad)).reshape(rows_p, LANE)
    bf = jnp.pad(b.reshape(-1), (0, pad)).reshape(rows_p, LANE)
    out = pl.pallas_call(
        _add_relu_kernel,
        out_shape=jax.ShapeDtypeStruct((rows_p, LANE), a.dtype),
        grid=(rows_p // tr,),
        in_specs=[pl.BlockSpec((tr, LANE), lambda i: (i, 0)),
                  pl.BlockSpec((tr, LANE), lambda i: (i, 0))],
        out_specs=pl.BlockSpec((tr, LANE), lambda i: (i, 0)),
        compiler_params=pltpu.CompilerParams(
            dimension_semantics=("parallel",)),
    )(af, bf)
    return out.reshape(-1)[:total].reshape(shape)


# -----------------------------------------------------------------------------
# Parameter construction (deterministic, synthetic)
# -----------------------------------------------------------------------------
class _KeyGen:
    def __init__(self, seed):
        self._key = jax.random.PRNGKey(seed)
        self._i = 0

    def __call__(self):
        self._i += 1
        return jax.random.fold_in(self._key, self._i)


def _conv_bn_params(key, cin, cout, k):
    fan_in = cin * k ** 3
    w = jax.random.normal(key, (cout, cin, k, k, k), jnp.float32) * (2.0 / fan_in) ** 0.5
    # GEMM layout: rows = (tap dz,dy,dx major) x cin, cols = cout.
    wmat = jnp.transpose(w, (2, 3, 4, 1, 0)).reshape(k ** 3 * cin, cout)
    # Eval-mode BatchNorm folded into the weights as a per-channel scale and a
    # separate per-channel shift (gamma=1, beta=0, mean=0, var=1: torch defaults).
    # TODO(synk): train-mode BN (batch statistics) not implemented; eval-mode only.
    scale = jnp.full((cout,), 1.0 / (1.0 + _BN_EPS) ** 0.5, jnp.float32)
    wmat = (wmat * scale[None, :]).astype(jnp.bfloat16)     # pre-cast to bf16
    shift = jnp.zeros((1, cout), jnp.float32)
    return dict(wmat=wmat, shift=shift)


def _basic_block_params(kg, cin, cout, stride):
    p = dict(stride=stride,
             conv1=_conv_bn_params(kg(), cin, cout, 3),
             conv2=_conv_bn_params(kg(), cout, cout, 3))
    if stride != 1 or cin != cout:
        p["downsample"] = _conv_bn_params(kg(), cin, cout, 1)
    return p


def build_unet_params(seed=0, in_channels=3, classes=1,
                      decoder_channels=(256, 128, 64, 32, 16)):
    kg = _KeyGen(seed)
    # ---- encoder: ResNet34 (3D) ----
    enc = dict(conv1=_conv_bn_params(kg(), in_channels, 64, 7))
    layer_defs = [(64, 64, 3, 1), (64, 128, 4, 2), (128, 256, 6, 2), (256, 512, 3, 2)]
    layers = []
    for cin, cout, nblocks, stride in layer_defs:
        blocks = []
        for b in range(nblocks):
            blocks.append(_basic_block_params(
                kg, cin if b == 0 else cout, cout, stride if b == 0 else 1))
        layers.append(blocks)
    enc["layers"] = layers

    # ---- decoder (smp UnetDecoder channel plumbing, center=False for resnet) ----
    encoder_channels = (in_channels, 64, 64, 128, 256, 512)
    ech = list(encoder_channels[1:])[::-1]               # [512, 256, 128, 64, 64]
    in_chs = [ech[0]] + list(decoder_channels[:-1])      # [512, 256, 128, 64, 32]
    skip_chs = ech[1:] + [0]                             # [256, 128, 64, 64, 0]
    dec = []
    for ic, sc, oc in zip(in_chs, skip_chs, decoder_channels):
        dec.append(dict(conv1=_conv_bn_params(kg(), ic + sc, oc, 3),
                        conv2=_conv_bn_params(kg(), oc, oc, 3)))

    # ---- segmentation head: Conv3d(decoder_channels[-1], classes, k=3, pad=1) ----
    c_last = decoder_channels[-1]
    head_w = jax.random.normal(kg(), (classes, c_last, 3, 3, 3), jnp.float32) * \
        (1.0 / (c_last * 27)) ** 0.5
    head = dict(wmat=jnp.transpose(head_w, (2, 3, 4, 1, 0))
                .reshape(27 * c_last, classes).astype(jnp.bfloat16),
                shift=jnp.zeros((1, classes), jnp.float32))  # conv bias (zero-init)
    return dict(encoder=enc, decoder=dec, head=head)


# -----------------------------------------------------------------------------
# Forward pass (all activations channels-last, bf16)
# -----------------------------------------------------------------------------
def _basic_block_fwd(p, x):
    s = p["stride"]
    c1, c2 = p["conv1"], p["conv2"]
    if s == 1:
        y = conv3d_s1(x, c1["wmat"], c1["shift"], relu=True)
    else:
        y = conv3d_general(x, c1["wmat"], c1["shift"],
                           ksize=3, stride=s, padding=1, relu=True)
    y = conv3d_s1(y, c2["wmat"], c2["shift"], relu=False)
    if "downsample" in p:
        d = p["downsample"]
        identity = conv3d_general(x, d["wmat"], d["shift"],
                                  ksize=1, stride=s, padding=0, relu=False)
    else:
        identity = x
    return add_relu(y, identity)


def encoder_forward(p, x):
    feats = [x]                                          # identity feature
    c1 = p["conv1"]
    y = conv3d_general(x, c1["wmat"], c1["shift"],
                       ksize=7, stride=2, padding=3, relu=True)  # conv1+bn1+relu
    feats.append(y)
    y = maxpool3d_k3s2(y)
    for layer in p["layers"]:
        for blk in layer:
            y = _basic_block_fwd(blk, y)
        feats.append(y)
    return feats                                         # channels (3,64,64,128,256,512)


def decoder_forward(p, features):
    feats = features[1:][::-1]        # drop same-resolution feature, reverse
    x = feats[0]                      # encoder head (center=False -> identity)
    skips = feats[1:]
    for i, blk in enumerate(p):
        x = upsample_nearest_2x(x)
        if i < len(skips):
            x = jnp.concatenate([x, skips[i].astype(x.dtype)], axis=-1)
        x = conv3d_s1(x, blk["conv1"]["wmat"], blk["conv1"]["shift"], relu=True)
        x = conv3d_s1(x, blk["conv2"]["wmat"], blk["conv2"]["shift"], relu=True)
    return x


def unet_forward(params, x_ncdhw):
    # module boundary: NCDHW (PyTorch) -> channels-last bf16 internally
    x = jnp.transpose(x_ncdhw, (0, 2, 3, 4, 1)).astype(jnp.bfloat16)
    features = encoder_forward(params["encoder"], x)
    dec = decoder_forward(params["decoder"], features)
    h = params["head"]
    masks = conv3d_s1(dec, h["wmat"], h["shift"], relu=False, out_f32=True)
    # activation=None -> identity.
    # interp_output_size=False (default) -> no final resize.
    # TODO(synk): trilinear F.interpolate for interp_output_size=True not implemented.
    return jnp.transpose(masks, (0, 4, 1, 2, 3))         # back to NCDHW


# -----------------------------------------------------------------------------
if __name__ == "__main__":
    params = build_unet_params(seed=0, in_channels=3, classes=1)
    x = jax.random.normal(jax.random.PRNGKey(0), (1, 3, 32, 32, 32), jnp.float32)
    masks = unet_forward(params, x)
    masks = jax.block_until_ready(masks)
    assert masks.shape == (1, 1, 32, 32, 32), masks.shape
    assert bool(jnp.isfinite(masks).all())
    print("KERNEL_OK")
</pallas_src>

<mosaic_0001>
module attributes {stable_mosaic.version = 11 : i64} {
  func.func @_tap_gemm_kernel(%arg0: i32, %arg1: i32, %arg2: memref<4096x1032xbf16, #tpu.memory_space<vmem>>, %arg3: memref<1032x64xbf16, #tpu.memory_space<vmem>>, %arg4: memref<1x64xf32, #tpu.memory_space<vmem>>, %arg5: memref<1024x64xbf16, #tpu.memory_space<vmem>>, %arg6: memref<1024x64xf32, #tpu.memory_space<vmem>>) attributes {dimension_semantics = [#tpu.dimension_semantics<parallel>, #tpu.dimension_semantics<parallel>], iteration_bounds = array<i64: 1, 4>, scalar_prefetch = 0 : i64, scratch_operands = 1 : i64, tpu.core_type = #tpu.core_type<tc>, window_params = [{pipeline_mode = #tpu.pipeline_mode<synchronous>, transform_indices = @transform_0, window_bounds = array<i64: 4096, 1032>}, {transform_indices = @transform_1, window_bounds = array<i64: 1032, 64>}, {transform_indices = @transform_2, window_bounds = array<i64: 1, 64>}, {transform_indices = @transform_3, window_bounds = array<i64: 1024, 64>}]} {
    %c1024_i32 = arith.constant 1024 : i32
    %0 = arith.muli %arg1, %c1024_i32 : i32
    %1 = tpu.assume_multiple %0, 8 : i32
    %c0_i32 = arith.constant 0 : i32
    %2 = arith.addi %1, %c0_i32 : i32
    %3 = arith.index_cast %2 : i32 to index
    %c0 = arith.constant 0 : index
    %4 = vector.load %arg2[%3, %c0] : memref<4096x1032xbf16, #tpu.memory_space<vmem>>, vector<1024x1032xbf16>
    %c0_0 = arith.constant 0 : index
    %c0_1 = arith.constant 0 : index
    %5 = vector.load %arg3[%c0_0, %c0_1] : memref<1032x64xbf16, #tpu.memory_space<vmem>>, vector<1032x64xbf16>
    %cst = arith.constant dense<0.000000e+00> : vector<1024x64xf32>
    %6 = tpu.matmul %4, %5, %cst {dimension_numbers = #tpu.dot_dimension_numbers<[1], [0], [0], [1], [0, 0, 1, 1], [], []>} : vector<1024x1032xbf16>, vector<1032x64xbf16>, vector<1024x64xf32> -> vector<1024x64xf32>
    %c0_2 = arith.constant 0 : index
    %c0_3 = arith.constant 0 : index
    %7 = vector.load %arg6[%c0_2, %c0_3] : memref<1024x64xf32, #tpu.memory_space<vmem>>, vector<1024x64xf32>
    tpu.vector_store %arg6[%c0_2, %c0_3], %6 {strides = array<i32>} : memref<1024x64xf32, #tpu.memory_space<vmem>>, vector<1024x64xf32>,
    %c0_4 = arith.constant 0 : index
    %c0_5 = arith.constant 0 : index
    %8 = vector.load %arg6[%c0_4, %c0_5] : memref<1024x64xf32, #tpu.memory_space<vmem>>, vector<1024x64xf32>
    %c0_6 = arith.constant 0 : index
    %c0_7 = arith.constant 0 : index
    %9 = vector.load %arg4[%c0_6, %c0_7] : memref<1x64xf32, #tpu.memory_space<vmem>>, vector<1x64xf32>
    %10 = vector.broadcast %9 : vector<1x64xf32> to vector<1024x64xf32>
    %11 = arith.addf %8, %10 : vector<1024x64xf32>
    %cst_8 = arith.constant 0.000000e+00 : f32
    %12 = vector.broadcast %cst_8 : f32 to vector<1024x64xf32>
    %13 = arith.maximumf %11, %12 : vector<1024x64xf32>
    %14 = arith.truncf %13 : vector<1024x64xf32> to vector<1024x64xbf16>
    %c0_9 = arith.constant 0 : index
    %c0_10 = arith.constant 0 : index
    %15 = vector.load %arg5[%c0_9, %c0_10] : memref<1024x64xbf16, #tpu.memory_space<vmem>>, vector<1024x64xbf16>
    tpu.vector_store %arg5[%c0_9, %c0_10], %14 {strides = array<i32>} : memref<1024x64xbf16, #tpu.memory_space<vmem>>, vector<1024x64xbf16>,
    return
  }
  func.func @transform_0(%arg0: i32, %arg1: i32) -> (i32, i32) {
    %c0_i32 = arith.constant 0 : i32
    %c0_i32_0 = arith.constant 0 : i32
    %c0_i32_1 = arith.constant 0 : i32
    return %c0_i32, %c0_i32_0 : i32, i32
  }
  func.func @transform_1(%arg0: i32, %arg1: i32) -> (i32, i32) {
    %c0_i32 = arith.constant 0 : i32
    %c0_i32_0 = arith.constant 0 : i32
    return %c0_i32, %arg0 : i32, i32
  }
  func.func @transform_2(%arg0: i32, %arg1: i32) -> (i32, i32) {
    %c0_i32 = arith.constant 0 : i32
    %c0_i32_0 = arith.constant 0 : i32
    return %c0_i32, %arg0 : i32, i32
  }
  func.func @transform_3(%arg0: i32, %arg1: i32) -> (i32, i32) {
    %c0_i32 = arith.constant 0 : i32
    return %arg1, %arg0 : i32, i32
  }
}

</mosaic_0001>

<bundles_post_ra>
// kernel: conv3d_general.1
= control target key start
LH: loop header
LB: loop body
LE: loop exit
PB: predicated region body
PF: predicated region fallthrough
CT: control target
= control target key end

     0   :  { %8 = vsyncpa [#allocation4], 0  ;;  %s13717_s0 = inlined_call_operand.vmem [shape: bf16[4096,1032], index: 0, kind: input, shape index: {}]   ;;  %s13718_s1 = inlined_call_operand.vmem [shape: bf16[1032,64], index: 1, kind: input, shape index: {}]   ;;  %s13719_s2 = inlined_call_operand.vmem [shape: f32[1,64], index: 2, kind: input, shape index: {}]   ;;  %s13720_s3 = inlined_call_operand.hbm [shape: bf16[4096,64], index: 3, kind: output, shape index: {}]  }
   0x1   :  { %10 = vsyncpa [#allocation4 + $0x1], 0  ;;  %s11332_s12 = smov 0   ;;  %s11334_s13 = smov 0  }
   0x2   :  { %s11336_s14 = smov 0   ;;  %s11338_s15 = smov 0  }
   0x3   :  { %s11340_s16 = smov 0   ;;  %s11342_s17 = smov 0  }
   0x4 LB: > { %s8425_s18 = sadd.s32 4294967295, %s11306_s17   ;;  %s8426_s19 = sadd.s32 4294967294, %s11306_s17   ;;  %s11306_s17 = sphi %s11342_s17, %s16_s17   ;;  %s11302_s16 = sphi %s11340_s16, %s13921_s16   ;;  %s11298_s15 = sphi %s11338_s15, %s13920_s15   ;;  %s11294_s14 = sphi %s11336_s14, %s13919_s14   ;;  %s11290_s13 = sphi %s11334_s13, %s13918_s13   ;;  %s11286_s12 = sphi %s11332_s12, %s13917_s12  }
   0x5   : > { %s25_s20 = sadd.s32 1, %s11302_s16  ;;  %s110_s21 = sadd.s32 1, %s11294_s14 }
   0x6   : > { %p26_p0 = scmp.ge.s32.totalorder %s25_s20, 4  ;;  %p120_p1 = scmp.ne.s32.totalorder %s11294_s14, %s11290_s13 }
   0x7   : > { %p121_p2 = scmp.eq.s32.totalorder %s8425_s18, 3  ;;  %p126_p3 = scmp.ne.s32.totalorder %s11290_s13, %s11286_s12 }
   0x8   : > { %s13923_s20 = smov (%p26_p0, %s25_s20), 0  ;;  %p127_p5 = scmp.eq.s32.totalorder %s8426_s19, 3 }
   0x9   : > { %p11372_p4 = por %p121_p2, %p120_p1  ;;  %s105_s23 = ssub.s32 %s11302_s16, %s13923_s20 }
   0xa   : > { %p8430_p6 = scmp.ge.s32.totalorder %s11306_s17, 1  ;;  %p108_p7 = scmp.eq.s32.totalorder %s105_s23, 0 }
   0xb   : > { %p11379_p8 = por %p127_p5, %p126_p3  ;;  %p161_p9 = scmp.lt.s32.totalorder %s11306_s17, 5 }
   0xc   : > { %s11385_s25 = scalar_select %p108_p7, %s11294_s14, %s110_s21  }
   0xd   : > { %p162_p10 = pnand %p8430_p6, %p161_p9 }
   0xf   : > { %165 = sbr.rel (%p162_p10) target bundleno = 1478 (0x5c6), region = 32 }
  0x16   : > { %v10329_v0 = vld [vmem:[%s13718_s1] sm:$0xff]   ;;  %v11308_v1 = vmov 0   ;;  %v10331_v3 = vld [vmem:[%s13718_s1 + $0x8] sm:$0xff]   ;;  %v10333_v5 = vld [vmem:[%s13718_s1 + $0x10] sm:$0xff]   ;;  %s8432_s6 = sshll.u32 %s11298_s15, 10  ;;  %vm4431_vm0 = vcmask 1043456  }
  0x17   : > { %4435 = vmatprep.subr.bf16.mxu1 %v11308_v1  ;;  %4980 = vmatprep.subr.bf16.mxu0 %v11308_v1  ;;  %v11395_v2 = vld [vmem:[%s13718_s1 + $0x80] sm:$0xff]   ;;  %v11405_v4 = vld [vmem:[%s13718_s1 + $0x88] sm:$0xff]   ;;  %v11416_v6 = vld [vmem:[%s13718_s1 + $0x90] sm:$0xff]   ;;  %s197_s11 = sshra.s32 %s8432_s6, 3  ;;  %vm4238_vm1 = vcmask 64512   ;;  %vm7160_vm2 = vcmask 523264  }
  0x18   : > { %4436 = vmatpush1.bf16.msra.mxu1 %v10329_v0  ;;  %4981 = vmatpush1.bf16.msra.mxu0 %v11395_v2  ;;  %v10335_v7 = vld [vmem:[%s13718_s1 + $0x18] sm:$0xff]   ;;  %v10337_v9 = vld [vmem:[%s13718_s1 + $0x20] sm:$0xff]   ;;  %v10339_v11 = vld [vmem:[%s13718_s1 + $0x28] sm:$0xff]   ;;  %s9273_s21 = smul.u32 36, %s197_s11  ;;  %s184_s5 = sand.u32 1, %s11290_s13   ;;  %vm8192_vm3 = vcmask 519168  }
  0x19   : > { %4437 = vmatprep.subr.bf16.mxu1 %v11308_v1  ;;  %4982 = vmatprep.subr.bf16.mxu0 %v11308_v1  ;;  %v11427_v8 = vld [vmem:[%s13718_s1 + $0x98] sm:$0xff]   ;;  %v11438_v10 = vld [vmem:[%s13718_s1 + $0xa0] sm:$0xff]   ;;  %v11449_v12 = vld [vmem:[%s13718_s1 + $0xa8] sm:$0xff]   ;;  %s12832_s8 = sshll.u32 %s184_s5, 9  ;;  %s9402_s19 = sshll.u32 %s11298_s15, 13 }
  0x1a   : > { %v10341_v13 = vld [vmem:[%s13718_s1 + $0x30] sm:$0xff]   ;;  %v10343_v15 = vld [vmem:[%s13718_s1 + $0x38] sm:$0xff]   ;;  %v10345_v17 = vld [vmem:[%s13718_s1 + $0x40] sm:$0xff]   ;;  %s11481_s4 = scalar_lea.vmem %s13717_s0, %s9273_s21  ;;  %s12851_s9 = scalar_lea.vmem [#allocation3], %s12832_s8 }
  0x1b   : > { %v11461_v14 = vld [vmem:[%s13718_s1 + $0xb0] sm:$0xff]   ;;  %v11472_v16 = vld [vmem:[%s13718_s1 + $0xb8] sm:$0xff]   ;;  %v11488_v18 = vld [vmem:[%s13718_s1 + $0xc0] sm:$0xff]   ;;  %s8336_s21 = sshll.u32 %s12851_s9, 4  ;;  %s13659_s27 = scalar_lea.hbm %s13720_s3, %s9402_s19  ;;  %s13661_s21 = int_to_ptr.vmem [resolvable:$true] %s8336_s21 }
  0x1c   : > { %4438 = vmatpush1.bf16.msra.mxu1 %v10331_v3  ;;  %4983 = vmatpush1.bf16.msra.mxu0 %v11405_v4  ;;  %v10363_v19 = vld [vmem:[%s11481_s4 + $0x4] ss:$36 sps:$4 sm:$0xff]   ;;  %v10366_v21 = vld [vmem:[%s11481_s4 + $0xc] ss:$36 sps:$4 sm:$0xff]   ;;  %v10351_v25 = vld [vmem:[%s13718_s1 + $0x58] sm:$0xff]   ;;  %s13671_s15 = scalar_lea.sflag [#allocation4], %s184_s5 }
  0x1d   : > { %4439 = vmatprep.subr.bf16.mxu1 %v11308_v1  ;;  %4984 = vmatprep.subr.bf16.mxu0 %v11308_v1  ;;  %v10347_v20 = vld [vmem:[%s13718_s1 + $0x48] sm:$0xff]   ;;  %v10349_v23 = vld [vmem:[%s13718_s1 + $0x50] sm:$0xff]   ;;  %v11523_v26 = vld [vmem:[%s13718_s1 + $0xd8] sm:$0xff]   ;;  %s11228_s28 = scalar_lea.vmem %s13661_s21, 8192  ;;  %s11309_s29 = smov [#allocation3]  }
  0x1e   : > { %v11501_v22 = vld [vmem:[%s13718_s1 + $0xc8] sm:$0xff]   ;;  %4467 = vmatprep.mubr.bf16.mxu1 %v10363_v19  ;;  %5012 = vmatprep.mubr.bf16.mxu0 %v10366_v21  ;;  %v11512_v24 = vld [vmem:[%s13718_s1 + $0xd0] sm:$0xff]   ;;  %v10353_v27 = vld [vmem:[%s13718_s1 + $0x60] sm:$0xff]   ;;  %p11229_p11 = scmp.ne.s32.totalorder %s13661_s21, %s11228_s28  ;;  %s11232_s30 = sshll.u32 %s11309_s29, 4  ;;  %s11233_s30 = int_to_ptr.vmem [resolvable:$false] %s11232_s30 }
  0x1f   : > { %v11534_v28 = vld [vmem:[%s13718_s1 + $0xe0] sm:$0xff]   ;;  %v10355_v29 = vld [vmem:[%s13718_s1 + $0x68] sm:$0xff]   ;;  %v10357_v31 = vld [vmem:[%s13718_s1 + $0x70] sm:$0xff]   ;;  %s11234_s6 = scalar_lea.vmem %s11233_s30, 16384  ;;  %p11235_p0 = scmp.lt.s32.totalorder %s13661_s21, %s11233_s30 }
  0x20   : > { %4440 = vmatpush1.bf16.msra.mxu1 %v10333_v5  ;;  %4985 = vmatpush1.bf16.msra.mxu0 %v11416_v6  ;;  %v11545_v30 = vld [vmem:[%s13718_s1 + $0xe8] sm:$0xff]   ;;  %v11556_v32 = vld [vmem:[%s13718_s1 + $0xf0] sm:$0xff]   ;;  %v10359_v33 = vld [vmem:[%s13718_s1 + $0x78] sm:$0xff]   ;;  %p11230_p12 = pnand %p11229_p11, %p11372_p4  ;;  %p11236_p1 = scmp.lt.s32.totalorder %s11234_s6, %s11228_s28 }
  0x21   : > { %4441 = vmatprep.subr.bf16.mxu1 %v11308_v1  ;;  %4986 = vmatprep.subr.bf16.mxu0 %v11308_v1  ;;  %v11567_v34 = vld [vmem:[%s13718_s1 + $0xf8] sm:$0xff]   ;;  %v10361_v35 = vld [vmem:[%s11481_s4] ss:$36 sps:$4 sm:$0xff]   ;;  %v10364_v36 = vld [vmem:[%s11481_s4 + $0x8] ss:$36 sps:$4 sm:$0xff]  }
  0x22   : > { %v10367_v37 = vld [vmem:[%s13718_s1 + $0x100] sm:$0xff]   ;;  %v10368_v38 = vld [vmem:[%s11481_s4 + $0x4c] ss:$36 sps:$4 sm:$0xff]   ;;  %v10370_v39 = vld [vmem:[%s11481_s4 + $0x54] ss:$36 sps:$4 sm:$0xff]   ;;  %p11231_p13 = pneg %p11230_p12  ;;  %p11237_p2 = por %p11236_p1, %p11235_p0 }
  0x23   : > { %v10374_v40 = vld [vmem:[%s13718_s1 + $0x108] sm:$0xff]   ;;  %v10373_v42 = vld [vmem:[%s11481_s4 + $0x50] ss:$36 sps:$4 sm:$0xff]   ;;  %v10377_v44 = vld [vmem:[%s11481_s4 + $0x9c] ss:$36 sps:$4 sm:$0xff]  }
  0x24   : > { %4442 = vmatpush1.bf16.msra.mxu1 %v10335_v7  ;;  %4987 = vmatpush1.bf16.msra.mxu0 %v11427_v8  ;;  %v10372_v41 = vld [vmem:[%s11481_s4 + $0x48] ss:$36 sps:$4 sm:$0xff]   ;;  %v10375_v43 = vld [vmem:[%s11481_s4 + $0x94] ss:$36 sps:$4 sm:$0xff]   ;;  %v10382_v49 = vld [vmem:[%s11481_s4 + $0xdc] ss:$36 sps:$4 sm:$0xff]   ;;  %p11238_p3 = pnand %p11237_p2, %p11231_p13 }
  0x25   : > { %4443 = vmatprep.subr.bf16.mxu1 %v11308_v1  ;;  %4988 = vmatprep.subr.bf16.mxu0 %v11308_v1  ;;  %v10381_v45 = vld [vmem:[%s13718_s1 + $0x110] sm:$0xff]   ;;  %v10388_v46 = vld [vmem:[%s13718_s1 + $0x118] sm:$0xff]   ;;  %v10384_v50 = vld [vmem:[%s11481_s4 + $0xe4] ss:$36 sps:$4 sm:$0xff]  }
  0x26   : > { %v10379_v47 = vld [vmem:[%s11481_s4 + $0x90] ss:$36 sps:$4 sm:$0xff]   ;;  %v10380_v48 = vld [vmem:[%s11481_s4 + $0x98] ss:$36 sps:$4 sm:$0xff]   ;;  %v10395_v51 = vld [vmem:[%s13718_s1 + $0x120] sm:$0xff]  }
  0x27   : > { %v10402_v52 = vld [vmem:[%s13718_s1 + $0x128] sm:$0xff]   ;;  %v10386_v53 = vld [vmem:[%s11481_s4 + $0xd8] ss:$36 sps:$4 sm:$0xff]   ;;  %v10387_v54 = vld [vmem:[%s11481_s4 + $0xe0] ss:$36 sps:$4 sm:$0xff]  }
  0x28   : > { %4444 = vmatpush1.bf16.msra.mxu1 %v10337_v9  ;;  %4989 = vmatpush1.bf16.msra.mxu0 %v11438_v10  ;;  %v10389_v55 = vld [vmem:[%s11481_s4 + $0x124] ss:$36 sps:$4 sm:$0xff]   ;;  %v10391_v56 = vld [vmem:[%s11481_s4 + $0x12c] ss:$36 sps:$4 sm:$0xff]   ;;  %v10416_v58 = vld [vmem:[%s13718_s1 + $0x138] sm:$0xff]  }
  0x29   : > { %4445 = vmatprep.subr.bf16.mxu1 %v11308_v1  ;;  %4990 = vmatprep.subr.bf16.mxu0 %v11308_v1  ;;  %v10409_v57 = vld [vmem:[%s13718_s1 + $0x130] sm:$0xff]   ;;  %v10393_v59 = vld [vmem:[%s11481_s4 + $0x120] ss:$36 sps:$4 sm:$0xff]   ;;  %v10394_v60 = vld [vmem:[%s11481_s4 + $0x128] ss:$36 sps:$4 sm:$0xff]  }
  0x2a   : > { %v10396_v61 = vld [vmem:[%s11481_s4 + $0x16c] ss:$36 sps:$4 sm:$0xff]   ;;  %v10398_v62 = vld [vmem:[%s11481_s4 + $0x174] ss:$36 sps:$4 sm:$0xff]   ;;  %v10423_v63 = vld [vmem:[%s13718_s1 + $0x140] sm:$0xff]  }
  0x2b   : > { %v10430_v0 = vld [vmem:[%s13718_s1 + $0x148] sm:$0xff]   ;;  %v10401_v3 = vld [vmem:[%s11481_s4 + $0x170] ss:$36 sps:$4 sm:$0xff]   ;;  %v10405_v5 = vld [vmem:[%s11481_s4 + $0x1bc] ss:$36 sps:$4 sm:$0xff]  }
  0x2c   : > { %4446 = vmatpush1.bf16.msra.mxu1 %v10339_v11  ;;  %4991 = vmatpush1.bf16.msra.mxu0 %v11449_v12  ;;  %v10444_v7 = vld [vmem:[%s13718_s1 + $0x158] sm:$0xff]   ;;  %v10412_v11 = vld [vmem:[%s11481_s4 + $0x204] ss:$36 sps:$4 sm:$0xff]  }
  0x2d   : > { %4447 = vmatprep.subr.bf16.mxu1 %v11308_v1  ;;  %4992 = vmatprep.subr.bf16.mxu0 %v11308_v1  ;;  %v10408_v9 = vld [vmem:[%s11481_s4 + $0x1b8] ss:$36 sps:$4 sm:$0xff]   ;;  %v10421_v19 = vld [vmem:[%s11481_s4 + $0x240] ss:$36 sps:$4 sm:$0xff]   ;;  %v10422_v21 = vld [vmem:[%s11481_s4 + $0x248] ss:$36 sps:$4 sm:$0xff]  }
  0x30   : > { %4448 = vmatpush1.bf16.msra.mxu1 %v10341_v13  ;;  %4993 = vmatpush1.bf16.msra.mxu0 %v11461_v14  ;;  %v10414_v13 = vld [vmem:[%s11481_s4 + $0x1f8] ss:$36 sps:$4 sm:$0xff]  }
  0x31   : > { %4449 = vmatprep.subr.bf16.mxu1 %v11308_v1  ;;  %4994 = vmatprep.subr.bf16.mxu0 %v11308_v1 }
  0x34   : > { %4450 = vmatpush1.bf16.msra.mxu1 %v10343_v15  ;;  %4995 = vmatpush1.bf16.msra.mxu0 %v11472_v16  ;;  %v10415_v15 = vld [vmem:[%s11481_s4 + $0x200] ss:$36 sps:$4 sm:$0xff]  }
  0x35   : > { %4451 = vmatprep.subr.bf16.mxu1 %v11308_v1  ;;  %4996 = vmatprep.subr.bf16.mxu0 %v11308_v1 }
  0x38   : > { %4452 = vmatpush1.bf16.msra.mxu1 %v10345_v17  ;;  %4997 = vmatpush1.bf16.msra.mxu0 %v11488_v18  ;;  %v10419_v17 = vld [vmem:[%s11481_s4 + $0x24c] ss:$36 sps:$4 sm:$0xff]  }
  0x39   : > { %4453 = vmatprep.subr.bf16.mxu1 %v11308_v1  ;;  %4998 = vmatprep.subr.bf16.mxu0 %v11308_v1 }
  0x3c   : > { %4454 = vmatpush1.bf16.msra.mxu1 %v10347_v20  ;;  %4999 = vmatpush1.bf16.msra.mxu0 %v11501_v22  ;;  %v10472_v20 = vld [vmem:[%s13718_s1 + $0x178] sm:$0xff]  }
  0x3d   : > { %4455 = vmatprep.subr.bf16.mxu1 %v11308_v1  ;;  %5000 = vmatprep.subr.bf16.mxu0 %v11308_v1 }
  0x40   : > { %4456 = vmatpush1.bf16.msra.mxu1 %v10349_v23  ;;  %5001 = vmatpush1.bf16.msra.mxu0 %v11512_v24  ;;  %v10426_v23 = vld [vmem:[%s11481_s4 + $0x294] ss:$36 sps:$4 sm:$0xff]  }
  0x41   : > { %4457 = vmatprep.subr.bf16.mxu1 %v11308_v1  ;;  %5002 = vmatprep.subr.bf16.mxu0 %v11308_v1 }
  0x44   : > { %4458 = vmatpush1.bf16.msra.mxu1 %v10351_v25  ;;  %5003 = vmatpush1.bf16.msra.mxu0 %v11523_v26  ;;  %v10429_v25 = vld [vmem:[%s11481_s4 + $0x290] ss:$36 sps:$4 sm:$0xff]  }
  0x45   : > { %4459 = vmatprep.subr.bf16.mxu1 %v11308_v1  ;;  %5004 = vmatprep.subr.bf16.mxu0 %v11308_v1 }
  0x48   : > { %4460 = vmatpush1.bf16.msra.mxu1 %v10353_v27  ;;  %5005 = vmatpush1.bf16.msra.mxu0 %v11534_v28  ;;  %v10433_v27 = vld [vmem:[%s11481_s4 + $0x2dc] ss:$36 sps:$4 sm:$0xff]  }
  0x49   : > { %4461 = vmatprep.subr.bf16.mxu1 %v11308_v1  ;;  %5006 = vmatprep.subr.bf16.mxu0 %v11308_v1 }
  0x4c   : > { %4462 = vmatpush1.bf16.msra.mxu1 %v10355_v29  ;;  %5007 = vmatpush1.bf16.msra.mxu0 %v11545_v30  ;;  %v10436_v29 = vld [vmem:[%s11481_s4 + $0x2d8] ss:$36 sps:$4 sm:$0xff]  }
  0x4d   : > { %4463 = vmatprep.subr.bf16.mxu1 %v11308_v1  ;;  %5008 = vmatprep.subr.bf16.mxu0 %v11308_v1 }
  0x50   : > { %4464 = vmatpush1.bf16.msra.mxu1 %v10357_v31  ;;  %5009 = vmatpush1.bf16.msra.mxu0 %v11556_v32  ;;  %v10440_v31 = vld [vmem:[%s11481_s4 + $0x324] ss:$36 sps:$4 sm:$0xff]  }
  0x51   : > { %4465 = vmatprep.subr.bf16.mxu1 %v11308_v1  ;;  %5010 = vmatprep.subr.bf16.mxu0 %v11308_v1 }
  0x54   : > { %4466 = vmatpush1.bf16.msra.mxu1 %v10359_v33  ;;  %5011 = vmatpush1.bf16.msra.mxu0 %v11567_v34  ;;  %v10443_v33 = vld [vmem:[%s11481_s4 + $0x320] ss:$36 sps:$4 sm:$0xff]  }
  0x55   : > { %9598 = vmatprep.subr.bf16.mxu1 %v11308_v1  ;;  %5525 = vmatprep.subr.bf16.mxu0 %v11308_v1 }
  0x57   : > { %4468 = vmatmul.mubr.bf16.vlgmr.msra.gmra.mrb[0].mxu1 %v10361_v35  ;;  %5013 = vmatmul.mubr.bf16.vlgmr.msra.gmra.mrb[0].mxu0 %v10364_v36  ;;  %v10447_v35 = vld [vmem:[%s11481_s4 + $0x36c] ss:$36 sps:$4 sm:$0xff]   ;;  %v10449_v36 = vld [vmem:[%s11481_s4 + $0x360] ss:$36 sps:$4 sm:$0xff]  }
  0x58   : > { %9614 = vmatpush1.bf16.msra.mxu1 %v11395_v2  ;;  %5526 = vmatpush1.bf16.msra.mxu0 %v10367_v37  ;;  %v10400_v2 = vld [vmem:[%s11481_s4 + $0x168] ss:$36 sps:$4 sm:$0xff]  }
  0x59   : > { %4475 = vmatprep.mubr.bf16.mxu1 %v10368_v38  ;;  %5020 = vmatprep.mubr.bf16.mxu0 %v10370_v39  ;;  %v10450_v37 = vld [vmem:[%s11481_s4 + $0x368] ss:$36 sps:$4 sm:$0xff]   ;;  %v10454_v39 = vld [vmem:[%s11481_s4 + $0x3b4] ss:$36 sps:$4 sm:$0xff]  }
  0x5a   : > { %5527 = vmatprep.subr.bf16.mxu0 %v11308_v1  ;;  %9599 = vmatprep.subr.bf16.mxu1 %v11308_v1  ;;  %v10452_v38 = vld [vmem:[%s11481_s4 + $0x3ac] ss:$36 sps:$4 sm:$0xff]  }
  0x5c   : > { %9615 = vmatpush1.bf16.msra.mxu1 %v11405_v4  ;;  %5528 = vmatpush1.bf16.msra.mxu0 %v10374_v40  ;;  %v10403_v4 = vld [vmem:[%s11481_s4 + $0x1b4] ss:$36 sps:$4 sm:$0xff]   ;;  %v10456_v40 = vld [vmem:[%s11481_s4 + $0x3a8] ss:$36 sps:$4 sm:$0xff]  }
  0x5d   : > { %9600 = vmatprep.subr.bf16.mxu1 %v11308_v1  ;;  %5529 = vmatprep.subr.bf16.mxu0 %v11308_v1 }
  0x5f   : > { %4476 = vmatmul.mubr.bf16.gmra.mrb[4].mxu1 %v10372_v41  ;;  %5021 = vmatmul.mubr.bf16.gmra.mrb[4].mxu0 %v10373_v42  ;;  %v10457_v41 = vld [vmem:[%s11481_s4 + $0x3b0] ss:$36 sps:$4 sm:$0xff]  }
  0x60   : > { %4483 = vmatprep.mubr.bf16.mxu1 %v10375_v43  ;;  %5028 = vmatprep.mubr.bf16.mxu0 %v10377_v44  ;;  %v10459_v42 = vld [vmem:[%s11481_s4 + $0x3f4] ss:$36 sps:$4 sm:$0xff]   ;;  %v10461_v43 = vld [vmem:[%s11481_s4 + $0x3fc] ss:$36 sps:$4 sm:$0xff]  }
  0x61   : > { %5530 = vmatpush1.bf16.msra.mxu0 %v10381_v45  ;;  %9616 = vmatpush1.bf16.msra.mxu1 %v11416_v6  ;;  %v10437_v6 = vld [vmem:[%s13718_s1 + $0x150] sm:$0xff]   ;;  %v10464_v45 = vld [vmem:[%s11481_s4 + $0x3f8] ss:$36 sps:$4 sm:$0xff]  }
  0x62   : > { %5531 = vmatprep.subr.bf16.mxu0 %v11308_v1  ;;  %9601 = vmatprep.subr.bf16.mxu1 %v11308_v1  ;;  %v10463_v44 = vld [vmem:[%s11481_s4 + $0x3f0] ss:$36 sps:$4 sm:$0xff]  }
  0x65   : > { %5532 = vmatpush1.bf16.msra.mxu0 %v10388_v46  ;;  %9617 = vmatpush1.bf16.msra.mxu1 %v11427_v8  ;;  %v10407_v8 = vld [vmem:[%s11481_s4 + $0x1b0] ss:$36 sps:$4 sm:$0xff]   ;;  %v10466_v46 = vld [vmem:[%s11481_s4 + $0x43c] ss:$36 sps:$4 sm:$0xff]  }
  0x66   : > { %5533 = vmatprep.subr.bf16.mxu0 %v11308_v1  ;;  %9602 = vmatprep.subr.bf16.mxu1 %v11308_v1 }
  0x67   : > { %4484 = vmatmul.mubr.bf16.gmra.mrb[8].mxu1 %v10379_v47  ;;  %5029 = vmatmul.mubr.bf16.gmra.mrb[8].mxu0 %v10380_v48  ;;  %v10468_v47 = vld [vmem:[%s11481_s4 + $0x444] ss:$36 sps:$4 sm:$0xff]   ;;  %v10470_v48 = vld [vmem:[%s11481_s4 + $0x438] ss:$36 sps:$4 sm:$0xff]  }
  0x68   : > { %4491 = vmatprep.mubr.bf16.mxu1 %v10382_v49  ;;  %5036 = vmatprep.mubr.bf16.mxu0 %v10384_v50  ;;  %v10471_v49 = vld [vmem:[%s11481_s4 + $0x440] ss:$36 sps:$4 sm:$0xff]  }
  0x69   : > { %5534 = vmatpush1.bf16.msra.mxu0 %v10395_v51  ;;  %9618 = vmatpush1.bf16.msra.mxu1 %v11438_v10  ;;  %v10410_v10 = vld [vmem:[%s11481_s4 + $0x1fc] ss:$36 sps:$4 sm:$0xff]   ;;  %v10473_v50 = vld [vmem:[%s11481_s4 + $0x484] ss:$36 sps:$4 sm:$0xff]   ;;  %v10477_v51 = vld [vmem:[%s11481_s4 + $0x14] ss:$36 sps:$4 sm:$0xff]  }
  0x6a   : > { %5535 = vmatprep.subr.bf16.mxu0 %v11308_v1  ;;  %9603 = vmatprep.subr.bf16.mxu1 %v11308_v1 }
  0x6d   : > { %5536 = vmatpush1.bf16.msra.mxu0 %v10402_v52  ;;  %9619 = vmatpush1.bf16.msra.mxu1 %v11449_v12  ;;  %v10451_v12 = vld [vmem:[%s13718_s1 + $0x160] sm:$0xff]  }
  0x6e   : > { %5537 = vmatprep.subr.bf16.mxu0 %v11308_v1  ;;  %9604 = vmatprep.subr.bf16.mxu1 %v11308_v1  ;;  %v10478_v52 = vld [vmem:[%s11481_s4 + $0x480] ss:$36 sps:$4 sm:$0xff]  }
  0x6f   : > { %4492 = vmatmul.mubr.bf16.gmra.mrb[12].mxu1 %v10386_v53  ;;  %5037 = vmatmul.mubr.bf16.gmra.mrb[12].mxu0 %v10387_v54  ;;  %v10475_v53 = vld [vmem:[%s11481_s4 + $0x10] ss:$36 sps:$4 sm:$0xff]  }
  0x70   : > { %4499 = vmatprep.mubr.bf16.mxu1 %v10389_v55  ;;  %5044 = vmatprep.mubr.bf16.mxu0 %v10391_v56  ;;  %v10480_v54 = vld [vmem:[%s11481_s4 + $0x4cc] ss:$36 sps:$4 sm:$0xff]   ;;  %v10479_v55 = vld [vmem:[%s13718_s1 + $0x180] sm:$0xff]  }
  0x71   : > { %5538 = vmatpush1.bf16.msra.mxu0 %v10409_v57  ;;  %9620 = vmatpush1.bf16.msra.mxu1 %v11461_v14  ;;  %v10458_v14 = vld [vmem:[%s13718_s1 + $0x168] sm:$0xff]   ;;  %v10482_v56 = vld [vmem:[%s11481_s4 + $0x5c] ss:$36 sps:$4 sm:$0xff]  }
  0x72   : > { %5539 = vmatprep.subr.bf16.mxu0 %v11308_v1  ;;  %9605 = vmatprep.subr.bf16.mxu1 %v11308_v1  ;;  %v10504_v57 = vld [vmem:[%s13718_s1 + $0x188] sm:$0xff]  }
  0x75   : > { %5540 = vmatpush1.bf16.msra.mxu0 %v10416_v58  ;;  %9621 = vmatpush1.bf16.msra.mxu1 %v11472_v16  ;;  %v10417_v16 = vld [vmem:[%s11481_s4 + $0x244] ss:$36 sps:$4 sm:$0xff]  }
  0x76   : > { %5541 = vmatprep.subr.bf16.mxu0 %v11308_v1  ;;  %9606 = vmatprep.subr.bf16.mxu1 %v11308_v1  ;;  %v10484_v58 = vld [vmem:[%s11481_s4 + $0x4c8] ss:$36 sps:$4 sm:$0xff]  }
  0x77   : > { %4500 = vmatmul.mubr.bf16.gmra.mrb[16].mxu1 %v10393_v59  ;;  %5045 = vmatmul.mubr.bf16.gmra.mrb[16].mxu0 %v10394_v60  ;;  %v10485_v59 = vld [vmem:[%s11481_s4 + $0x58] ss:$36 sps:$4 sm:$0xff]  }
  0x78   : > { %4507 = vmatprep.mubr.bf16.mxu1 %v10396_v61  ;;  %5052 = vmatprep.mubr.bf16.mxu0 %v10398_v62  ;;  %v10486_v60 = vld [vmem:[%s11481_s4 + $0x514] ss:$36 sps:$4 sm:$0xff]   ;;  %v10488_v61 = vld [vmem:[%s11481_s4 + $0xa4] ss:$36 sps:$4 sm:$0xff]  }
  0x79   : > { %5542 = vmatpush1.bf16.msra.mxu0 %v10423_v63  ;;  %9622 = vmatpush1.bf16.msra.mxu1 %v11488_v18  ;;  %v10465_v18 = vld [vmem:[%s13718_s1 + $0x170] sm:$0xff]   ;;  %v10554_v63 = vld [vmem:[%s13718_s1 + $0x198] sm:$0xff]  }
  0x7a   : > { %5543 = vmatprep.subr.bf16.mxu0 %v11308_v1  ;;  %9607 = vmatprep.subr.bf16.mxu1 %v11308_v1  ;;  %v10529_v62 = vld [vmem:[%s13718_s1 + $0x190] sm:$0xff]  }
  0x7d   : > { %5544 = vmatpush1.bf16.msra.mxu0 %v10430_v0  ;;  %9623 = vmatpush1.bf16.msra.mxu1 %v11501_v22  ;;  %v10424_v22 = vld [vmem:[%s11481_s4 + $0x28c] ss:$36 sps:$4 sm:$0xff]  }
  0x7e   : > { %5545 = vmatprep.subr.bf16.mxu0 %v11308_v1  ;;  %9608 = vmatprep.subr.bf16.mxu1 %v11308_v1  ;;  %v10490_v0 = vld [vmem:[%s11481_s4 + $0x510] ss:$36 sps:$4 sm:$0xff]  }
  0x7f   : > { %4508 = vmatmul.mubr.bf16.gmra.mrb[20].mxu1 %v10400_v2  ;;  %5053 = vmatmul.mubr.bf16.gmra.mrb[20].mxu0 %v10401_v3  ;;  %v10491_v2 = vld [vmem:[%s11481_s4 + $0xa0] ss:$36 sps:$4 sm:$0xff]  }
  0x80   : > { %4515 = vmatprep.mubr.bf16.mxu1 %v10403_v4  ;;  %5060 = vmatprep.mubr.bf16.mxu0 %v10405_v5  ;;  %v10492_v3 = vld [vmem:[%s11481_s4 + $0x55c] ss:$36 sps:$4 sm:$0xff]   ;;  %v10494_v4 = vld [vmem:[%s11481_s4 + $0xec] ss:$36 sps:$4 sm:$0xff]  }
  0x81   : > { %5546 = vmatpush1.bf16.msra.mxu0 %v10437_v6  ;;  %9624 = vmatpush1.bf16.msra.mxu1 %v11512_v24  ;;  %v10428_v24 = vld [vmem:[%s11481_s4 + $0x288] ss:$36 sps:$4 sm:$0xff]   ;;  %v10579_v5 = vld [vmem:[%s13718_s1 + $0x1a0] sm:$0xff]   ;;  %v10496_v6 = vld [vmem:[%s11481_s4 + $0x558] ss:$36 sps:$4 sm:$0xff]  }
  0x82   : > { %5547 = vmatprep.subr.bf16.mxu0 %v11308_v1  ;;  %9609 = vmatprep.subr.bf16.mxu1 %v11308_v1 }
  0x85   : > { %5548 = vmatpush1.bf16.msra.mxu0 %v10444_v7  ;;  %9625 = vmatpush1.bf16.msra.mxu1 %v11523_v26  ;;  %v10431_v26 = vld [vmem:[%s11481_s4 + $0x2d4] ss:$36 sps:$4 sm:$0xff]   ;;  %v10497_v7 = vld [vmem:[%s11481_s4 + $0xe8] ss:$36 sps:$4 sm:$0xff]  }
  0x86   : > { %5549 = vmatprep.subr.bf16.mxu0 %v11308_v1  ;;  %9610 = vmatprep.subr.bf16.mxu1 %v11308_v1 }
  0x87   : > { %4516 = vmatmul.mubr.bf16.gmra.mrb[24].mxu1 %v10407_v8  ;;  %5061 = vmatmul.mubr.bf16.gmra.mrb[24].mxu0 %v10408_v9  ;;  %v10498_v8 = vld [vmem:[%s11481_s4 + $0x5a4] ss:$36 sps:$4 sm:$0xff]   ;;  %v10500_v9 = vld [vmem:[%s11481_s4 + $0x134] ss:$36 sps:$4 sm:$0xff]  }
  0x88   : > { %4523 = vmatprep.mubr.bf16.mxu1 %v10410_v10  ;;  %5068 = vmatprep.mubr.bf16.mxu0 %v10412_v11  ;;  %v10502_v10 = vld [vmem:[%s11481_s4 + $0x5a0] ss:$36 sps:$4 sm:$0xff]   ;;  %v10503_v11 = vld [vmem:[%s11481_s4 + $0x130] ss:$36 sps:$4 sm:$0xff]  }
  0x89   : > { %5550 = vmatpush1.bf16.msra.mxu0 %v10451_v12  ;;  %9626 = vmatpush1.bf16.msra.mxu1 %v11534_v28  ;;  %v10435_v28 = vld [vmem:[%s11481_s4 + $0x2d0] ss:$36 sps:$4 sm:$0xff]  }
  0x8a   : > { %5551 = vmatprep.subr.bf16.mxu0 %v11308_v1  ;;  %9611 = vmatprep.subr.bf16.mxu1 %v11308_v1  ;;  %v10505_v12 = vld [vmem:[%s11481_s4 + $0x5ec] ss:$36 sps:$4 sm:$0xff]  }
  0x8d   : > { %5552 = vmatpush1.bf16.msra.mxu0 %v10458_v14  ;;  %9627 = vmatpush1.bf16.msra.mxu1 %v11545_v30  ;;  %v10438_v30 = vld [vmem:[%s11481_s4 + $0x31c] ss:$36 sps:$4 sm:$0xff]   ;;  %v10604_v14 = vld [vmem:[%s13718_s1 + $0x1a8] sm:$0xff]  }
  0x8e   : > { %5553 = vmatprep.subr.bf16.mxu0 %v11308_v1  ;;  %9612 = vmatprep.subr.bf16.mxu1 %v11308_v1 }
  0x8f   : > { %4524 = vmatmul.mubr.bf16.gmra.mrb[28].mxu1 %v10414_v13  ;;  %5069 = vmatmul.mubr.bf16.gmra.mrb[28].mxu0 %v10415_v15  ;;  %v10507_v13 = vld [vmem:[%s11481_s4 + $0x17c] ss:$36 sps:$4 sm:$0xff]   ;;  %v10509_v15 = vld [vmem:[%s11481_s4 + $0x5e8] ss:$36 sps:$4 sm:$0xff]  }
  0x90   : > { %4531 = vmatprep.mubr.bf16.mxu1 %v10417_v16  ;;  %5076 = vmatprep.mubr.bf16.mxu0 %v10419_v17  ;;  %v10510_v16 = vld [vmem:[%s11481_s4 + $0x178] ss:$36 sps:$4 sm:$0xff]  }
  0x91   : > { %5554 = vmatpush1.bf16.msra.mxu0 %v10465_v18  ;;  %9628 = vmatpush1.bf16.msra.mxu1 %v11556_v32  ;;  %v10442_v32 = vld [vmem:[%s11481_s4 + $0x318] ss:$36 sps:$4 sm:$0xff]   ;;  %v10513_v18 = vld [vmem:[%s11481_s4 + $0x1c4] ss:$36 sps:$4 sm:$0xff]  }
  0x92   : > { %5555 = vmatprep.subr.bf16.mxu0 %v11308_v1  ;;  %9613 = vmatprep.subr.bf16.mxu1 %v11308_v1  ;;  %v10511_v17 = vld [vmem:[%s11481_s4 + $0x634] ss:$36 sps:$4 sm:$0xff]  }
  0x95   : > { %5556 = vmatpush1.bf16.msra.mxu0 %v10472_v20  ;;  %9629 = vmatpush1.bf16.msra.mxu1 %v11567_v34  ;;  %v10445_v34 = vld [vmem:[%s11481_s4 + $0x364] ss:$36 sps:$4 sm:$0xff]  }
  0x96   : > { %6070 = vmatprep.subr.bf16.mxu0 %v11308_v1  ;;  %v10516_v20 = vld [vmem:[%s11481_s4 + $0x1c0] ss:$36 sps:$4 sm:$0xff]  }
  0x97   : > { %4532 = vmatmul.mubr.bf16.gmra.mrb[32].mxu1 %v10421_v19  ;;  %5077 = vmatmul.mubr.bf16.gmra.mrb[32].mxu0 %v10422_v21  ;;  %v10515_v19 = vld [vmem:[%s11481_s4 + $0x630] ss:$36 sps:$4 sm:$0xff]   ;;  %v10517_v21 = vld [vmem:[%s11481_s4 + $0x67c] ss:$36 sps:$4 sm:$0xff]  }
  0x98   : > { %4539 = vmatprep.mubr.bf16.mxu1 %v10424_v22  ;;  %5084 = vmatprep.mubr.bf16.mxu0 %v10426_v23  ;;  %v10519_v22 = vld [vmem:[%s11481_s4 + $0x20c] ss:$36 sps:$4 sm:$0xff]   ;;  %v10521_v23 = vld [vmem:[%s11481_s4 + $0x678] ss:$36 sps:$4 sm:$0xff]  }
  0x9f   : > { %4540 = vmatmul.mubr.bf16.gmra.mrb[36].mxu1 %v10428_v24  ;;  %5085 = vmatmul.mubr.bf16.gmra.mrb[36].mxu0 %v10429_v25  ;;  %v10522_v24 = vld [vmem:[%s11481_s4 + $0x208] ss:$36 sps:$4 sm:$0xff]  }
  0xa0   : > { %4547 = vmatprep.mubr.bf16.mxu1 %v10431_v26  ;;  %5092 = vmatprep.mubr.bf16.mxu0 %v10433_v27  ;;  %v10523_v25 = vld [vmem:[%s11481_s4 + $0x6c4] ss:$36 sps:$4 sm:$0xff]   ;;  %v10525_v26 = vld [vmem:[%s11481_s4 + $0x254] ss:$36 sps:$4 sm:$0xff]  }
  0xa1   : > { %v10527_v27 = vld [vmem:[%s11481_s4 + $0x6c0] ss:$36 sps:$4 sm:$0xff]  }
  0xa7   : > { %4548 = vmatmul.mubr.bf16.gmra.mrb[40].mxu1 %v10435_v28  ;;  %5093 = vmatmul.mubr.bf16.gmra.mrb[40].mxu0 %v10436_v29  ;;  %v10528_v28 = vld [vmem:[%s11481_s4 + $0x250] ss:$36 sps:$4 sm:$0xff]  }
  0xa8   : > { %4555 = vmatprep.mubr.bf16.mxu1 %v10438_v30  ;;  %5100 = vmatprep.mubr.bf16.mxu0 %v10440_v31  ;;  %v10530_v29 = vld [vmem:[%s11481_s4 + $0x70c] ss:$36 sps:$4 sm:$0xff]   ;;  %v10532_v30 = vld [vmem:[%s11481_s4 + $0x29c] ss:$36 sps:$4 sm:$0xff]  }
  0xa9   : > { %v10629_v31 = vld [vmem:[%s13718_s1 + $0x1b0] sm:$0xff]  }
  0xaf   : > { %4556 = vmatmul.mubr.bf16.gmra.mrb[44].mxu1 %v10442_v32  ;;  %5101 = vmatmul.mubr.bf16.gmra.mrb[44].mxu0 %v10443_v33  ;;  %v10534_v32 = vld [vmem:[%s11481_s4 + $0x708] ss:$36 sps:$4 sm:$0xff]   ;;  %v10535_v33 = vld [vmem:[%s11481_s4 + $0x298] ss:$36 sps:$4 sm:$0xff]  }
  0xb0   : > { %4563 = vmatprep.mubr.bf16.mxu1 %v10445_v34  ;;  %5108 = vmatprep.mubr.bf16.mxu0 %v10447_v35  ;;  %v10536_v34 = vld [vmem:[%s11481_s4 + $0x754] ss:$36 sps:$4 sm:$0xff]   ;;  %v10538_v35 = vld [vmem:[%s11481_s4 + $0x2e4] ss:$36 sps:$4 sm:$0xff]  }
  0xb7   : > { %4564 = vmatmul.mubr.bf16.gmra.mrb[48].mxu1 %v10449_v36  ;;  %5109 = vmatmul.mubr.bf16.gmra.mrb[48].mxu0 %v10450_v37  ;;  %v10540_v36 = vld [vmem:[%s11481_s4 + $0x750] ss:$36 sps:$4 sm:$0xff]   ;;  %v10541_v37 = vld [vmem:[%s11481_s4 + $0x2e0] ss:$36 sps:$4 sm:$0xff]  }
  0xb8   : > { %4571 = vmatprep.mubr.bf16.mxu1 %v10452_v38  ;;  %5116 = vmatprep.mubr.bf16.mxu0 %v10454_v39  ;;  %v10542_v38 = vld [vmem:[%s11481_s4 + $0x79c] ss:$36 sps:$4 sm:$0xff]   ;;  %v10544_v39 = vld [vmem:[%s11481_s4 + $0x32c] ss:$36 sps:$4 sm:$0xff]  }
  0xbf   : > { %4572 = vmatmul.mubr.bf16.gmra.mrb[52].mxu1 %v10456_v40  ;;  %5117 = vmatmul.mubr.bf16.gmra.mrb[52].mxu0 %v10457_v41  ;;  %v10546_v40 = vld [vmem:[%s11481_s4 + $0x798] ss:$36 sps:$4 sm:$0xff]  }
  0xc0   : > { %4579 = vmatprep.mubr.bf16.mxu1 %v10459_v42  ;;  %5124 = vmatprep.mubr.bf16.mxu0 %v10461_v43  ;;  %v10547_v42 = vld [vmem:[%s11481_s4 + $0x328] ss:$36 sps:$4 sm:$0xff]  }
  0xc1   : > { %v10548_v43 = vld [vmem:[%s11481_s4 + $0x7e4] ss:$36 sps:$4 sm:$0xff]  }
  0xc7   : > { %4580 = vmatmul.mubr.bf16.gmra.mrb[56].mxu1 %v10463_v44  ;;  %5125 = vmatmul.mubr.bf16.gmra.mrb[56].mxu0 %v10464_v45  ;;  %v10550_v45 = vld [vmem:[%s11481_s4 + $0x374] ss:$36 sps:$4 sm:$0xff]  }
  0xc8   : > { %4587 = vmatprep.mubr.bf16.mxu1 %v10466_v46  ;;  %5132 = vmatprep.mubr.bf16.mxu0 %v10468_v47 }
  0xcf   : > { %4588 = vmatmul.mubr.bf16.gmra.mrb[60].mxu1 %v10470_v48  ;;  %5133 = vmatmul.mubr.bf16.gmra.mrb[60].mxu0 %v10471_v49  ;;  %v10552_v48 = vld [vmem:[%s11481_s4 + $0x7e0] ss:$36 sps:$4 sm:$0xff]  }
  0xd0   : > { %4595 = vmatprep.mubr.bf16.mxu1 %v10473_v50  ;;  %5557 = vmatprep.mubr.bf16.mxu0 %v10477_v51  ;;  %v10553_v50 = vld [vmem:[%s11481_s4 + $0x370] ss:$36 sps:$4 sm:$0xff]  }
  0xd1   : > { %v10555_v51 = vld [vmem:[%s11481_s4 + $0x82c] ss:$36 sps:$4 sm:$0xff]  }
  0xd7   : > { %4596 = vmatmul.mubr.bf16.gmra.mrb[64].mxu1 %v10478_v52  ;;  %5558 = vmatmul.mubr.bf16.vlgmr.msra.gmra.mrb[0].mxu0 %v10475_v53  ;;  %v10557_v53 = vld [vmem:[%s11481_s4 + $0x3bc] ss:$36 sps:$4 sm:$0xff]  }
  0xd8   : > { %4603 = vmatprep.mubr.bf16.mxu1 %v10480_v54  ;;  %6071 = vmatpush1.bf16.msra.mxu0 %v10479_v55 }
  0xd9   : > { %5565 = vmatprep.mubr.bf16.mxu0 %v10482_v56  ;;  %6072 = vmatprep.subr.bf16.mxu0 %v11308_v1  ;;  %v10654_v56 = vld [vmem:[%s13718_s1 + $0x1b8] sm:$0xff]  }
  0xdc   : > { %6073 = vmatpush1.bf16.msra.mxu0 %v10504_v57  ;;  %v10559_v57 = vld [vmem:[%s11481_s4 + $0x828] ss:$36 sps:$4 sm:$0xff]  }
  0xdd   : > { %6074 = vmatprep.subr.bf16.mxu0 %v11308_v1 }
  0xdf   : > { %4604 = vmatmul.mubr.bf16.gmra.mrb[68].mxu1 %v10484_v58  ;;  %5566 = vmatmul.mubr.bf16.gmra.mrb[4].mxu0 %v10485_v59  ;;  %v10560_v59 = vld [vmem:[%s11481_s4 + $0x3b8] ss:$36 sps:$4 sm:$0xff]  }
  0xe0   : > { %4611 = vmatprep.mubr.bf16.mxu1 %v10486_v60  ;;  %5573 = vmatprep.mubr.bf16.mxu0 %v10488_v61  ;;  %v10561_v60 = vld [vmem:[%s11481_s4 + $0x874] ss:$36 sps:$4 sm:$0xff]  }
  0xe1   : > { %6075 = vmatpush1.bf16.msra.mxu0 %v10529_v62  ;;  %v10563_v62 = vld [vmem:[%s11481_s4 + $0x404] ss:$36 sps:$4 sm:$0xff]  }
  0xe2   : > { %6076 = vmatprep.subr.bf16.mxu0 %v11308_v1 }
  0xe5   : > { %6077 = vmatpush1.bf16.msra.mxu0 %v10554_v63 }
  0xe6   : > { %6078 = vmatprep.subr.bf16.mxu0 %v11308_v1 }
  0xe7   : > { %4612 = vmatmul.mubr.bf16.gmra.mrb[72].mxu1 %v10490_v0  ;;  %5574 = vmatmul.mubr.bf16.gmra.mrb[8].mxu0 %v10491_v2  ;;  %v10565_v2 = vld [vmem:[%s11481_s4 + $0x870] ss:$36 sps:$4 sm:$0xff]  }
  0xe8   : > { %4619 = vmatprep.mubr.bf16.mxu1 %v10492_v3  ;;  %5581 = vmatprep.mubr.bf16.mxu0 %v10494_v4  ;;  %v10566_v4 = vld [vmem:[%s11481_s4 + $0x400] ss:$36 sps:$4 sm:$0xff]  }
  0xe9   : > { %6079 = vmatpush1.bf16.msra.mxu0 %v10579_v5  ;;  %v10567_v5 = vld [vmem:[%s11481_s4 + $0x8bc] ss:$36 sps:$4 sm:$0xff]  }
  0xea   : > { %6080 = vmatprep.subr.bf16.mxu0 %v11308_v1 }
  0xed   : > { %6081 = vmatpush1.bf16.msra.mxu0 %v10604_v14 }
  0xee   : > { %6082 = vmatprep.subr.bf16.mxu0 %v11308_v1 }
  0xef   : > { %4620 = vmatmul.mubr.bf16.gmra.mrb[76].mxu1 %v10496_v6  ;;  %5582 = vmatmul.mubr.bf16.gmra.mrb[12].mxu0 %v10497_v7  ;;  %v10569_v7 = vld [vmem:[%s11481_s4 + $0x44c] ss:$36 sps:$4 sm:$0xff]  }
  0xf0   : > { %4627 = vmatprep.mubr.bf16.mxu1 %v10498_v8  ;;  %5589 = vmatprep.mubr.bf16.mxu0 %v10500_v9 }
  0xf1   : > { %6083 = vmatpush1.bf16.msra.mxu0 %v10629_v31 }
  0xf2   : > { %6084 = vmatprep.subr.bf16.mxu0 %v11308_v1 }
  0xf5   : > { %6085 = vmatpush1.bf16.msra.mxu0 %v10654_v56 }
  0xf6   : > { %6086 = vmatprep.subr.bf16.mxu0 %v11308_v1 }
  0xf7   : > { %4628 = vmatmul.mubr.bf16.gmra.mrb[80].mxu1 %v10502_v10  ;;  %5590 = vmatmul.mubr.bf16.gmra.mrb[16].mxu0 %v10503_v11  ;;  %v10571_v10 = vld [vmem:[%s11481_s4 + $0x8b8] ss:$36 sps:$4 sm:$0xff]  }
  0xf8   : > { %4635 = vmatprep.mubr.bf16.mxu1 %v10505_v12  ;;  %5597 = vmatprep.mubr.bf16.mxu0 %v10507_v13  ;;  %v10572_v12 = vld [vmem:[%s11481_s4 + $0x448] ss:$36 sps:$4 sm:$0xff]  }
  0xf9   : > { %v10573_v13 = vld [vmem:[%s11481_s4 + $0x904] ss:$36 sps:$4 sm:$0xff]  }
  0xff   : > { %4636 = vmatmul.mubr.bf16.gmra.mrb[84].mxu1 %v10509_v15  ;;  %5598 = vmatmul.mubr.bf16.gmra.mrb[20].mxu0 %v10510_v16  ;;  %v10575_v15 = vld [vmem:[%s11481_s4 + $0x494] ss:$36 sps:$4 sm:$0xff]  }
 0x100   : > { %4643 = vmatprep.mubr.bf16.mxu1 %v10511_v17  ;;  %5605 = vmatprep.mubr.bf16.mxu0 %v10513_v18  ;;  %v10577_v18 = vld [vmem:[%s11481_s4 + $0x900] ss:$36 sps:$4 sm:$0xff]  }
 0x107   : > { %4644 = vmatmul.mubr.bf16.gmra.mrb[88].mxu1 %v10515_v19  ;;  %5606 = vmatmul.mubr.bf16.gmra.mrb[24].mxu0 %v10516_v20  ;;  %v10578_v20 = vld [vmem:[%s11481_s4 + $0x490] ss:$36 sps:$4 sm:$0xff]  }
 0x108   : > { %4651 = vmatprep.mubr.bf16.mxu1 %v10517_v21  ;;  %5613 = vmatprep.mubr.bf16.mxu0 %v10519_v22  ;;  %v10580_v21 = vld [vmem:[%s11481_s4 + $0x94c] ss:$36 sps:$4 sm:$0xff]  }
 0x10f   : > { %4652 = vmatmul.mubr.bf16.gmra.mrb[92].mxu1 %v10521_v23  ;;  %5614 = vmatmul.mubr.bf16.gmra.mrb[28].mxu0 %v10522_v24  ;;  %v10582_v23 = vld [vmem:[%s11481_s4 + $0x4dc] ss:$36 sps:$4 sm:$0xff]  }
 0x110   : > { %4659 = vmatprep.mubr.bf16.mxu1 %v10523_v25  ;;  %5621 = vmatprep.mubr.bf16.mxu0 %v10525_v26  ;;  %v10679_v26 = vld [vmem:[%s13718_s1 + $0x1c0] sm:$0xff]  }
 0x111   : > { %6087 = vmatpush1.bf16.msra.mxu0 %v10679_v26 }
 0x112   : > { %6088 = vmatprep.subr.bf16.mxu0 %v11308_v1 }
 0x117   : > { %4660 = vmatmul.mubr.bf16.gmra.mrb[96].mxu1 %v10527_v27  ;;  %5622 = vmatmul.mubr.bf16.gmra.mrb[32].mxu0 %v10528_v28  ;;  %v10584_v27 = vld [vmem:[%s11481_s4 + $0x948] ss:$36 sps:$4 sm:$0xff]  }
 0x118   : > { %4667 = vmatprep.mubr.bf16.mxu1 %v10530_v29  ;;  %5629 = vmatprep.mubr.bf16.mxu0 %v10532_v30  ;;  %v10585_v29 = vld [vmem:[%s11481_s4 + $0x4d8] ss:$36 sps:$4 sm:$0xff]  }
 0x119   : > { %v10586_v30 = vld [vmem:[%s11481_s4 + $0x994] ss:$36 sps:$4 sm:$0xff]  }
 0x11f   : > { %4668 = vmatmul.mubr.bf16.gmra.mrb[100].mxu1 %v10534_v32  ;;  %5630 = vmatmul.mubr.bf16.gmra.mrb[36].mxu0 %v10535_v33  ;;  %v10588_v32 = vld [vmem:[%s11481_s4 + $0x524] ss:$36 sps:$4 sm:$0xff]  }
 0x120   : > { %4675 = vmatprep.mubr.bf16.mxu1 %v10536_v34  ;;  %5637 = vmatprep.mubr.bf16.mxu0 %v10538_v35  ;;  %v10590_v35 = vld [vmem:[%s11481_s4 + $0x990] ss:$36 sps:$4 sm:$0xff]  }
 0x127   : > { %4676 = vmatmul.mubr.bf16.gmra.mrb[104].mxu1 %v10540_v36  ;;  %5638 = vmatmul.mubr.bf16.gmra.mrb[40].mxu0 %v10541_v37  ;;  %v10591_v37 = vld [vmem:[%s11481_s4 + $0x520] ss:$36 sps:$4 sm:$0xff]  }
 0x128   : > { %4683 = vmatprep.mubr.bf16.mxu1 %v10542_v38  ;;  %5645 = vmatprep.mubr.bf16.mxu0 %v10544_v39  ;;  %v10592_v38 = vld [vmem:[%s11481_s4 + $0x9dc] ss:$36 sps:$4 sm:$0xff]  }
 0x12a   : > { %v11805_v41 = vpop.f32.mrb[0].mxu1 }
 0x12b   : > { %v4471_v44 = vpop.f32.mrb[1].mxu1 }
 0x12c   : > { %v11810_v46 = vpop.f32.mrb[2].mxu1  ;;  %v10596_v44 = vld [vmem:[%s11481_s4 + $0x9d8] ss:$36 sps:$4 sm:$0xff]  }
 0x12d   : > { %v4474_v47 = vpop.f32.mrb[3].mxu1 }
 0x12e   : > { %v10597_v47 = vld [vmem:[%s11481_s4 + $0x568] ss:$36 sps:$4 sm:$0xff]  }
 0x12f   : > { %4684 = vmatmul.mubr.bf16.gmra.mrb[108].mxu1 %v10546_v40  ;;  %5646 = vmatmul.mubr.bf16.gmra.mrb[44].mxu0 %v10547_v42  ;;  %v10594_v40 = vld [vmem:[%s11481_s4 + $0x56c] ss:$36 sps:$4 sm:$0xff]  }
 0x130   : > { %4691 = vmatprep.mubr.bf16.mxu1 %v10548_v43  ;;  %5653 = vmatprep.mubr.bf16.mxu0 %v10550_v45 }
 0x132   : > { %v11813_v49 = vpop.f32.mrb[4].mxu1 }
 0x133   : > { %v4479_v52 = vpop.f32.mrb[5].mxu1 }
 0x134   : > { %v11818_v54 = vpop.f32.mrb[6].mxu1 }
 0x135   : > { %v4482_v55 = vpop.f32.mrb[7].mxu1 }
 0x137   : > { %4692 = vmatmul.mubr.bf16.gmra.mrb[112].mxu1 %v10552_v48  ;;  %5654 = vmatmul.mubr.bf16.gmra.mrb[48].mxu0 %v10553_v50  ;;  %v10598_v48 = vld [vmem:[%s11481_s4 + $0xa24] ss:$36 sps:$4 sm:$0xff]  }
 0x138   : > { %4699 = vmatprep.mubr.bf16.mxu1 %v10555_v51  ;;  %5661 = vmatprep.mubr.bf16.mxu0 %v10557_v53  ;;  %v10600_v51 = vld [vmem:[%s11481_s4 + $0x5b4] ss:$36 sps:$4 sm:$0xff]  }
 0x13a   : > { %v11824_v58 = vpop.f32.mrb[8].mxu1 }
 0x13b   : > { %v4487_v61 = vpop.f32.mrb[9].mxu1 }
 0x13c   : > { %v11830_v63 = vpop.f32.mrb[10].mxu1  ;;  %v10605_v61 = vld [vmem:[%s11481_s4 + $0xa6c] ss:$36 sps:$4 sm:$0xff]  }
 0x13d   : > { %v4490_v0 = vpop.f32.mrb[11].mxu1 }
 0x13e   : > { %v10607_v0 = vld [vmem:[%s11481_s4 + $0x5fc] ss:$36 sps:$4 sm:$0xff]  }
 0x13f   : > { %4700 = vmatmul.mubr.bf16.gmra.mrb[116].mxu1 %v10559_v57  ;;  %5662 = vmatmul.mubr.bf16.gmra.mrb[52].mxu0 %v10560_v59  ;;  %v10602_v57 = vld [vmem:[%s11481_s4 + $0xa20] ss:$36 sps:$4 sm:$0xff]  }
 0x140   : > { %4707 = vmatprep.mubr.bf16.mxu1 %v10561_v60  ;;  %5669 = vmatprep.mubr.bf16.mxu0 %v10563_v62  ;;  %v10603_v60 = vld [vmem:[%s11481_s4 + $0x5b0] ss:$36 sps:$4 sm:$0xff]  }
 0x142   : > { %v11833_v3 = vpop.f32.mrb[12].mxu1 }
 0x143   : > { %v4495_v6 = vpop.f32.mrb[13].mxu1 }
 0x144   : > { %v11838_v8 = vpop.f32.mrb[14].mxu1  ;;  %v10609_v6 = vld [vmem:[%s11481_s4 + $0xa68] ss:$36 sps:$4 sm:$0xff]  }
 0x145   : > { %v4498_v9 = vpop.f32.mrb[15].mxu1 }
 0x146   : > { %v10610_v9 = vld [vmem:[%s11481_s4 + $0x5f8] ss:$36 sps:$4 sm:$0xff]  }
 0x147   : > { %4708 = vmatmul.mubr.bf16.gmra.mrb[120].mxu1 %v10565_v2  ;;  %5670 = vmatmul.mubr.bf16.gmra.mrb[56].mxu0 %v10566_v4  ;;  %v10704_v2 = vld [vmem:[%s13718_s1 + $0x1c8] sm:$0xff]  }
 0x148   : > { %4715 = vmatprep.mubr.bf16.mxu1 %v10567_v5  ;;  %5677 = vmatprep.mubr.bf16.mxu0 %v10569_v7 }
 0x149   : > { %6089 = vmatpush1.bf16.msra.mxu0 %v10704_v2 }
 0x14a   : > { %v11841_v11 = vpop.f32.mrb[16].mxu1  ;;  %6090 = vmatprep.subr.bf16.mxu0 %v11308_v1 }
 0x14b   : > { %v4503_v14 = vpop.f32.mrb[17].mxu1 }
 0x14c   : > { %v11846_v16 = vpop.f32.mrb[18].mxu1 }
 0x14d   : > { %v4506_v17 = vpop.f32.mrb[19].mxu1 }
 0x14e   : > { %v10615_v17 = vld [vmem:[%s11481_s4 + $0xab0] ss:$36 sps:$4 sm:$0xff]  }
 0x14f   : > { %4716 = vmatmul.mubr.bf16.gmra.mrb[124].mxu1 %v10571_v10  ;;  %5678 = vmatmul.mubr.bf16.gmra.mrb[60].mxu0 %v10572_v12  ;;  %v10611_v10 = vld [vmem:[%s11481_s4 + $0xab4] ss:$36 sps:$4 sm:$0xff]  }
 0x150   : > { %4723 = vmatprep.mubr.bf16.mxu1 %v10573_v13  ;;  %5685 = vmatprep.mubr.bf16.mxu0 %v10575_v15  ;;  %v10613_v13 = vld [vmem:[%s11481_s4 + $0x644] ss:$36 sps:$4 sm:$0xff]  }
 0x152   : > { %v11849_v19 = vpop.f32.mrb[20].mxu1 }
 0x153   : > { %v4511_v22 = vpop.f32.mrb[21].mxu1 }
 0x154   : > { %v11854_v24 = vpop.f32.mrb[22].mxu1 }
 0x155   : > { %v4514_v25 = vpop.f32.mrb[23].mxu1 }
 0x157   : > { %4724 = vmatmul.mubr.bf16.gmra.mrb[128].mxu1 %v10577_v18  ;;  %5686 = vmatmul.mubr.bf16.gmra.mrb[64].mxu0 %v10578_v20  ;;  %v10616_v20 = vld [vmem:[%s11481_s4 + $0x640] ss:$36 sps:$4 sm:$0xff]  }
 0x158   : > { %4731 = vmatprep.mubr.bf16.mxu1 %v10580_v21  ;;  %5693 = vmatprep.mubr.bf16.mxu0 %v10582_v23  ;;  %v10617_v21 = vld [vmem:[%s11481_s4 + $0xafc] ss:$36 sps:$4 sm:$0xff]   ;;  %v10619_v23 = vld [vmem:[%s11481_s4 + $0x68c] ss:$36 sps:$4 sm:$0xff]  }
 0x15a   : > { %v11860_v28 = vpop.f32.mrb[24].mxu1 }
 0x15b   : > { %v4519_v31 = vpop.f32.mrb[25].mxu1 }
 0x15c   : > { %v11866_v33 = vpop.f32.mrb[26].mxu1  ;;  %v10623_v31 = vld [vmem:[%s11481_s4 + $0xb44] ss:$36 sps:$4 sm:$0xff]  }
 0x15d   : > { %v4522_v34 = vpop.f32.mrb[27].mxu1 }
 0x15e   : > { %v10625_v34 = vld [vmem:[%s11481_s4 + $0x6d4] ss:$36 sps:$4 sm:$0xff]  }
 0x15f   : > { %4732 = vmatmul.mubr.bf16.gmra.mrb[132].mxu1 %v10584_v27  ;;  %5694 = vmatmul.mubr.bf16.gmra.mrb[68].mxu0 %v10585_v29  ;;  %v10621_v27 = vld [vmem:[%s11481_s4 + $0xaf8] ss:$36 sps:$4 sm:$0xff]  }
 0x160   : > { %4739 = vmatprep.mubr.bf16.mxu1 %v10586_v30  ;;  %5701 = vmatprep.mubr.bf16.mxu0 %v10588_v32  ;;  %v10622_v30 = vld [vmem:[%s11481_s4 + $0x688] ss:$36 sps:$4 sm:$0xff]  }
 0x162   : > { %v11869_v36 = vpop.f32.mrb[28].mxu1 }
 0x163   : > { %v4527_v39 = vpop.f32.mrb[29].mxu1 }
 0x164   : > { %v11874_v42 = vpop.f32.mrb[30].mxu1 }
 0x165   : > { %v4530_v43 = vpop.f32.mrb[31].mxu1 }
 0x166   : > { %v10630_v43 = vld [vmem:[%s11481_s4 + $0xb8c] ss:$36 sps:$4 sm:$0xff]  }
 0x167   : > { %4740 = vmatmul.mubr.bf16.gmra.mrb[136].mxu1 %v10590_v35  ;;  %5702 = vmatmul.mubr.bf16.gmra.mrb[72].mxu0 %v10591_v37 }
 0x168   : > { %4747 = vmatprep.mubr.bf16.mxu1 %v10592_v38  ;;  %5709 = vmatprep.mubr.bf16.mxu0 %v10594_v40  ;;  %v10627_v38 = vld [vmem:[%s11481_s4 + $0xb40] ss:$36 sps:$4 sm:$0xff]   ;;  %v10628_v40 = vld [vmem:[%s11481_s4 + $0x6d0] ss:$36 sps:$4 sm:$0xff]  }
 0x16a   : > { %v11877_v45 = vpop.f32.mrb[32].mxu1 }
 0x16b   : > { %v4535_v50 = vpop.f32.mrb[33].mxu1 }
 0x16c   : > { %v11882_v52 = vpop.f32.mrb[34].mxu1 }
 0x16d   : > { %v4538_v53 = vpop.f32.mrb[35].mxu1 }
 0x16e   : > { %v10634_v53 = vld [vmem:[%s11481_s4 + $0xb88] ss:$36 sps:$4 sm:$0xff]  }
 0x16f   : > { %4748 = vmatmul.mubr.bf16.gmra.mrb[140].mxu1 %v10596_v44  ;;  %5710 = vmatmul.mubr.bf16.gmra.mrb[76].mxu0 %v10597_v47  ;;  %v10632_v47 = vld [vmem:[%s11481_s4 + $0x71c] ss:$36 sps:$4 sm:$0xff]  }
 0x170   : > { %4755 = vmatprep.mubr.bf16.mxu1 %v10598_v48  ;;  %5717 = vmatprep.mubr.bf16.mxu0 %v10600_v51  ;;  %v10729_v48 = vld [vmem:[%s13718_s1 + $0x1d0] sm:$0xff]  }
 0x171   : > { %6091 = vmatpush1.bf16.msra.mxu0 %v10729_v48  ;;  %v10672_v48 = vld [vmem:[%s11481_s4 + $0x8c8] ss:$36 sps:$4 sm:$0xff]  }
 0x172   : > { %v11884_v55 = vpop.f32.mrb[36].mxu1  ;;  %6092 = vmatprep.subr.bf16.mxu0 %v11308_v1 }
 0x173   : > { %v4543_v56 = vpop.f32.mrb[37].mxu1 }
 0x174   : > { %v11887_v59 = vpop.f32.mrb[38].mxu1 }
 0x175   : > { %v4546_v62 = vpop.f32.mrb[39].mxu1 }
 0x176   : > { %v10638_v62 = vld [vmem:[%s11481_s4 + $0x764] ss:$36 sps:$4 sm:$0xff]  }
 0x177   : > { %4756 = vmatmul.mubr.bf16.gmra.mrb[144].mxu1 %v10602_v57  ;;  %5718 = vmatmul.mubr.bf16.gmra.mrb[80].mxu0 %v10603_v60  ;;  %v10635_v57 = vld [vmem:[%s11481_s4 + $0x718] ss:$36 sps:$4 sm:$0xff]  }
 0x178   : > { %4763 = vmatprep.mubr.bf16.mxu1 %v10605_v61  ;;  %5725 = vmatprep.mubr.bf16.mxu0 %v10607_v0  ;;  %v10636_v60 = vld [vmem:[%s11481_s4 + $0xbd4] ss:$36 sps:$4 sm:$0xff]  }
 0x17a   : > { %v11895_v4 = vpop.f32.mrb[40].mxu1 }
 0x17b   : > { %v4551_v5 = vpop.f32.mrb[41].mxu1 }
 0x17c   : > { %v11899_v7 = vpop.f32.mrb[42].mxu1  ;;  %v10640_v5 = vld [vmem:[%s11481_s4 + $0xbd0] ss:$36 sps:$4 sm:$0xff]  }
 0x17d   : > { %v4554_v12 = vpop.f32.mrb[43].mxu1 }
 0x17f   : > { %4764 = vmatmul.mubr.bf16.gmra.mrb[148].mxu1 %v10609_v6  ;;  %5726 = vmatmul.mubr.bf16.gmra.mrb[84].mxu0 %v10610_v9  ;;  %v10641_v9 = vld [vmem:[%s11481_s4 + $0x760] ss:$36 sps:$4 sm:$0xff]  }
 0x180   : > { %4771 = vmatprep.mubr.bf16.mxu1 %v10611_v10  ;;  %5733 = vmatprep.mubr.bf16.mxu0 %v10613_v13  ;;  %v10642_v10 = vld [vmem:[%s11481_s4 + $0xc1c] ss:$36 sps:$4 sm:$0xff]   ;;  %v10644_v13 = vld [vmem:[%s11481_s4 + $0x7ac] ss:$36 sps:$4 sm:$0xff]  }
 0x182   : > { %v11904_v14 = vpop.f32.mrb[44].mxu1 }
 0x183   : > { %v4559_v15 = vpop.f32.mrb[45].mxu1 }
 0x184   : > { %v11907_v18 = vpop.f32.mrb[46].mxu1  ;;  %v10646_v15 = vld [vmem:[%s11481_s4 + $0xc18] ss:$36 sps:$4 sm:$0xff]  }
 0x185   : > { %v4562_v22 = vpop.f32.mrb[47].mxu1 }
 0x186   : > { %v10652_v22 = vld [vmem:[%s11481_s4 + $0xc60] ss:$36 sps:$4 sm:$0xff]  }
 0x187   : > { %4772 = vmatmul.mubr.bf16.gmra.mrb[152].mxu1 %v10615_v17  ;;  %5734 = vmatmul.mubr.bf16.gmra.mrb[88].mxu0 %v10616_v20  ;;  %v10647_v17 = vld [vmem:[%s11481_s4 + $0x7a8] ss:$36 sps:$4 sm:$0xff]  }
 0x188   : > { %4779 = vmatprep.mubr.bf16.mxu1 %v10617_v21  ;;  %5741 = vmatprep.mubr.bf16.mxu0 %v10619_v23  ;;  %v10648_v20 = vld [vmem:[%s11481_s4 + $0xc64] ss:$36 sps:$4 sm:$0xff]   ;;  %v10650_v21 = vld [vmem:[%s11481_s4 + $0x7f4] ss:$36 sps:$4 sm:$0xff]  }
 0x189   : > { %v10653_v23 = vld [vmem:[%s11481_s4 + $0x7f0] ss:$36 sps:$4 sm:$0xff]  }
 0x18a   : > { %v11912_v25 = vpop.f32.mrb[48].mxu1 }
 0x18b   : > { %v4567_v26 = vpop.f32.mrb[49].mxu1 }
 0x18c   : > { %v11915_v29 = vpop.f32.mrb[50].mxu1  ;;  %v10655_v26 = vld [vmem:[%s11481_s4 + $0xcac] ss:$36 sps:$4 sm:$0xff]  }
 0x18d   : > { %v4570_v32 = vpop.f32.mrb[51].mxu1 }
 0x18e   : > { %v10660_v32 = vld [vmem:[%s11481_s4 + $0x838] ss:$36 sps:$4 sm:$0xff]  }
 0x18f   : > { %4780 = vmatmul.mubr.bf16.gmra.mrb[156].mxu1 %v10621_v27  ;;  %5742 = vmatmul.mubr.bf16.gmra.mrb[92].mxu0 %v10622_v30  ;;  %v10657_v27 = vld [vmem:[%s11481_s4 + $0x83c] ss:$36 sps:$4 sm:$0xff]  }
 0x190   : > { %4787 = vmatprep.mubr.bf16.mxu1 %v10623_v31  ;;  %5749 = vmatprep.mubr.bf16.mxu0 %v10625_v34  ;;  %v10754_v30 = vld [vmem:[%s13718_s1 + $0x1d8] sm:$0xff]   ;;  %v10659_v31 = vld [vmem:[%s11481_s4 + $0xca8] ss:$36 sps:$4 sm:$0xff]  }
 0x191   : > { %6093 = vmatpush1.bf16.msra.mxu0 %v10754_v30  ;;  %v10661_v34 = vld [vmem:[%s11481_s4 + $0xcf4] ss:$36 sps:$4 sm:$0xff]  }
 0x192   : > { %v11920_v35 = vpop.f32.mrb[52].mxu1  ;;  %6094 = vmatprep.subr.bf16.mxu0 %v11308_v1  ;;  %v10700_v30 = vld [vmem:[%s11481_s4 + $0xa34] ss:$36 sps:$4 sm:$0xff]  }
 0x193   : > { %v4575_v37 = vpop.f32.mrb[53].mxu1 }
 0x194   : > { %v11923_v39 = vpop.f32.mrb[54].mxu1  ;;  %v10663_v37 = vld [vmem:[%s11481_s4 + $0x884] ss:$36 sps:$4 sm:$0xff]  }
 0x195   : > { %v4578_v44 = vpop.f32.mrb[55].mxu1 }
 0x196   : > { %v10669_v44 = vld [vmem:[%s11481_s4 + $0x8cc] ss:$36 sps:$4 sm:$0xff]  }
 0x197   : > { %4788 = vmatmul.mubr.bf16.gmra.mrb[160].mxu1 %v10627_v38  ;;  %5750 = vmatmul.mubr.bf16.gmra.mrb[96].mxu0 %v10628_v40  ;;  %v10665_v38 = vld [vmem:[%s11481_s4 + $0xcf0] ss:$36 sps:$4 sm:$0xff]   ;;  %v10666_v40 = vld [vmem:[%s11481_s4 + $0x880] ss:$36 sps:$4 sm:$0xff]  }
 0x198   : > { %4795 = vmatprep.mubr.bf16.mxu1 %v10630_v43  ;;  %5757 = vmatprep.mubr.bf16.mxu0 %v10632_v47  ;;  %v10667_v43 = vld [vmem:[%s11481_s4 + $0xd3c] ss:$36 sps:$4 sm:$0xff]  }
 0x199   : > { %v10671_v47 = vld [vmem:[%s11481_s4 + $0xd38] ss:$36 sps:$4 sm:$0xff]  }
 0x19a   : > { %v11931_v50 = vpop.f32.mrb[56].mxu1 }
 0x19b   : > { %v4583_v51 = vpop.f32.mrb[57].mxu1 }
 0x19c   : > { %v11935_v56 = vpop.f32.mrb[58].mxu1  ;;  %v10673_v51 = vld [vmem:[%s11481_s4 + $0xd84] ss:$36 sps:$4 sm:$0xff]  }
 0x19d   : > { %v4586_v61 = vpop.f32.mrb[59].mxu1 }
 0x19e   : > { %v10680_v61 = vld [vmem:[%s11481_s4 + $0xdcc] ss:$36 sps:$4 sm:$0xff]  }
 0x19f   : > { %4796 = vmatmul.mubr.bf16.gmra.mrb[164].mxu1 %v10634_v53  ;;  %5758 = vmatmul.mubr.bf16.gmra.mrb[100].mxu0 %v10635_v57  ;;  %v10675_v53 = vld [vmem:[%s11481_s4 + $0x914] ss:$36 sps:$4 sm:$0xff]   ;;  %v10677_v57 = vld [vmem:[%s11481_s4 + $0xd80] ss:$36 sps:$4 sm:$0xff]  }
 0x1a0   : > { %4803 = vmatprep.mubr.bf16.mxu1 %v10636_v60  ;;  %5765 = vmatprep.mubr.bf16.mxu0 %v10638_v62  ;;  %v10678_v60 = vld [vmem:[%s11481_s4 + $0x910] ss:$36 sps:$4 sm:$0xff]   ;;  %v10682_v62 = vld [vmem:[%s11481_s4 + $0x95c] ss:$36 sps:$4 sm:$0xff]  }
 0x1a2   : > { %v11940_v0 = vpop.f32.mrb[60].mxu1 }
 0x1a3   : > { %v4591_v2 = vpop.f32.mrb[61].mxu1 }
 0x1a4   : > { %v11943_v6 = vpop.f32.mrb[62].mxu1  ;;  %v10779_v2 = vld [vmem:[%s13718_s1 + $0x1e0] sm:$0xff]  }
 0x1a5   : > { %v4594_v12 = vpop.f32.mrb[63].mxu1  ;;  %6095 = vmatpush1.bf16.msra.mxu0 %v10779_v2  ;;  %v10725_v2 = vld [vmem:[%s11481_s4 + $0xb54] ss:$36 sps:$4 sm:$0xff]  }
 0x1a6   : > { %6096 = vmatprep.subr.bf16.mxu0 %v11308_v1  ;;  %v10685_v12 = vld [vmem:[%s11481_s4 + $0x958] ss:$36 sps:$4 sm:$0xff]  }
 0x1a7   : > { %4804 = vmatmul.mubr.bf16.gmra.mrb[168].mxu1 %v10640_v5  ;;  %5766 = vmatmul.mubr.bf16.gmra.mrb[104].mxu0 %v10641_v9  ;;  %v10780_v5 = vld [vmem:[%s13718_s1 + $0x200] ss:$0 sps:$4 sm:$0xff]  }
 0x1a8   : > { %4811 = vmatprep.mubr.bf16.mxu1 %v10642_v10  ;;  %5773 = vmatprep.mubr.bf16.mxu0 %v10644_v13  ;;  %v11982_v9 = vsel %vm4431_vm0, %v10780_v5, 0  ;;  %v10684_v10 = vld [vmem:[%s11481_s4 + $0xdc8] ss:$36 sps:$4 sm:$0xff]   ;;  %v10686_v13 = vld [vmem:[%s11481_s4 + $0xe14] ss:$36 sps:$4 sm:$0xff]  }
 0x1a9   : > { %10270 = vmatprep.subr.msk.bf16.mxu1 %vm4431_vm0, %v10780_v5  ;;  %v10727_v5 = vld [vmem:[%s11481_s4 + $0xfc0] ss:$36 sps:$4 sm:$0xff]  }
 0x1af   : > { %4812 = vmatmul.mubr.bf16.gmra.mrb[172].mxu1 %v10646_v15  ;;  %5774 = vmatmul.mubr.bf16.gmra.mrb[108].mxu0 %v10647_v17  ;;  %v10688_v15 = vld [vmem:[%s11481_s4 + $0x9a4] ss:$36 sps:$4 sm:$0xff]   ;;  %v10690_v17 = vld [vmem:[%s11481_s4 + $0xe10] ss:$36 sps:$4 sm:$0xff]  }
 0x1b0   : > { %4819 = vmatprep.mubr.bf16.mxu1 %v10648_v20  ;;  %5781 = vmatprep.mubr.bf16.mxu0 %v10650_v21  ;;  %v10691_v20 = vld [vmem:[%s11481_s4 + $0x9a0] ss:$36 sps:$4 sm:$0xff]  }
 0x1b1   : > { %v10692_v21 = vld [vmem:[%s11481_s4 + $0xe5c] ss:$36 sps:$4 sm:$0xff]  }
 0x1b7   : > { %4820 = vmatmul.mubr.bf16.gmra.mrb[176].mxu1 %v10652_v22  ;;  %5782 = vmatmul.mubr.bf16.gmra.mrb[112].mxu0 %v10653_v23  ;;  %v10694_v22 = vld [vmem:[%s11481_s4 + $0x9ec] ss:$36 sps:$4 sm:$0xff]   ;;  %v10696_v23 = vld [vmem:[%s11481_s4 + $0xe58] ss:$36 sps:$4 sm:$0xff]  }
 0x1b8   : > { %4827 = vmatprep.mubr.bf16.mxu1 %v10655_v26  ;;  %5789 = vmatprep.mubr.bf16.mxu0 %v10657_v27  ;;  %v10697_v26 = vld [vmem:[%s11481_s4 + $0x9e8] ss:$36 sps:$4 sm:$0xff]  }
 0x1b9   : > { %v10698_v27 = vld [vmem:[%s11481_s4 + $0xea4] ss:$36 sps:$4 sm:$0xff]  }
 0x1bf   : > { %4828 = vmatmul.mubr.bf16.gmra.mrb[180].mxu1 %v10659_v31  ;;  %5790 = vmatmul.mubr.bf16.gmra.mrb[116].mxu0 %v10660_v32  ;;  %v10702_v31 = vld [vmem:[%s11481_s4 + $0xea0] ss:$36 sps:$4 sm:$0xff]   ;;  %v10703_v32 = vld [vmem:[%s11481_s4 + $0xa30] ss:$36 sps:$4 sm:$0xff]  }
 0x1c0   : > { %4835 = vmatprep.mubr.bf16.mxu1 %v10661_v34  ;;  %5797 = vmatprep.mubr.bf16.mxu0 %v10663_v37  ;;  %v10705_v34 = vld [vmem:[%s11481_s4 + $0xeec] ss:$36 sps:$4 sm:$0xff]   ;;  %v10707_v37 = vld [vmem:[%s11481_s4 + $0xa7c] ss:$36 sps:$4 sm:$0xff]  }
 0x1c7   : > { %4836 = vmatmul.mubr.bf16.gmra.mrb[184].mxu1 %v10665_v38  ;;  %5798 = vmatmul.mubr.bf16.gmra.mrb[120].mxu0 %v10666_v40  ;;  %v10805_v38 = vld [vmem:[%s13718_s1 + $0x1e8] sm:$0xff]  }
 0x1c8   : > { %4843 = vmatprep.mubr.bf16.mxu1 %v10667_v43  ;;  %5805 = vmatprep.mubr.bf16.mxu0 %v10669_v44  ;;  %v10709_v40 = vld [vmem:[%s11481_s4 + $0xee8] ss:$36 sps:$4 sm:$0xff]   ;;  %v10710_v43 = vld [vmem:[%s11481_s4 + $0xa78] ss:$36 sps:$4 sm:$0xff]  }
 0x1c9   : > { %6097 = vmatpush1.bf16.msra.mxu0 %v10805_v38  ;;  %v10711_v44 = vld [vmem:[%s11481_s4 + $0xf34] ss:$36 sps:$4 sm:$0xff]  }
 0x1ca   : > { %6098 = vmatprep.subr.bf16.mxu0 %v11308_v1  ;;  %v10753_v38 = vld [vmem:[%s11481_s4 + $0xc70] ss:$36 sps:$4 sm:$0xff]  }
 0x1cf   : > { %4844 = vmatmul.mubr.bf16.gmra.mrb[188].mxu1 %v10671_v47  ;;  %5806 = vmatmul.mubr.bf16.gmra.mrb[124].mxu0 %v10672_v48  ;;  %v10713_v47 = vld [vmem:[%s11481_s4 + $0xac4] ss:$36 sps:$4 sm:$0xff]   ;;  %v10715_v48 = vld [vmem:[%s11481_s4 + $0xf30] ss:$36 sps:$4 sm:$0xff]  }
 0x1d0   : > { %4851 = vmatprep.mubr.bf16.mxu1 %v10673_v51  ;;  %5813 = vmatprep.mubr.bf16.mxu0 %v10675_v53  ;;  %v10716_v51 = vld [vmem:[%s11481_s4 + $0xac0] ss:$36 sps:$4 sm:$0xff]  }
 0x1d1   : > { %v10717_v53 = vld [vmem:[%s11481_s4 + $0xf7c] ss:$36 sps:$4 sm:$0xff]  }
 0x1d7   : > { %4852 = vmatmul.mubr.bf16.gmra.mrb[192].mxu1 %v10677_v57  ;;  %5814 = vmatmul.mubr.bf16.gmra.mrb[128].mxu0 %v10678_v60  ;;  %v10719_v57 = vld [vmem:[%s11481_s4 + $0xb0c] ss:$36 sps:$4 sm:$0xff]   ;;  %v10721_v60 = vld [vmem:[%s11481_s4 + $0xf78] ss:$36 sps:$4 sm:$0xff]  }
 0x1d8   : > { %4859 = vmatprep.mubr.bf16.mxu1 %v10680_v61  ;;  %5821 = vmatprep.mubr.bf16.mxu0 %v10682_v62  ;;  %v10722_v61 = vld [vmem:[%s11481_s4 + $0xb08] ss:$36 sps:$4 sm:$0xff]  }
 0x1d9   : > { %v10723_v62 = vld [vmem:[%s11481_s4 + $0xfc4] ss:$36 sps:$4 sm:$0xff]  }
 0x1df   : > { %4860 = vmatmul.mubr.bf16.gmra.mrb[196].mxu1 %v10684_v10  ;;  %5822 = vmatmul.mubr.bf16.gmra.mrb[132].mxu0 %v10685_v12  ;;  %v10728_v10 = vld [vmem:[%s11481_s4 + $0xb50] ss:$36 sps:$4 sm:$0xff]  }
 0x1e0   : > { %4867 = vmatprep.mubr.bf16.mxu1 %v10686_v13  ;;  %5829 = vmatprep.mubr.bf16.mxu0 %v10688_v15  ;;  %v10730_v12 = vld [vmem:[%s11481_s4 + $0x100c] ss:$36 sps:$4 sm:$0xff]   ;;  %v10732_v13 = vld [vmem:[%s11481_s4 + $0xb9c] ss:$36 sps:$4 sm:$0xff]  }
 0x1e1   : > { %v10830_v15 = vld [vmem:[%s13718_s1 + $0x1f0] sm:$0xff]  }
 0x1e2   : > { %6099 = vmatpush1.bf16.msra.mxu0 %v10830_v15  ;;  %v10778_v15 = vld [vmem:[%s11481_s4 + $0xd90] ss:$36 sps:$4 sm:$0xff]  }
 0x1e3   : > { %6100 = vmatprep.subr.bf16.mxu0 %v11308_v1  ;;  %v10746_v1 = vld [vmem:[%s11481_s4 + $0x1098] ss:$36 sps:$4 sm:$0xff]  }
 0x1e7   : > { %4868 = vmatmul.mubr.bf16.gmra.mrb[200].mxu1 %v10690_v17  ;;  %5830 = vmatmul.mubr.bf16.gmra.mrb[136].mxu0 %v10691_v20  ;;  %v10734_v17 = vld [vmem:[%s11481_s4 + $0x1008] ss:$36 sps:$4 sm:$0xff]   ;;  %v10735_v20 = vld [vmem:[%s11481_s4 + $0xb98] ss:$36 sps:$4 sm:$0xff]  }
 0x1e8   : > { %4875 = vmatprep.mubr.bf16.mxu1 %v10692_v21  ;;  %5837 = vmatprep.mubr.bf16.mxu0 %v10694_v22  ;;  %v10736_v21 = vld [vmem:[%s11481_s4 + $0x1054] ss:$36 sps:$4 sm:$0xff]   ;;  %v10738_v22 = vld [vmem:[%s11481_s4 + $0xbe4] ss:$36 sps:$4 sm:$0xff]  }
 0x1ef   : > { %4876 = vmatmul.mubr.bf16.gmra.mrb[204].mxu1 %v10696_v23  ;;  %5838 = vmatmul.mubr.bf16.gmra.mrb[140].mxu0 %v10697_v26  ;;  %v10740_v23 = vld [vmem:[%s11481_s4 + $0x1050] ss:$36 sps:$4 sm:$0xff]   ;;  %v10741_v26 = vld [vmem:[%s11481_s4 + $0xbe0] ss:$36 sps:$4 sm:$0xff]  }
 0x1f0   : > { %4883 = vmatprep.mubr.bf16.mxu1 %v10698_v27  ;;  %5845 = vmatprep.mubr.bf16.mxu0 %v10700_v30  ;;  %v10742_v27 = vld [vmem:[%s11481_s4 + $0x109c] ss:$36 sps:$4 sm:$0xff]   ;;  %v10744_v30 = vld [vmem:[%s11481_s4 + $0xc2c] ss:$36 sps:$4 sm:$0xff]  }
 0x1f7   : > { %4884 = vmatmul.mubr.bf16.gmra.mrb[208].mxu1 %v10702_v31  ;;  %5846 = vmatmul.mubr.bf16.gmra.mrb[144].mxu0 %v10703_v32  ;;  %v10747_v31 = vld [vmem:[%s11481_s4 + $0xc28] ss:$36 sps:$4 sm:$0xff]  }
 0x1f8   : > { %4891 = vmatprep.mubr.bf16.mxu1 %v10705_v34  ;;  %5853 = vmatprep.mubr.bf16.mxu0 %v10707_v37  ;;  %v10748_v32 = vld [vmem:[%s11481_s4 + $0x10e4] ss:$36 sps:$4 sm:$0xff]   ;;  %v10750_v34 = vld [vmem:[%s11481_s4 + $0xc74] ss:$36 sps:$4 sm:$0xff]  }
 0x1f9   : > { %v10752_v37 = vld [vmem:[%s11481_s4 + $0x10e0] ss:$36 sps:$4 sm:$0xff]  }
 0x1ff   : > { %4892 = vmatmul.mubr.bf16.gmra.mrb[212].mxu1 %v10709_v40  ;;  %5854 = vmatmul.mubr.bf16.gmra.mrb[148].mxu0 %v10710_v43  ;;  %v10755_v40 = vld [vmem:[%s11481_s4 + $0x112c] ss:$36 sps:$4 sm:$0xff]   ;;  %v10757_v43 = vld [vmem:[%s11481_s4 + $0xcbc] ss:$36 sps:$4 sm:$0xff]  }
 0x200   : > { %4899 = vmatprep.mubr.bf16.mxu1 %v10711_v44  ;;  %5861 = vmatprep.mubr.bf16.mxu0 %v10713_v47  ;;  %v10855_v44 = vld [vmem:[%s13718_s1 + $0x1f8] sm:$0xff]   ;;  %v10759_v47 = vld [vmem:[%s11481_s4 + $0x1128] ss:$36 sps:$4 sm:$0xff]  }
 0x201   : > { %6101 = vmatpush1.bf16.msra.mxu0 %v10855_v44  ;;  %v10808_v44 = vld [vmem:[%s11481_s4 + $0xefc] ss:$36 sps:$4 sm:$0xff]  }
 0x207   : > { %4900 = vmatmul.mubr.bf16.gmra.mrb[216].mxu1 %v10715_v48  ;;  %5862 = vmatmul.mubr.bf16.gmra.mrb[152].mxu0 %v10716_v51  ;;  %v10760_v48 = vld [vmem:[%s11481_s4 + $0xcb8] ss:$36 sps:$4 sm:$0xff]  }
 0x208   : > { %4907 = vmatprep.mubr.bf16.mxu1 %v10717_v53  ;;  %5869 = vmatprep.mubr.bf16.mxu0 %v10719_v57  ;;  %v10761_v51 = vld [vmem:[%s11481_s4 + $0x1174] ss:$36 sps:$4 sm:$0xff]   ;;  %v10763_v53 = vld [vmem:[%s11481_s4 + $0xd04] ss:$36 sps:$4 sm:$0xff]  }
 0x209   : > { %v10765_v57 = vld [vmem:[%s11481_s4 + $0x1170] ss:$36 sps:$4 sm:$0xff]  }
 0x20f   : > { %4908 = vmatmul.mubr.bf16.gmra.mrb[220].mxu1 %v10721_v60  ;;  %5870 = vmatmul.mubr.bf16.gmra.mrb[156].mxu0 %v10722_v61  ;;  %v10766_v60 = vld [vmem:[%s11481_s4 + $0xd00] ss:$36 sps:$4 sm:$0xff]  }
 0x210   : > { %4915 = vmatprep.mubr.bf16.mxu1 %v10723_v62  ;;  %5877 = vmatprep.mubr.bf16.mxu0 %v10725_v2  ;;  %v10767_v61 = vld [vmem:[%s11481_s4 + $0x11bc] ss:$36 sps:$4 sm:$0xff]   ;;  %v10769_v62 = vld [vmem:[%s11481_s4 + $0xd4c] ss:$36 sps:$4 sm:$0xff]  }
 0x211   : > { %v10771_v2 = vld [vmem:[%s11481_s4 + $0x11b8] ss:$36 sps:$4 sm:$0xff]  }
 0x217   : > { %4916 = vmatmul.mubr.bf16.gmra.mrb[224].mxu1 %v10727_v5  ;;  %5878 = vmatmul.mubr.bf16.gmra.mrb[160].mxu0 %v10728_v10  ;;  %v10772_v5 = vld [vmem:[%s11481_s4 + $0xd48] ss:$36 sps:$4 sm:$0xff]  }
 0x218   : > { %4923 = vmatprep.mubr.bf16.mxu1 %v10730_v12  ;;  %5885 = vmatprep.mubr.bf16.mxu0 %v10732_v13  ;;  %v10775_v10 = vld [vmem:[%s11481_s4 + $0x48c] ss:$36 sps:$4 sm:$0xff]   ;;  %v10776_v12 = vld [vmem:[%s11481_s4 + $0xd94] ss:$36 sps:$4 sm:$0xff]  }
 0x219   : > { %v10773_v13 = vld [vmem:[%s11481_s4 + $0x488] ss:$36 sps:$4 sm:$0xff]  }
 0x21f   : > { %4924 = vmatmul.mubr.bf16.gmra.mrb[228].mxu1 %v10734_v17  ;;  %5886 = vmatmul.mubr.bf16.gmra.mrb[164].mxu0 %v10735_v20  ;;  %v10781_v17 = vld [vmem:[%s11481_s4 + $0x4d4] ss:$36 sps:$4 sm:$0xff]   ;;  %v10783_v20 = vld [vmem:[%s11481_s4 + $0xddc] ss:$36 sps:$4 sm:$0xff]  }
 0x220   : > { %4931 = vmatprep.mubr.bf16.mxu1 %v10736_v21  ;;  %5893 = vmatprep.mubr.bf16.mxu0 %v10738_v22  ;;  %v10785_v21 = vld [vmem:[%s11481_s4 + $0x4d0] ss:$36 sps:$4 sm:$0xff]   ;;  %v10786_v22 = vld [vmem:[%s11481_s4 + $0xdd8] ss:$36 sps:$4 sm:$0xff]  }
 0x227   : > { %4932 = vmatmul.mubr.bf16.gmra.mrb[232].mxu1 %v10740_v23  ;;  %5894 = vmatmul.mubr.bf16.gmra.mrb[168].mxu0 %v10741_v26  ;;  %v10787_v23 = vld [vmem:[%s11481_s4 + $0x51c] ss:$36 sps:$4 sm:$0xff]   ;;  %v10789_v26 = vld [vmem:[%s11481_s4 + $0xe24] ss:$36 sps:$4 sm:$0xff]  }
 0x228   : > { %4939 = vmatprep.mubr.bf16.mxu1 %v10742_v27  ;;  %5901 = vmatprep.mubr.bf16.mxu0 %v10744_v30  ;;  %v10791_v27 = vld [vmem:[%s11481_s4 + $0x518] ss:$36 sps:$4 sm:$0xff]   ;;  %v10792_v30 = vld [vmem:[%s11481_s4 + $0xe20] ss:$36 sps:$4 sm:$0xff]  }
 0x22f   : > { %4940 = vmatmul.mubr.bf16.gmra.mrb[236].mxu1 %v10746_v1  ;;  %5902 = vmatmul.mubr.bf16.gmra.mrb[172].mxu0 %v10747_v31  ;;  %v10793_v1 = vld [vmem:[%s11481_s4 + $0x564] ss:$36 sps:$4 sm:$0xff]  }
 0x230   : > { %4947 = vmatprep.mubr.bf16.mxu1 %v10748_v32  ;;  %5909 = vmatprep.mubr.bf16.mxu0 %v10750_v34  ;;  %v10797_v31 = vld [vmem:[%s11481_s4 + $0x560] ss:$36 sps:$4 sm:$0xff]   ;;  %v10798_v32 = vld [vmem:[%s11481_s4 + $0xe68] ss:$36 sps:$4 sm:$0xff]  }
 0x231   : > { %v10799_v34 = vld [vmem:[%s11481_s4 + $0x5ac] ss:$36 sps:$4 sm:$0xff]  }
 0x237   : > { %4948 = vmatmul.mubr.bf16.gmra.mrb[240].mxu1 %v10752_v37  ;;  %5910 = vmatmul.mubr.bf16.gmra.mrb[176].mxu0 %v10753_v38  ;;  %v10801_v37 = vld [vmem:[%s11481_s4 + $0xeb4] ss:$36 sps:$4 sm:$0xff]   ;;  %v10803_v38 = vld [vmem:[%s11481_s4 + $0x5a8] ss:$36 sps:$4 sm:$0xff]  }
 0x238   : > { %4955 = vmatprep.mubr.bf16.mxu1 %v10755_v40  ;;  %5917 = vmatprep.mubr.bf16.mxu0 %v10757_v43  ;;  %v10804_v40 = vld [vmem:[%s11481_s4 + $0xeb0] ss:$36 sps:$4 sm:$0xff]  }
 0x239   : > { %v10806_v43 = vld [vmem:[%s11481_s4 + $0x5f4] ss:$36 sps:$4 sm:$0xff]  }
 0x23f   : > { %4956 = vmatmul.mubr.bf16.gmra.mrb[244].mxu1 %v10759_v47  ;;  %5918 = vmatmul.mubr.bf16.gmra.mrb[180].mxu0 %v10760_v48  ;;  %v10810_v47 = vld [vmem:[%s11481_s4 + $0x5f0] ss:$36 sps:$4 sm:$0xff]   ;;  %v10811_v48 = vld [vmem:[%s11481_s4 + $0xef8] ss:$36 sps:$4 sm:$0xff]  }
 0x240   : > { %4963 = vmatprep.mubr.bf16.mxu1 %v10761_v51  ;;  %5925 = vmatprep.mubr.bf16.mxu0 %v10763_v53  ;;  %v10812_v51 = vld [vmem:[%s11481_s4 + $0x63c] ss:$36 sps:$4 sm:$0xff]   ;;  %v10814_v53 = vld [vmem:[%s11481_s4 + $0xf44] ss:$36 sps:$4 sm:$0xff]  }
 0x247   : > { %4964 = vmatmul.mubr.bf16.gmra.mrb[248].mxu1 %v10765_v57  ;;  %5926 = vmatmul.mubr.bf16.gmra.mrb[184].mxu0 %v10766_v60  ;;  %v10816_v57 = vld [vmem:[%s11481_s4 + $0x638] ss:$36 sps:$4 sm:$0xff]   ;;  %v10817_v60 = vld [vmem:[%s11481_s4 + $0xf40] ss:$36 sps:$4 sm:$0xff]  }
 0x248   : > { %4971 = vmatprep.mubr.bf16.mxu1 %v10767_v61  ;;  %5933 = vmatprep.mubr.bf16.mxu0 %v10769_v62  ;;  %v10818_v61 = vld [vmem:[%s11481_s4 + $0x684] ss:$36 sps:$4 sm:$0xff]   ;;  %v10820_v62 = vld [vmem:[%s11481_s4 + $0xf8c] ss:$36 sps:$4 sm:$0xff]  }
 0x24f   : > { %4972 = vmatmul.mubr.bf16.gmra.mrb[252].mxu1 %v10771_v2  ;;  %5934 = vmatmul.mubr.bf16.gmra.mrb[188].mxu0 %v10772_v5  ;;  %v10822_v2 = vld [vmem:[%s11481_s4 + $0x680] ss:$36 sps:$4 sm:$0xff]   ;;  %v10823_v5 = vld [vmem:[%s11481_s4 + $0xf88] ss:$36 sps:$4 sm:$0xff]  }
 0x250   : > { %5140 = vmatprep.mubr.bf16.mxu1 %v10775_v10  ;;  %5941 = vmatprep.mubr.bf16.mxu0 %v10776_v12  ;;  %v10824_v10 = vld [vmem:[%s11481_s4 + $0x6cc] ss:$36 sps:$4 sm:$0xff]   ;;  %v10826_v12 = vld [vmem:[%s11481_s4 + $0xfd4] ss:$36 sps:$4 sm:$0xff]  }
 0x257   : > { %5141 = vmatmul.mubr.bf16.vlgmr.msra.gmra.mrb[64].mxu1 %v10773_v13  ;;  %5942 = vmatmul.mubr.bf16.gmra.mrb[192].mxu0 %v10778_v15  ;;  %v10828_v13 = vld [vmem:[%s11481_s4 + $0x6c8] ss:$36 sps:$4 sm:$0xff]   ;;  %v10829_v15 = vld [vmem:[%s11481_s4 + $0xfd0] ss:$36 sps:$4 sm:$0xff]  }
 0x258   : > { %9469 = vmatpush3.bf16.msra.mxu1 %v11982_v9  ;;  %5148 = vmatprep.mubr.bf16.mxu1 %v10781_v17  ;;  %v10795_v9 = vld [vmem:[%s11481_s4 + $0xe6c] ss:$36 sps:$4 sm:$0xff]   ;;  %v10831_v17 = vld [vmem:[%s11481_s4 + $0x714] ss:$36 sps:$4 sm:$0xff]  }
 0x259   : > { %5949 = vmatprep.mubr.bf16.mxu0 %v10783_v20  ;;  %v10833_v20 = vld [vmem:[%s11481_s4 + $0x101c] ss:$36 sps:$4 sm:$0xff]  }
 0x25f   : > { %5149 = vmatmul.mubr.bf16.gmra.mrb[68].mxu1 %v10785_v21  ;;  %5950 = vmatmul.mubr.bf16.gmra.mrb[196].mxu0 %v10786_v22  ;;  %v10835_v21 = vld [vmem:[%s11481_s4 + $0x710] ss:$36 sps:$4 sm:$0xff]   ;;  %v10836_v22 = vld [vmem:[%s11481_s4 + $0x1018] ss:$36 sps:$4 sm:$0xff]  }
 0x260   : > { %5156 = vmatprep.mubr.bf16.mxu1 %v10787_v23  ;;  %5957 = vmatprep.mubr.bf16.mxu0 %v10789_v26  ;;  %v10837_v23 = vld [vmem:[%s11481_s4 + $0x75c] ss:$36 sps:$4 sm:$0xff]   ;;  %v10839_v26 = vld [vmem:[%s11481_s4 + $0x1064] ss:$36 sps:$4 sm:$0xff]  }
 0x267   : > { %5157 = vmatmul.mubr.bf16.gmra.mrb[72].mxu1 %v10791_v27  ;;  %5958 = vmatmul.mubr.bf16.gmra.mrb[200].mxu0 %v10792_v30  ;;  %v10841_v27 = vld [vmem:[%s11481_s4 + $0x758] ss:$36 sps:$4 sm:$0xff]   ;;  %v10842_v30 = vld [vmem:[%s11481_s4 + $0x1060] ss:$36 sps:$4 sm:$0xff]  }
 0x268   : > { %5164 = vmatprep.mubr.bf16.mxu1 %v10793_v1  ;;  %5965 = vmatprep.mubr.bf16.mxu0 %v10795_v9  ;;  %v10843_v1 = vld [vmem:[%s11481_s4 + $0x7a4] ss:$36 sps:$4 sm:$0xff]   ;;  %v10845_v9 = vld [vmem:[%s11481_s4 + $0x10ac] ss:$36 sps:$4 sm:$0xff]  }
 0x26f   : > { %5165 = vmatmul.mubr.bf16.gmra.mrb[76].mxu1 %v10797_v31  ;;  %5966 = vmatmul.mubr.bf16.gmra.mrb[204].mxu0 %v10798_v32  ;;  %v10847_v31 = vld [vmem:[%s11481_s4 + $0x7a0] ss:$36 sps:$4 sm:$0xff]   ;;  %v10848_v32 = vld [vmem:[%s11481_s4 + $0x10a8] ss:$36 sps:$4 sm:$0xff]  }
 0x270   : > { %5172 = vmatprep.mubr.bf16.mxu1 %v10799_v34  ;;  %5973 = vmatprep.mubr.bf16.mxu0 %v10801_v37  ;;  %v10849_v34 = vld [vmem:[%s11481_s4 + $0x7ec] ss:$36 sps:$4 sm:$0xff]   ;;  %v10851_v37 = vld [vmem:[%s11481_s4 + $0x10f4] ss:$36 sps:$4 sm:$0xff]  }
 0x277   : > { %5173 = vmatmul.mubr.bf16.gmra.mrb[80].mxu1 %v10803_v38  ;;  %5974 = vmatmul.mubr.bf16.gmra.mrb[208].mxu0 %v10804_v40  ;;  %v10853_v38 = vld [vmem:[%s11481_s4 + $0x7e8] ss:$36 sps:$4 sm:$0xff]   ;;  %v10854_v40 = vld [vmem:[%s11481_s4 + $0x10f0] ss:$36 sps:$4 sm:$0xff]  }
 0x278   : > { %5180 = vmatprep.mubr.bf16.mxu1 %v10806_v43  ;;  %5981 = vmatprep.mubr.bf16.mxu0 %v10808_v44  ;;  %v10856_v43 = vld [vmem:[%s11481_s4 + $0x834] ss:$36 sps:$4 sm:$0xff]   ;;  %v10858_v44 = vld [vmem:[%s11481_s4 + $0x113c] ss:$36 sps:$4 sm:$0xff]  }
 0x27f   : > { %5181 = vmatmul.mubr.bf16.gmra.mrb[84].mxu1 %v10810_v47  ;;  %5982 = vmatmul.mubr.bf16.gmra.mrb[212].mxu0 %v10811_v48  ;;  %v10860_v47 = vld [vmem:[%s11481_s4 + $0x830] ss:$36 sps:$4 sm:$0xff]   ;;  %v10861_v48 = vld [vmem:[%s11481_s4 + $0x1138] ss:$36 sps:$4 sm:$0xff]  }
 0x280   : > { %5188 = vmatprep.mubr.bf16.mxu1 %v10812_v51  ;;  %5989 = vmatprep.mubr.bf16.mxu0 %v10814_v53  ;;  %v10862_v51 = vld [vmem:[%s11481_s4 + $0x87c] ss:$36 sps:$4 sm:$0xff]   ;;  %v10864_v53 = vld [vmem:[%s11481_s4 + $0x1184] ss:$36 sps:$4 sm:$0xff]  }
 0x287   : > { %5189 = vmatmul.mubr.bf16.gmra.mrb[88].mxu1 %v10816_v57  ;;  %5990 = vmatmul.mubr.bf16.gmra.mrb[216].mxu0 %v10817_v60  ;;  %v10866_v57 = vld [vmem:[%s11481_s4 + $0x878] ss:$36 sps:$4 sm:$0xff]   ;;  %v10867_v60 = vld [vmem:[%s11481_s4 + $0x1180] ss:$36 sps:$4 sm:$0xff]  }
 0x288   : > { %5196 = vmatprep.mubr.bf16.mxu1 %v10818_v61  ;;  %5997 = vmatprep.mubr.bf16.mxu0 %v10820_v62  ;;  %v10868_v61 = vld [vmem:[%s11481_s4 + $0x8c4] ss:$36 sps:$4 sm:$0xff]   ;;  %v10870_v62 = vld [vmem:[%s11481_s4 + $0x11cc] ss:$36 sps:$4 sm:$0xff]  }
 0x28f   : > { %5197 = vmatmul.mubr.bf16.gmra.mrb[92].mxu1 %v10822_v2  ;;  %5998 = vmatmul.mubr.bf16.gmra.mrb[220].mxu0 %v10823_v5  ;;  %v10872_v2 = vld [vmem:[%s11481_s4 + $0x8c0] ss:$36 sps:$4 sm:$0xff]   ;;  %v10873_v5 = vld [vmem:[%s11481_s4 + $0x11c8] ss:$36 sps:$4 sm:$0xff]  }
 0x290   : > { %5204 = vmatprep.mubr.bf16.mxu1 %v10824_v10  ;;  %6005 = vmatprep.mubr.bf16.mxu0 %v10826_v12  ;;  %v10874_v10 = vld [vmem:[%s11481_s4 + $0x90c] ss:$36 sps:$4 sm:$0xff]   ;;  %v10878_v12 = vld [vmem:[%s11481_s4 + $0x1c] ss:$36 sps:$4 sm:$0xff]  }
 0x297   : > { %5205 = vmatmul.mubr.bf16.gmra.mrb[96].mxu1 %v10828_v13  ;;  %6006 = vmatmul.mubr.bf16.gmra.mrb[224].mxu0 %v10829_v15  ;;  %v10879_v13 = vld [vmem:[%s11481_s4 + $0x908] ss:$36 sps:$4 sm:$0xff]   ;;  %v10876_v15 = vld [vmem:[%s11481_s4 + $0x18] ss:$36 sps:$4 sm:$0xff]  }
 0x298   : > { %5212 = vmatprep.mubr.bf16.mxu1 %v10831_v17  ;;  %6013 = vmatprep.mubr.bf16.mxu0 %v10833_v20  ;;  %v10880_v17 = vld [vmem:[%s11481_s4 + $0x954] ss:$36 sps:$4 sm:$0xff]   ;;  %v10882_v20 = vld [vmem:[%s11481_s4 + $0x64] ss:$36 sps:$4 sm:$0xff]  }
 0x29f   : > { %5213 = vmatmul.mubr.bf16.gmra.mrb[100].mxu1 %v10835_v21  ;;  %6014 = vmatmul.mubr.bf16.gmra.mrb[228].mxu0 %v10836_v22  ;;  %v10884_v21 = vld [vmem:[%s11481_s4 + $0x950] ss:$36 sps:$4 sm:$0xff]   ;;  %v10885_v22 = vld [vmem:[%s11481_s4 + $0x60] ss:$36 sps:$4 sm:$0xff]  }
 0x2a0   : > { %5220 = vmatprep.mubr.bf16.mxu1 %v10837_v23  ;;  %6021 = vmatprep.mubr.bf16.mxu0 %v10839_v26  ;;  %v10886_v23 = vld [vmem:[%s11481_s4 + $0x99c] ss:$36 sps:$4 sm:$0xff]   ;;  %v10888_v26 = vld [vmem:[%s11481_s4 + $0xac] ss:$36 sps:$4 sm:$0xff]  }
 0x2a7   : > { %5221 = vmatmul.mubr.bf16.gmra.mrb[104].mxu1 %v10841_v27  ;;  %6022 = vmatmul.mubr.bf16.gmra.mrb[232].mxu0 %v10842_v30  ;;  %v10890_v27 = vld [vmem:[%s11481_s4 + $0x998] ss:$36 sps:$4 sm:$0xff]   ;;  %v10891_v30 = vld [vmem:[%s11481_s4 + $0xa8] ss:$36 sps:$4 sm:$0xff]  }
 0x2a8   : > { %5228 = vmatprep.mubr.bf16.mxu1 %v10843_v1  ;;  %6029 = vmatprep.mubr.bf16.mxu0 %v10845_v9  ;;  %v10892_v1 = vld [vmem:[%s11481_s4 + $0x9e4] ss:$36 sps:$4 sm:$0xff]   ;;  %v10894_v9 = vld [vmem:[%s11481_s4 + $0xf4] ss:$36 sps:$4 sm:$0xff]  }
 0x2af   : > { %5229 = vmatmul.mubr.bf16.gmra.mrb[108].mxu1 %v10847_v31  ;;  %6030 = vmatmul.mubr.bf16.gmra.mrb[236].mxu0 %v10848_v32  ;;  %v10896_v31 = vld [vmem:[%s11481_s4 + $0x9e0] ss:$36 sps:$4 sm:$0xff]   ;;  %v10897_v32 = vld [vmem:[%s11481_s4 + $0xf0] ss:$36 sps:$4 sm:$0xff]  }
 0x2b0   : > { %5236 = vmatprep.mubr.bf16.mxu1 %v10849_v34  ;;  %6037 = vmatprep.mubr.bf16.mxu0 %v10851_v37  ;;  %v10898_v34 = vld [vmem:[%s11481_s4 + $0xa2c] ss:$36 sps:$4 sm:$0xff]   ;;  %v10900_v37 = vld [vmem:[%s11481_s4 + $0x13c] ss:$36 sps:$4 sm:$0xff]  }
 0x2b7   : > { %5237 = vmatmul.mubr.bf16.gmra.mrb[112].mxu1 %v10853_v38  ;;  %6038 = vmatmul.mubr.bf16.gmra.mrb[240].mxu0 %v10854_v40  ;;  %v10902_v38 = vld [vmem:[%s11481_s4 + $0xa28] ss:$36 sps:$4 sm:$0xff]   ;;  %v10903_v40 = vld [vmem:[%s11481_s4 + $0x138] ss:$36 sps:$4 sm:$0xff]  }
 0x2b8   : > { %5244 = vmatprep.mubr.bf16.mxu1 %v10856_v43  ;;  %6045 = vmatprep.mubr.bf16.mxu0 %v10858_v44  ;;  %v10904_v43 = vld [vmem:[%s11481_s4 + $0xa74] ss:$36 sps:$4 sm:$0xff]   ;;  %v10906_v44 = vld [vmem:[%s11481_s4 + $0x184] ss:$36 sps:$4 sm:$0xff]  }
 0x2bf   : > { %5245 = vmatmul.mubr.bf16.gmra.mrb[116].mxu1 %v10860_v47  ;;  %6046 = vmatmul.mubr.bf16.gmra.mrb[244].mxu0 %v10861_v48  ;;  %v10908_v47 = vld [vmem:[%s11481_s4 + $0xa70] ss:$36 sps:$4 sm:$0xff]   ;;  %v10909_v48 = vld [vmem:[%s11481_s4 + $0x180] ss:$36 sps:$4 sm:$0xff]  }
 0x2c0   : > { %5252 = vmatprep.mubr.bf16.mxu1 %v10862_v51  ;;  %6053 = vmatprep.mubr.bf16.mxu0 %v10864_v53  ;;  %v10910_v51 = vld [vmem:[%s11481_s4 + $0xabc] ss:$36 sps:$4 sm:$0xff]   ;;  %v10912_v53 = vld [vmem:[%s11481_s4 + $0x1cc] ss:$36 sps:$4 sm:$0xff]  }
 0x2c7   : > { %5253 = vmatmul.mubr.bf16.gmra.mrb[120].mxu1 %v10866_v57  ;;  %6054 = vmatmul.mubr.bf16.gmra.mrb[248].mxu0 %v10867_v60  ;;  %v10914_v57 = vld [vmem:[%s11481_s4 + $0xab8] ss:$36 sps:$4 sm:$0xff]   ;;  %v10915_v60 = vld [vmem:[%s11481_s4 + $0x1c8] ss:$36 sps:$4 sm:$0xff]  }
 0x2c8   : > { %5260 = vmatprep.mubr.bf16.mxu1 %v10868_v61  ;;  %6061 = vmatprep.mubr.bf16.mxu0 %v10870_v62  ;;  %v10916_v61 = vld [vmem:[%s11481_s4 + $0xb04] ss:$36 sps:$4 sm:$0xff]   ;;  %v10918_v62 = vld [vmem:[%s11481_s4 + $0x214] ss:$36 sps:$4 sm:$0xff]  }
 0x2cf   : > { %5261 = vmatmul.mubr.bf16.gmra.mrb[124].mxu1 %v10872_v2  ;;  %6062 = vmatmul.mubr.bf16.gmra.mrb[252].mxu0 %v10873_v5  ;;  %v10920_v2 = vld [vmem:[%s11481_s4 + $0xb00] ss:$36 sps:$4 sm:$0xff]   ;;  %v10921_v5 = vld [vmem:[%s11481_s4 + $0x210] ss:$36 sps:$4 sm:$0xff]  }
 0x2d0   : > { %5268 = vmatprep.mubr.bf16.mxu1 %v10874_v10  ;;  %6102 = vmatprep.mubr.bf16.mxu0 %v10878_v12  ;;  %v10922_v10 = vld [vmem:[%s11481_s4 + $0xb4c] ss:$36 sps:$4 sm:$0xff]   ;;  %v10924_v12 = vld [vmem:[%s11481_s4 + $0x25c] ss:$36 sps:$4 sm:$0xff]  }
 0x2d7   : > { %5269 = vmatmul.mubr.bf16.gmra.mrb[128].mxu1 %v10879_v13  ;;  %6103 = vmatmul.mubr.bf16.vlgmr.msra.gmra.mrb[0].mxu0 %v10876_v15  ;;  %v10926_v13 = vld [vmem:[%s11481_s4 + $0xb48] ss:$36 sps:$4 sm:$0xff]   ;;  %v10927_v15 = vld [vmem:[%s11481_s4 + $0x258] ss:$36 sps:$4 sm:$0xff]  }
 0x2d8   : > { %5276 = vmatprep.mubr.bf16.mxu1 %v10880_v17  ;;  %6110 = vmatprep.mubr.bf16.mxu0 %v10882_v20  ;;  %v10928_v17 = vld [vmem:[%s11481_s4 + $0xb94] ss:$36 sps:$4 sm:$0xff]   ;;  %v10930_v20 = vld [vmem:[%s11481_s4 + $0x2a4] ss:$36 sps:$4 sm:$0xff]  }
 0x2df   : > { %5277 = vmatmul.mubr.bf16.gmra.mrb[132].mxu1 %v10884_v21  ;;  %6111 = vmatmul.mubr.bf16.gmra.mrb[4].mxu0 %v10885_v22  ;;  %v10932_v21 = vld [vmem:[%s11481_s4 + $0xb90] ss:$36 sps:$4 sm:$0xff]   ;;  %v10933_v22 = vld [vmem:[%s11481_s4 + $0x2a0] ss:$36 sps:$4 sm:$0xff]  }
 0x2e0   : > { %5284 = vmatprep.mubr.bf16.mxu1 %v10886_v23  ;;  %6118 = vmatprep.mubr.bf16.mxu0 %v10888_v26  ;;  %v10934_v23 = vld [vmem:[%s11481_s4 + $0xbdc] ss:$36 sps:$4 sm:$0xff]   ;;  %v10936_v26 = vld [vmem:[%s11481_s4 + $0x2ec] ss:$36 sps:$4 sm:$0xff]  }
 0x2e7   : > { %5285 = vmatmul.mubr.bf16.gmra.mrb[136].mxu1 %v10890_v27  ;;  %6119 = vmatmul.mubr.bf16.gmra.mrb[8].mxu0 %v10891_v30  ;;  %v10938_v27 = vld [vmem:[%s11481_s4 + $0xbd8] ss:$36 sps:$4 sm:$0xff]   ;;  %v10939_v30 = vld [vmem:[%s11481_s4 + $0x2e8] ss:$36 sps:$4 sm:$0xff]  }
 0x2e8   : > { %5292 = vmatprep.mubr.bf16.mxu1 %v10892_v1  ;;  %6126 = vmatprep.mubr.bf16.mxu0 %v10894_v9  ;;  %v10940_v1 = vld [vmem:[%s11481_s4 + $0xc24] ss:$36 sps:$4 sm:$0xff]   ;;  %v10942_v9 = vld [vmem:[%s11481_s4 + $0x334] ss:$36 sps:$4 sm:$0xff]  }
 0x2ef   : > { %5293 = vmatmul.mubr.bf16.gmra.mrb[140].mxu1 %v10896_v31  ;;  %6127 = vmatmul.mubr.bf16.gmra.mrb[12].mxu0 %v10897_v32 }
 0x2f0   : > { %5300 = vmatprep.mubr.bf16.mxu1 %v10898_v34  ;;  %6134 = vmatprep.mubr.bf16.mxu0 %v10900_v37  ;;  %v10944_v34 = vld [vmem:[%s11481_s4 + $0xc20] ss:$36 sps:$4 sm:$0xff]  }
 0x2f7   : > { %5301 = vmatmul.mubr.bf16.gmra.mrb[144].mxu1 %v10902_v38  ;;  %6135 = vmatmul.mubr.bf16.gmra.mrb[16].mxu0 %v10903_v40  ;;  %v10945_v38 = vld [vmem:[%s11481_s4 + $0x330] ss:$36 sps:$4 sm:$0xff]  }
 0x2f8   : > { %5308 = vmatprep.mubr.bf16.mxu1 %v10904_v43  ;;  %6142 = vmatprep.mubr.bf16.mxu0 %v10906_v44  ;;  %v10946_v40 = vld [vmem:[%s11481_s4 + $0xc6c] ss:$36 sps:$4 sm:$0xff]   ;;  %v10948_v44 = vld [vmem:[%s11481_s4 + $0x37c] ss:$36 sps:$4 sm:$0xff]  }
 0x2ff   : > { %5309 = vmatmul.mubr.bf16.gmra.mrb[148].mxu1 %v10908_v47  ;;  %6143 = vmatmul.mubr.bf16.gmra.mrb[20].mxu0 %v10909_v48 }
 0x300   : > { %5316 = vmatprep.mubr.bf16.mxu1 %v10910_v51  ;;  %6150 = vmatprep.mubr.bf16.mxu0 %v10912_v53  ;;  %v10950_v51 = vld [vmem:[%s11481_s4 + $0xc68] ss:$36 sps:$4 sm:$0xff]  }
 0x307   : > { %5317 = vmatmul.mubr.bf16.gmra.mrb[152].mxu1 %v10914_v57  ;;  %6151 = vmatmul.mubr.bf16.gmra.mrb[24].mxu0 %v10915_v60  ;;  %v10951_v57 = vld [vmem:[%s11481_s4 + $0x378] ss:$36 sps:$4 sm:$0xff]  }
 0x308   : > { %5324 = vmatprep.mubr.bf16.mxu1 %v10916_v61  ;;  %6158 = vmatprep.mubr.bf16.mxu0 %v10918_v62  ;;  %v10952_v60 = vld [vmem:[%s11481_s4 + $0xcb4] ss:$36 sps:$4 sm:$0xff]   ;;  %v10954_v62 = vld [vmem:[%s11481_s4 + $0x3c4] ss:$36 sps:$4 sm:$0xff]  }
 0x30f   : > { %5325 = vmatmul.mubr.bf16.gmra.mrb[156].mxu1 %v10920_v2  ;;  %6159 = vmatmul.mubr.bf16.gmra.mrb[28].mxu0 %v10921_v5 }
 0x310   : > { %5332 = vmatprep.mubr.bf16.mxu1 %v10922_v10  ;;  %6166 = vmatprep.mubr.bf16.mxu0 %v10924_v12  ;;  %v10956_v10 = vld [vmem:[%s11481_s4 + $0xcb0] ss:$36 sps:$4 sm:$0xff]  }
 0x317   : > { %5333 = vmatmul.mubr.bf16.gmra.mrb[160].mxu1 %v10926_v13  ;;  %6167 = vmatmul.mubr.bf16.gmra.mrb[32].mxu0 %v10927_v15  ;;  %v10957_v13 = vld [vmem:[%s11481_s4 + $0x3c0] ss:$36 sps:$4 sm:$0xff]  }
 0x318   : > { %5340 = vmatprep.mubr.bf16.mxu1 %v10928_v17  ;;  %6174 = vmatprep.mubr.bf16.mxu0 %v10930_v20  ;;  %v10958_v15 = vld [vmem:[%s11481_s4 + $0xcfc] ss:$36 sps:$4 sm:$0xff]   ;;  %v10960_v20 = vld [vmem:[%s11481_s4 + $0x40c] ss:$36 sps:$4 sm:$0xff]  }
 0x31f   : > { %5341 = vmatmul.mubr.bf16.gmra.mrb[164].mxu1 %v10932_v21  ;;  %6175 = vmatmul.mubr.bf16.gmra.mrb[36].mxu0 %v10933_v22 }
 0x320   : > { %5348 = vmatprep.mubr.bf16.mxu1 %v10934_v23  ;;  %6182 = vmatprep.mubr.bf16.mxu0 %v10936_v26  ;;  %v10962_v23 = vld [vmem:[%s11481_s4 + $0xcf8] ss:$36 sps:$4 sm:$0xff]  }
 0x327   : > { %5349 = vmatmul.mubr.bf16.gmra.mrb[168].mxu1 %v10938_v27  ;;  %6183 = vmatmul.mubr.bf16.gmra.mrb[40].mxu0 %v10939_v30  ;;  %v10963_v27 = vld [vmem:[%s11481_s4 + $0x408] ss:$36 sps:$4 sm:$0xff]  }
 0x328   : > { %5356 = vmatprep.mubr.bf16.mxu1 %v10940_v1  ;;  %6190 = vmatprep.mubr.bf16.mxu0 %v10942_v9  ;;  %v10964_v30 = vld [vmem:[%s11481_s4 + $0xd44] ss:$36 sps:$4 sm:$0xff]   ;;  %v10966_v9 = vld [vmem:[%s11481_s4 + $0x454] ss:$36 sps:$4 sm:$0xff]  }
 0x32a   : > { %v12165_v31 = vpop.f32.mrb[64].mxu1 }
 0x32b   : > { %v5144_v32 = vpop.f32.mrb[65].mxu1 }
 0x32c   : > { %v12168_v37 = vpop.f32.mrb[66].mxu1 }
 0x32d   : > { %v5147_v43 = vpop.f32.mrb[67].mxu1 }
 0x32e   : > { %v10969_v43 = vld [vmem:[%s11481_s4 + $0x450] ss:$36 sps:$4 sm:$0xff]  }
 0x32f   : > { %5357 = vmatmul.mubr.bf16.gmra.mrb[172].mxu1 %v10944_v34  ;;  %6191 = vmatmul.mubr.bf16.gmra.mrb[44].mxu0 %v10945_v38  ;;  %v10968_v38 = vld [vmem:[%s11481_s4 + $0xd40] ss:$36 sps:$4 sm:$0xff]  }
 0x330   : > { %5364 = vmatprep.mubr.bf16.mxu1 %v10946_v40  ;;  %6198 = vmatprep.mubr.bf16.mxu0 %v10948_v44  ;;  %v10970_v44 = vld [vmem:[%s11481_s4 + $0xd8c] ss:$36 sps:$4 sm:$0xff]  }
 0x332   : > { %v12173_v47 = vpop.f32.mrb[68].mxu1 }
 0x333   : > { %v5152_v48 = vpop.f32.mrb[69].mxu1 }
 0x334   : > { %v12176_v53 = vpop.f32.mrb[70].mxu1 }
 0x335   : > { %v5155_v61 = vpop.f32.mrb[71].mxu1 }
 0x336   : > { %v10974_v61 = vld [vmem:[%s11481_s4 + $0xd88] ss:$36 sps:$4 sm:$0xff]  }
 0x337   : > { %5365 = vmatmul.mubr.bf16.gmra.mrb[176].mxu1 %v10950_v51  ;;  %6199 = vmatmul.mubr.bf16.gmra.mrb[48].mxu0 %v10951_v57  ;;  %v10972_v51 = vld [vmem:[%s11481_s4 + $0x49c] ss:$36 sps:$4 sm:$0xff]  }
 0x338   : > { %5372 = vmatprep.mubr.bf16.mxu1 %v10952_v60  ;;  %6206 = vmatprep.mubr.bf16.mxu0 %v10954_v62 }
 0x33a   : > { %v12181_v2 = vpop.f32.mrb[72].mxu1 }
 0x33b   : > { %v5160_v5 = vpop.f32.mrb[73].mxu1 }
 0x33c   : > { %v12184_v12 = vpop.f32.mrb[74].mxu1  ;;  %v10975_v5 = vld [vmem:[%s11481_s4 + $0x498] ss:$36 sps:$4 sm:$0xff]  }
 0x33d   : > { %v5163_v17 = vpop.f32.mrb[75].mxu1 }
 0x33f   : > { %5373 = vmatmul.mubr.bf16.gmra.mrb[180].mxu1 %v10956_v10  ;;  %6207 = vmatmul.mubr.bf16.gmra.mrb[52].mxu0 %v10957_v13  ;;  %v10976_v10 = vld [vmem:[%s11481_s4 + $0xdd4] ss:$36 sps:$4 sm:$0xff]  }
 0x340   : > { %5380 = vmatprep.mubr.bf16.mxu1 %v10958_v15  ;;  %6214 = vmatprep.mubr.bf16.mxu0 %v10960_v20  ;;  %v10978_v15 = vld [vmem:[%s11481_s4 + $0x4e4] ss:$36 sps:$4 sm:$0xff]  }
 0x342   : > { %v12189_v21 = vpop.f32.mrb[76].mxu1 }
 0x343   : > { %v5168_v22 = vpop.f32.mrb[77].mxu1 }
 0x344   : > { %v12192_v26 = vpop.f32.mrb[78].mxu1  ;;  %v10980_v22 = vld [vmem:[%s11481_s4 + $0xdd0] ss:$36 sps:$4 sm:$0xff]  }
 0x345   : > { %v5171_v1 = vpop.f32.mrb[79].mxu1 }
 0x347   : > { %5381 = vmatmul.mubr.bf16.gmra.mrb[184].mxu1 %v10962_v23  ;;  %6215 = vmatmul.mubr.bf16.gmra.mrb[56].mxu0 %v10963_v27  ;;  %v10981_v27 = vld [vmem:[%s11481_s4 + $0x4e0] ss:$36 sps:$4 sm:$0xff]  }
 0x348   : > { %5388 = vmatprep.mubr.bf16.mxu1 %v10964_v30  ;;  %6222 = vmatprep.mubr.bf16.mxu0 %v10966_v9  ;;  %v10982_v30 = vld [vmem:[%s11481_s4 + $0xe1c] ss:$36 sps:$4 sm:$0xff]   ;;  %v10984_v9 = vld [vmem:[%s11481_s4 + $0x52c] ss:$36 sps:$4 sm:$0xff]  }
 0x34a   : > { %v12197_v32 = vpop.f32.mrb[80].mxu1 }
 0x34b   : > { %v5176_v34 = vpop.f32.mrb[81].mxu1 }
 0x34c   : > { %v12200_v40 = vpop.f32.mrb[82].mxu1 }
 0x34d   : > { %v5179_v48 = vpop.f32.mrb[83].mxu1 }
 0x34e   : > { %v10987_v48 = vld [vmem:[%s11481_s4 + $0x528] ss:$36 sps:$4 sm:$0xff]  }
 0x34f   : > { %5389 = vmatmul.mubr.bf16.gmra.mrb[188].mxu1 %v10968_v38  ;;  %6223 = vmatmul.mubr.bf16.gmra.mrb[60].mxu0 %v10969_v43  ;;  %v10986_v43 = vld [vmem:[%s11481_s4 + $0xe18] ss:$36 sps:$4 sm:$0xff]  }
 0x350   : > { %5396 = vmatprep.mubr.bf16.mxu1 %v10970_v44  ;;  %6230 = vmatprep.mubr.bf16.mxu0 %v10972_v51  ;;  %v10988_v51 = vld [vmem:[%s11481_s4 + $0xe64] ss:$36 sps:$4 sm:$0xff]  }
 0x352   : > { %v12205_v57 = vpop.f32.mrb[84].mxu1 }
 0x353   : > { %v5184_v60 = vpop.f32.mrb[85].mxu1 }
 0x354   : > { %v12208_v62 = vpop.f32.mrb[86].mxu1 }
 0x355   : > { %v5187_v13 = vpop.f32.mrb[87].mxu1 }
 0x356   : > { %v10992_v13 = vld [vmem:[%s11481_s4 + $0xe60] ss:$36 sps:$4 sm:$0xff]  }
 0x357   : > { %5397 = vmatmul.mubr.bf16.gmra.mrb[192].mxu1 %v10974_v61  ;;  %6231 = vmatmul.mubr.bf16.gmra.mrb[64].mxu0 %v10975_v5  ;;  %v10990_v61 = vld [vmem:[%s11481_s4 + $0x574] ss:$36 sps:$4 sm:$0xff]  }
 0x358   : > { %5404 = vmatprep.mubr.bf16.mxu1 %v10976_v10  ;;  %6238 = vmatprep.mubr.bf16.mxu0 %v10978_v15 }
 0x35a   : > { %v12213_v17 = vpop.f32.mrb[88].mxu1 }
 0x35b   : > { %v5192_v20 = vpop.f32.mrb[89].mxu1 }
 0x35c   : > { %v12216_v23 = vpop.f32.mrb[90].mxu1  ;;  %v10993_v20 = vld [vmem:[%s11481_s4 + $0x570] ss:$36 sps:$4 sm:$0xff]  }
 0x35d   : > { %v5195_v1 = vpop.f32.mrb[91].mxu1 }
 0x35f   : > { %5405 = vmatmul.mubr.bf16.gmra.mrb[196].mxu1 %v10980_v22  ;;  %6239 = vmatmul.mubr.bf16.gmra.mrb[68].mxu0 %v10981_v27  ;;  %v10994_v22 = vld [vmem:[%s11481_s4 + $0xeac] ss:$36 sps:$4 sm:$0xff]  }
 0x360   : > { %5412 = vmatprep.mubr.bf16.mxu1 %v10982_v30  ;;  %6246 = vmatprep.mubr.bf16.mxu0 %v10984_v9  ;;  %v10996_v30 = vld [vmem:[%s11481_s4 + $0x5bc] ss:$36 sps:$4 sm:$0xff]  }
 0x362   : > { %v12221_v34 = vpop.f32.mrb[92].mxu1 }
 0x363   : > { %v5200_v38 = vpop.f32.mrb[93].mxu1 }
 0x364   : > { %v12224_v44 = vpop.f32.mrb[94].mxu1  ;;  %v10998_v38 = vld [vmem:[%s11481_s4 + $0xea8] ss:$36 sps:$4 sm:$0xff]  }
 0x365   : > { %v5203_v60 = vpop.f32.mrb[95].mxu1 }
 0x367   : > { %5413 = vmatmul.mubr.bf16.gmra.mrb[200].mxu1 %v10986_v43  ;;  %6247 = vmatmul.mubr.bf16.gmra.mrb[72].mxu0 %v10987_v48  ;;  %v10999_v48 = vld [vmem:[%s11481_s4 + $0x5b8] ss:$36 sps:$4 sm:$0xff]  }
 0x368   : > { %5420 = vmatprep.mubr.bf16.mxu1 %v10988_v51  ;;  %6254 = vmatprep.mubr.bf16.mxu0 %v10990_v61  ;;  %v11000_v51 = vld [vmem:[%s11481_s4 + $0xef4] ss:$36 sps:$4 sm:$0xff]   ;;  %v11002_v61 = vld [vmem:[%s11481_s4 + $0x604] ss:$36 sps:$4 sm:$0xff]  }
 0x36a   : > { %v12229_v5 = vpop.f32.mrb[96].mxu1 }
 0x36b   : > { %v5208_v10 = vpop.f32.mrb[97].mxu1 }
 0x36c   : > { %v12232_v15 = vpop.f32.mrb[98].mxu1 }
 0x36d   : > { %v5211_v27 = vpop.f32.mrb[99].mxu1 }
 0x36e   : > { %v11005_v27 = vld [vmem:[%s11481_s4 + $0x600] ss:$36 sps:$4 sm:$0xff]  }
 0x36f   : > { %5421 = vmatmul.mubr.bf16.gmra.mrb[204].mxu1 %v10992_v13  ;;  %6255 = vmatmul.mubr.bf16.gmra.mrb[76].mxu0 %v10993_v20  ;;  %v11004_v20 = vld [vmem:[%s11481_s4 + $0xef0] ss:$36 sps:$4 sm:$0xff]  }
 0x370   : > { %5428 = vmatprep.mubr.bf16.mxu1 %v10994_v22  ;;  %6262 = vmatprep.mubr.bf16.mxu0 %v10996_v30  ;;  %v11006_v30 = vld [vmem:[%s11481_s4 + $0xf3c] ss:$36 sps:$4 sm:$0xff]  }
 0x372   : > { %v12237_v1 = vpop.f32.mrb[100].mxu1 }
 0x373   : > { %13723 = vst [vmem:[#allocation6_spill] sm:$0xff] %v12237_v1  ;;  %v5216_v9 = vpop.f32.mrb[101].mxu1 }
 0x374   : > { %v12240_v43 = vpop.f32.mrb[102].mxu1 }
 0x375   : > { %13724 = vst [vmem:[#allocation7_spill] sm:$0xff] %v12240_v43  ;;  %v5219_v60 = vpop.f32.mrb[103].mxu1  ;;  %v11008_v43 = vld [vmem:[%s11481_s4 + $0x64c] ss:$36 sps:$4 sm:$0xff]  }
 0x377   : > { %5429 = vmatmul.mubr.bf16.gmra.mrb[208].mxu1 %v10998_v38  ;;  %6263 = vmatmul.mubr.bf16.gmra.mrb[80].mxu0 %v10999_v48 }
 0x378   : > { %5436 = vmatprep.mubr.bf16.mxu1 %v11000_v51  ;;  %6270 = vmatprep.mubr.bf16.mxu0 %v11002_v61  ;;  %v11010_v51 = vld [vmem:[%s11481_s4 + $0xf38] ss:$36 sps:$4 sm:$0xff]   ;;  %v11011_v61 = vld [vmem:[%s11481_s4 + $0x648] ss:$36 sps:$4 sm:$0xff]  }
 0x37a   : > { %v12245_v10 = vpop.f32.mrb[104].mxu1 }
 0x37b   : > { %13725 = vst [vmem:[#allocation8_spill] sm:$0xff] %v12245_v10  ;;  %v5224_v13 = vpop.f32.mrb[105].mxu1  ;;  %v11014_v10 = vld [vmem:[%s11481_s4 + $0x694] ss:$36 sps:$4 sm:$0xff]  }
 0x37c   : > { %v12248_v22 = vpop.f32.mrb[106].mxu1  ;;  %v11012_v13 = vld [vmem:[%s11481_s4 + $0xf84] ss:$36 sps:$4 sm:$0xff]  }
 0x37d   : > { %13726 = vst [vmem:[#allocation9_spill] sm:$0xff] %v12248_v22  ;;  %v5227_v9 = vpop.f32.mrb[107].mxu1 }
 0x37e   : > { %v11017_v9 = vld [vmem:[%s11481_s4 + $0x690] ss:$36 sps:$4 sm:$0xff]  }
 0x37f   : > { %5437 = vmatmul.mubr.bf16.gmra.mrb[212].mxu1 %v11004_v20  ;;  %6271 = vmatmul.mubr.bf16.gmra.mrb[84].mxu0 %v11005_v27  ;;  %v11016_v27 = vld [vmem:[%s11481_s4 + $0xf80] ss:$36 sps:$4 sm:$0xff]  }
 0x380   : > { %5444 = vmatprep.mubr.bf16.mxu1 %v11006_v30  ;;  %6278 = vmatprep.mubr.bf16.mxu0 %v11008_v43 }
 0x382   : > { %v12253_v38 = vpop.f32.mrb[108].mxu1 }
 0x383   : > { %13727 = vst [vmem:[#allocation10_spill] sm:$0xff] %v12253_v38  ;;  %v5232_v48 = vpop.f32.mrb[109].mxu1  ;;  %v11020_v38 = vld [vmem:[%s11481_s4 + $0x6dc] ss:$36 sps:$4 sm:$0xff]  }
 0x384   : > { %v12256_v60 = vpop.f32.mrb[110].mxu1  ;;  %v11018_v48 = vld [vmem:[%s11481_s4 + $0xfcc] ss:$36 sps:$4 sm:$0xff]  }
 0x385   : > { %13728 = vst [vmem:[#allocation11_spill] sm:$0xff] %v12256_v60  ;;  %v5235_v22 = vpop.f32.mrb[111].mxu1 }
 0x387   : > { %5445 = vmatmul.mubr.bf16.gmra.mrb[216].mxu1 %v11010_v51  ;;  %6279 = vmatmul.mubr.bf16.gmra.mrb[88].mxu0 %v11011_v61  ;;  %v11022_v51 = vld [vmem:[%s11481_s4 + $0xfc8] ss:$36 sps:$4 sm:$0xff]  }
 0x388   : > { %5452 = vmatprep.mubr.bf16.mxu1 %v11012_v13  ;;  %6286 = vmatprep.mubr.bf16.mxu0 %v11014_v10  ;;  %v11023_v13 = vld [vmem:[%s11481_s4 + $0x6d8] ss:$36 sps:$4 sm:$0xff]  }
 0x38a   : > { %v12261_v20 = vpop.f32.mrb[112].mxu1 }
 0x38b   : > { %13729 = vst [vmem:[#allocation12_spill] sm:$0xff] %v12261_v20  ;;  %v5240_v43 = vpop.f32.mrb[113].mxu1  ;;  %v11026_v20 = vld [vmem:[%s11481_s4 + $0x724] ss:$36 sps:$4 sm:$0xff]  }
 0x38c   : > { %v12264_v30 = vpop.f32.mrb[114].mxu1  ;;  %v11024_v43 = vld [vmem:[%s11481_s4 + $0x1014] ss:$36 sps:$4 sm:$0xff]  }
 0x38d   : > { %13730 = vst [vmem:[#allocation13_spill] sm:$0xff] %v12264_v30  ;;  %v5243_v60 = vpop.f32.mrb[115].mxu1 }
 0x38f   : > { %5453 = vmatmul.mubr.bf16.gmra.mrb[220].mxu1 %v11016_v27  ;;  %6287 = vmatmul.mubr.bf16.gmra.mrb[92].mxu0 %v11017_v9  ;;  %v11028_v27 = vld [vmem:[%s11481_s4 + $0x1010] ss:$36 sps:$4 sm:$0xff]  }
 0x390   : > { %5460 = vmatprep.mubr.bf16.mxu1 %v11018_v48  ;;  %6294 = vmatprep.mubr.bf16.mxu0 %v11020_v38  ;;  %v11029_v48 = vld [vmem:[%s11481_s4 + $0x720] ss:$36 sps:$4 sm:$0xff]  }
 0x392   : > { %v12269_v22 = vpop.f32.mrb[116].mxu1 }
 0x393   : > { %13731 = vst [vmem:[#allocation14_spill] sm:$0xff] %v12269_v22  ;;  %v5248_v10 = vpop.f32.mrb[117].mxu1  ;;  %v11032_v22 = vld [vmem:[%s11481_s4 + $0x76c] ss:$36 sps:$4 sm:$0xff]  }
 0x394   : > { %v12272_v61 = vpop.f32.mrb[118].mxu1  ;;  %v11030_v10 = vld [vmem:[%s11481_s4 + $0x105c] ss:$36 sps:$4 sm:$0xff]  }
 0x395   : > { %13732 = vst [vmem:[#allocation15_spill] sm:$0xff] %v12272_v61  ;;  %v5251_v30 = vpop.f32.mrb[119].mxu1 }
 0x397   : > { %5461 = vmatmul.mubr.bf16.gmra.mrb[224].mxu1 %v11022_v51  ;;  %6295 = vmatmul.mubr.bf16.gmra.mrb[96].mxu0 %v11023_v13  ;;  %v11034_v51 = vld [vmem:[%s11481_s4 + $0x1058] ss:$36 sps:$4 sm:$0xff]  }
 0x398   : > { %5468 = vmatprep.mubr.bf16.mxu1 %v11024_v43  ;;  %6302 = vmatprep.mubr.bf16.mxu0 %v11026_v20  ;;  %v11035_v43 = vld [vmem:[%s11481_s4 + $0x768] ss:$36 sps:$4 sm:$0xff]  }
 0x39a   : > { %v12277_v60 = vpop.f32.mrb[120].mxu1 }
 0x39b   : > { %13733 = vst [vmem:[#allocation16_spill] sm:$0xff] %v12277_v60  ;;  %v5256_v38 = vpop.f32.mrb[121].mxu1  ;;  %v11038_v60 = vld [vmem:[%s11481_s4 + $0x7b4] ss:$36 sps:$4 sm:$0xff]  }
 0x39c   : > { %v12280_v9 = vpop.f32.mrb[122].mxu1  ;;  %v11036_v38 = vld [vmem:[%s11481_s4 + $0x10a4] ss:$36 sps:$4 sm:$0xff]  }
 0x39d   : > { %13734 = vst [vmem:[#allocation17_spill] sm:$0xff] %v12280_v9  ;;  %v5259_v61 = vpop.f32.mrb[123].mxu1 }
 0x39f   : > { %5469 = vmatmul.mubr.bf16.gmra.mrb[228].mxu1 %v11028_v27  ;;  %6303 = vmatmul.mubr.bf16.gmra.mrb[100].mxu0 %v11029_v48  ;;  %v11040_v48 = vld [vmem:[%s11481_s4 + $0x10a0] ss:$36 sps:$4 sm:$0xff]  }
 0x3a0   : > { %5476 = vmatprep.mubr.bf16.mxu1 %v11030_v10  ;;  %6310 = vmatprep.mubr.bf16.mxu0 %v11032_v22 }
 0x3a2   : > { %v12285_v30 = vpop.f32.mrb[124].mxu1 }
 0x3a3   : > { %13735 = vst [vmem:[#allocation18_spill] sm:$0xff] %v12285_v30  ;;  %v5264_v20 = vpop.f32.mrb[125].mxu1  ;;  %v11041_v30 = vld [vmem:[%s11481_s4 + $0x7b0] ss:$36 sps:$4 sm:$0xff]  }
 0x3a4   : > { %v12288_v13 = vpop.f32.mrb[126].mxu1 }
 0x3a5   : > { %13736 = vst [vmem:[#allocation19_spill] sm:$0xff] %v12288_v13  ;;  %v5267_v9 = vpop.f32.mrb[127].mxu1 }
 0x3a6   : > { %v11042_v9 = vld [vmem:[%s11481_s4 + $0x10ec] ss:$36 sps:$4 sm:$0xff]  }
 0x3a7   : > { %5477 = vmatmul.mubr.bf16.gmra.mrb[232].mxu1 %v11034_v51  ;;  %6311 = vmatmul.mubr.bf16.gmra.mrb[104].mxu0 %v11035_v43  ;;  %v11044_v43 = vld [vmem:[%s11481_s4 + $0x7fc] ss:$36 sps:$4 sm:$0xff]  }
 0x3a8   : > { %5484 = vmatprep.mubr.bf16.mxu1 %v11036_v38  ;;  %6318 = vmatprep.mubr.bf16.mxu0 %v11038_v60 }
 0x3aa   : > { %v12293_v61 = vpop.f32.mrb[128].mxu1  ;;  %v6104_v22 = vpop.f32.mrb[0].mxu0 }
 0x3ab   : > { %v5272_v27 = vpop.f32.mrb[129].mxu1  ;;  %v12297_v10 = vadd.f32 %v6104_v22, %v11805_v41  ;;  %v6106_v20 = vpop.f32.mrb[1].mxu0 }
 0x3ac   : > { %v12299_v13 = vpop.f32.mrb[130].mxu1  ;;  %v6107_v1 = vpop.f32.mrb[2].mxu0  ;;  %v11046_v20 = vld [vmem:[%s11481_s4 + $0x10e8] ss:$36 sps:$4 sm:$0xff]  }
 0x3ad   : > { %13737 = vst [vmem:[#allocation20_spill] sm:$0xff] %v12297_v10  ;;  %13738 = vst [vmem:[#allocation21_spill] sm:$0xff] %v12299_v13  ;;  %v5275_v51 = vpop.f32.mrb[131].mxu1  ;;  %v12305_v60 = vadd.f32 %v6107_v1, %v11810_v46  ;;  %v6109_v38 = vpop.f32.mrb[3].mxu0  ;;  %v11047_v46 = vld [vmem:[%s11481_s4 + $0x7f8] ss:$36 sps:$4 sm:$0xff]  }
 0x3ae   : > { %v11048_v1 = vld [vmem:[%s11481_s4 + $0x1134] ss:$36 sps:$4 sm:$0xff]  }
 0x3af   : > { %5485 = vmatmul.mubr.bf16.gmra.mrb[236].mxu1 %v11040_v48  ;;  %6319 = vmatmul.mubr.bf16.gmra.mrb[108].mxu0 %v11041_v30  ;;  %v11050_v30 = vld [vmem:[%s11481_s4 + $0x844] ss:$36 sps:$4 sm:$0xff]  }
 0x3b0   : > { %5492 = vmatprep.mubr.bf16.mxu1 %v11042_v9  ;;  %6326 = vmatprep.mubr.bf16.mxu0 %v11044_v43 }
 0x3b2   : > { %v12307_v41 = vpop.f32.mrb[132].mxu1  ;;  %v6112_v22 = vpop.f32.mrb[4].mxu0 }
 0x3b3   : > { %13739 = vst [vmem:[#allocation22_spill] sm:$0xff] %v12307_v41  ;;  %v5280_v27 = vpop.f32.mrb[133].mxu1  ;;  %v12311_v13 = vadd.f32 %v6112_v22, %v11813_v49  ;;  %v6114_v51 = vpop.f32.mrb[5].mxu0 }
 0x3b4   : > { %v12313_v10 = vpop.f32.mrb[134].mxu1  ;;  %v6115_v38 = vpop.f32.mrb[6].mxu0  ;;  %v11052_v51 = vld [vmem:[%s11481_s4 + $0x1130] ss:$36 sps:$4 sm:$0xff]  }
 0x3b5   : > { %13740 = vst [vmem:[#allocation23_spill] sm:$0xff] %v12313_v10  ;;  %v5283_v48 = vpop.f32.mrb[135].mxu1  ;;  %v12319_v9 = vadd.f32 %v6115_v38, %v11818_v54  ;;  %v6117_v43 = vpop.f32.mrb[7].mxu0  ;;  %v11053_v54 = vld [vmem:[%s11481_s4 + $0x840] ss:$36 sps:$4 sm:$0xff]  }
 0x3b6   : > { %v11054_v38 = vld [vmem:[%s11481_s4 + $0x117c] ss:$36 sps:$4 sm:$0xff]  }
 0x3b7   : > { %5493 = vmatmul.mubr.bf16.gmra.mrb[240].mxu1 %v11046_v20  ;;  %6327 = vmatmul.mubr.bf16.gmra.mrb[112].mxu0 %v11047_v46  ;;  %v11056_v46 = vld [vmem:[%s11481_s4 + $0x88c] ss:$36 sps:$4 sm:$0xff]  }
 0x3b8   : > { %5500 = vmatprep.mubr.bf16.mxu1 %v11048_v1  ;;  %6334 = vmatprep.mubr.bf16.mxu0 %v11050_v30 }
 0x3ba   : > { %v12321_v49 = vpop.f32.mrb[136].mxu1  ;;  %v6120_v22 = vpop.f32.mrb[8].mxu0 }
 0x3bb   : > { %13741 = vst [vmem:[#allocation24_spill] sm:$0xff] %v12321_v49  ;;  %v5288_v27 = vpop.f32.mrb[137].mxu1  ;;  %v12325_v10 = vadd.f32 %v6120_v22, %v11824_v58  ;;  %v6122_v48 = vpop.f32.mrb[9].mxu0 }
 0x3bc   : > { %v12327_v41 = vpop.f32.mrb[138].mxu1  ;;  %v6123_v43 = vpop.f32.mrb[10].mxu0  ;;  %v11058_v48 = vld [vmem:[%s11481_s4 + $0x1178] ss:$36 sps:$4 sm:$0xff]  }
 0x3bd   : > { %13742 = vst [vmem:[#allocation25_spill] sm:$0xff] %v12327_v41  ;;  %v5291_v20 = vpop.f32.mrb[139].mxu1  ;;  %v12333_v1 = vadd.f32 %v6123_v43, %v11830_v63  ;;  %v6125_v30 = vpop.f32.mrb[11].mxu0  ;;  %v11059_v63 = vld [vmem:[%s11481_s4 + $0x888] ss:$36 sps:$4 sm:$0xff]  }
 0x3be   : > { %v11060_v43 = vld [vmem:[%s11481_s4 + $0x11c4] ss:$36 sps:$4 sm:$0xff]  }
 0x3bf   : > { %13743 = vst [vmem:[#allocation26_spill] sm:$0xff] %v12333_v1  ;;  %5501 = vmatmul.mubr.bf16.gmra.mrb[244].mxu1 %v11052_v51  ;;  %6335 = vmatmul.mubr.bf16.gmra.mrb[116].mxu0 %v11053_v54  ;;  %v11062_v54 = vld [vmem:[%s11481_s4 + $0x8d4] ss:$36 sps:$4 sm:$0xff]  }
 0x3c0   : > { %5508 = vmatprep.mubr.bf16.mxu1 %v11054_v38  ;;  %6342 = vmatprep.mubr.bf16.mxu0 %v11056_v46 }
 0x3c2   : > { %v12335_v58 = vpop.f32.mrb[140].mxu1  ;;  %v6128_v22 = vpop.f32.mrb[12].mxu0 }
 0x3c3   : > { %13744 = vst [vmem:[#allocation27_spill] sm:$0xff] %v12335_v58  ;;  %v5296_v27 = vpop.f32.mrb[141].mxu1  ;;  %v12339_v41 = vadd.f32 %v6128_v22, %v11833_v3  ;;  %v6130_v20 = vpop.f32.mrb[13].mxu0 }
 0x3c4   : > { %v12341_v49 = vpop.f32.mrb[142].mxu1  ;;  %v6131_v30 = vpop.f32.mrb[14].mxu0  ;;  %v11064_v20 = vld [vmem:[%s11481_s4 + $0x11c0] ss:$36 sps:$4 sm:$0xff]  }
 0x3c5   : > { %13745 = vst [vmem:[#allocation28_spill] sm:$0xff] %v12341_v49  ;;  %v5299_v51 = vpop.f32.mrb[143].mxu1  ;;  %v12347_v38 = vadd.f32 %v6131_v30, %v11838_v8  ;;  %v6133_v46 = vpop.f32.mrb[15].mxu0  ;;  %v11065_v8 = vld [vmem:[%s11481_s4 + $0x8d0] ss:$36 sps:$4 sm:$0xff]  }
 0x3c6   : > { %v11068_v30 = vld [vmem:[%s11481_s4 + $0x20] ss:$36 sps:$4 sm:$0xff]  }
 0x3c7   : > { %5509 = vmatmul.mubr.bf16.gmra.mrb[248].mxu1 %v11058_v48  ;;  %6343 = vmatmul.mubr.bf16.gmra.mrb[120].mxu0 %v11059_v63  ;;  %v11066_v48 = vld [vmem:[%s11481_s4 + $0x91c] ss:$36 sps:$4 sm:$0xff]  }
 0x3c8   : > { %5516 = vmatprep.mubr.bf16.mxu1 %v11060_v43  ;;  %6350 = vmatprep.mubr.bf16.mxu0 %v11062_v54 }
 0x3ca   : > { %v12349_v3 = vpop.f32.mrb[144].mxu1  ;;  %v6136_v22 = vpop.f32.mrb[16].mxu0 }
 0x3cb   : > { %v5304_v27 = vpop.f32.mrb[145].mxu1  ;;  %v12353_v49 = vadd.f32 %v6136_v22, %v11841_v11  ;;  %v6138_v51 = vpop.f32.mrb[17].mxu0 }
 0x3cc   : > { %v12355_v58 = vpop.f32.mrb[146].mxu1  ;;  %v6139_v46 = vpop.f32.mrb[18].mxu0  ;;  %v11070_v27 = vld [vmem:[%s11481_s4 + $0x68] ss:$36 sps:$4 sm:$0xff]  }
 0x3cd   : > { %13746 = vst [vmem:[#allocation29_spill] sm:$0xff] %v12355_v58  ;;  %v5307_v1 = vpop.f32.mrb[147].mxu1  ;;  %v12361_v63 = vadd.f32 %v6139_v46, %v11846_v16  ;;  %v6141_v43 = vpop.f32.mrb[19].mxu0  ;;  %v11069_v16 = vld [vmem:[%s11481_s4 + $0x918] ss:$36 sps:$4 sm:$0xff]  }
 0x3ce   : > { %v11073_v46 = vld [vmem:[%s11481_s4 + $0xb0] ss:$36 sps:$4 sm:$0xff]  }
 0x3cf   : > { %5517 = vmatmul.mubr.bf16.gmra.mrb[252].mxu1 %v11064_v20  ;;  %6351 = vmatmul.mubr.bf16.gmra.mrb[124].mxu0 %v11065_v8  ;;  %v11071_v8 = vld [vmem:[%s11481_s4 + $0x964] ss:$36 sps:$4 sm:$0xff]  }
 0x3d0   : > { %9470 = vmatprep.mubr.msk.bf16.mxu1 %vm4238_vm1, %v11068_v30  ;;  %6358 = vmatprep.mubr.bf16.mxu0 %v11066_v48 }
 0x3d2   : > { %v12364_v11 = vpop.f32.mrb[148].mxu1  ;;  %v6144_v54 = vpop.f32.mrb[20].mxu0 }
 0x3d3   : > { %13747 = vst [vmem:[#allocation30_spill] sm:$0xff] %v12364_v11  ;;  %v5312_v22 = vpop.f32.mrb[149].mxu1  ;;  %v12368_v1 = vadd.f32 %v6144_v54, %v11849_v19  ;;  %v6146_v51 = vpop.f32.mrb[21].mxu0 }
 0x3d4   : > { %v12370_v58 = vpop.f32.mrb[150].mxu1  ;;  %v6147_v43 = vpop.f32.mrb[22].mxu0  ;;  %v11075_v51 = vld [vmem:[%s11481_s4 + $0xf8] ss:$36 sps:$4 sm:$0xff]  }
 0x3d5   : > { %13748 = vst [vmem:[#allocation31_spill] sm:$0xff] %v12370_v58  ;;  %v5315_v20 = vpop.f32.mrb[151].mxu1  ;;  %v12376_v30 = vadd.f32 %v6147_v43, %v11854_v24  ;;  %v6149_v48 = vpop.f32.mrb[23].mxu0  ;;  %v11074_v43 = vld [vmem:[%s11481_s4 + $0x960] ss:$36 sps:$4 sm:$0xff]  }
 0x3d6   : > { %v11078_v48 = vld [vmem:[%s11481_s4 + $0x140] ss:$36 sps:$4 sm:$0xff]  }
 0x3d7   : > { %9471 = vmatmul.mubr.msk.bf16.vlgmr.msra.gmra.mrb[0].mxu1 %vm4238_vm1, %v11070_v27  ;;  %6359 = vmatmul.mubr.bf16.gmra.mrb[128].mxu0 %v11069_v16  ;;  %v11076_v16 = vld [vmem:[%s11481_s4 + $0x9ac] ss:$36 sps:$4 sm:$0xff]  }
 0x3d8   : > { %9474 = vmatprep.mubr.msk.bf16.mxu1 %vm4238_vm1, %v11073_v46  ;;  %6366 = vmatprep.mubr.bf16.mxu0 %v11071_v8 }
 0x3da   : > { %v12380_v19 = vpop.f32.mrb[152].mxu1  ;;  %v6152_v54 = vpop.f32.mrb[24].mxu0 }
 0x3db   : > { %13749 = vst [vmem:[#allocation32_spill] sm:$0xff] %v12380_v19  ;;  %v5320_v22 = vpop.f32.mrb[153].mxu1  ;;  %v12384_v20 = vadd.f32 %v6152_v54, %v11860_v28  ;;  %v6154_v58 = vpop.f32.mrb[25].mxu0 }
 0x3dc   : > { %v12386_v24 = vpop.f32.mrb[154].mxu1  ;;  %v6155_v11 = vpop.f32.mrb[26].mxu0  ;;  %v11080_v22 = vld [vmem:[%s11481_s4 + $0x188] ss:$36 sps:$4 sm:$0xff]  }
 0x3dd   : > { %13750 = vst [vmem:[#allocation33_spill] sm:$0xff] %v12386_v24  ;;  %v5323_v27 = vpop.f32.mrb[155].mxu1  ;;  %v12392_v46 = vadd.f32 %v6155_v11, %v11866_v33  ;;  %v6157_v8 = vpop.f32.mrb[27].mxu0  ;;  %v11079_v11 = vld [vmem:[%s11481_s4 + $0x9a8] ss:$36 sps:$4 sm:$0xff]  }
 0x3de   : > { %v11083_v8 = vld [vmem:[%s11481_s4 + $0x1d0] ss:$36 sps:$4 sm:$0xff]  }
 0x3df   : > { %9475 = vmatmul.mubr.msk.bf16.gmra.mrb[4].mxu1 %vm4238_vm1, %v11075_v51  ;;  %6367 = vmatmul.mubr.bf16.gmra.mrb[132].mxu0 %v11074_v43  ;;  %v11081_v43 = vld [vmem:[%s11481_s4 + $0x9f4] ss:$36 sps:$4 sm:$0xff]  }
 0x3e0   : > { %9478 = vmatprep.mubr.msk.bf16.mxu1 %vm4238_vm1, %v11078_v48  ;;  %6374 = vmatprep.mubr.bf16.mxu0 %v11076_v16 }
 0x3e2   : > { %v12396_v28 = vpop.f32.mrb[156].mxu1  ;;  %v6160_v58 = vpop.f32.mrb[28].mxu0 }
 0x3e3   : > { %13751 = vst [vmem:[#allocation34_spill] sm:$0xff] %v12396_v28  ;;  %v5328_v54 = vpop.f32.mrb[157].mxu1  ;;  %v12400_v27 = vadd.f32 %v6160_v58, %v11869_v36  ;;  %v6162_v24 = vpop.f32.mrb[29].mxu0 }
 0x3e4   : > { %v12402_v33 = vpop.f32.mrb[158].mxu1  ;;  %v6163_v19 = vpop.f32.mrb[30].mxu0  ;;  %v11085_v54 = vld [vmem:[%s11481_s4 + $0x218] ss:$36 sps:$4 sm:$0xff]  }
 0x3e5   : > { %13752 = vst [vmem:[#allocation35_spill] sm:$0xff] %v12402_v33  ;;  %v5331_v51 = vpop.f32.mrb[159].mxu1  ;;  %v12408_v48 = vadd.f32 %v6163_v19, %v11874_v42  ;;  %v6165_v16 = vpop.f32.mrb[31].mxu0  ;;  %v11084_v19 = vld [vmem:[%s11481_s4 + $0x9f0] ss:$36 sps:$4 sm:$0xff]  }
 0x3e6   : > { %v11088_v16 = vld [vmem:[%s11481_s4 + $0x260] ss:$36 sps:$4 sm:$0xff]  }
 0x3e7   : > { %9479 = vmatmul.mubr.msk.bf16.gmra.mrb[8].mxu1 %vm4238_vm1, %v11080_v22  ;;  %6375 = vmatmul.mubr.bf16.gmra.mrb[136].mxu0 %v11079_v11  ;;  %v11086_v11 = vld [vmem:[%s11481_s4 + $0xa3c] ss:$36 sps:$4 sm:$0xff]  }
 0x3e8   : > { %9482 = vmatprep.mubr.msk.bf16.mxu1 %vm4238_vm1, %v11083_v8  ;;  %6382 = vmatprep.mubr.bf16.mxu0 %v11081_v43 }
 0x3ea   : > { %v12412_v36 = vpop.f32.mrb[160].mxu1  ;;  %v6168_v24 = vpop.f32.mrb[32].mxu0 }
 0x3eb   : > { %13753 = vst [vmem:[#allocation36_spill] sm:$0xff] %v12412_v36  ;;  %v5336_v58 = vpop.f32.mrb[161].mxu1  ;;  %v12416_v51 = vadd.f32 %v6168_v24, %v11877_v45  ;;  %v6170_v33 = vpop.f32.mrb[33].mxu0 }
 0x3ec   : > { %v12418_v42 = vpop.f32.mrb[162].mxu1  ;;  %v6171_v28 = vpop.f32.mrb[34].mxu0  ;;  %v11090_v58 = vld [vmem:[%s11481_s4 + $0x2a8] ss:$36 sps:$4 sm:$0xff]  }
 0x3ed   : > { %13754 = vst [vmem:[#allocation37_spill] sm:$0xff] %v12418_v42  ;;  %v5339_v22 = vpop.f32.mrb[163].mxu1  ;;  %v12424_v8 = vadd.f32 %v6171_v28, %v11882_v52  ;;  %v6173_v43 = vpop.f32.mrb[35].mxu0  ;;  %v11089_v28 = vld [vmem:[%s11481_s4 + $0xa38] ss:$36 sps:$4 sm:$0xff]  }
 0x3ee   : > { %v11093_v43 = vld [vmem:[%s11481_s4 + $0x2f0] ss:$36 sps:$4 sm:$0xff]  }
 0x3ef   : > { %9483 = vmatmul.mubr.msk.bf16.gmra.mrb[12].mxu1 %vm4238_vm1, %v11085_v54  ;;  %6383 = vmatmul.mubr.bf16.gmra.mrb[140].mxu0 %v11084_v19  ;;  %v11091_v19 = vld [vmem:[%s11481_s4 + $0xa84] ss:$36 sps:$4 sm:$0xff]  }
 0x3f0   : > { %9486 = vmatprep.mubr.msk.bf16.mxu1 %vm4238_vm1, %v11088_v16  ;;  %6390 = vmatprep.mubr.bf16.mxu0 %v11086_v11 }
 0x3f2   : > { %v12428_v45 = vpop.f32.mrb[164].mxu1  ;;  %v6176_v33 = vpop.f32.mrb[36].mxu0 }
 0x3f3   : > { %13755 = vst [vmem:[#allocation38_spill] sm:$0xff] %v12428_v45  ;;  %v5344_v24 = vpop.f32.mrb[165].mxu1  ;;  %v12432_v22 = vadd.f32 %v6176_v33, %v11884_v55  ;;  %v6178_v42 = vpop.f32.mrb[37].mxu0 }
 0x3f4   : > { %v12434_v52 = vpop.f32.mrb[166].mxu1  ;;  %v6179_v36 = vpop.f32.mrb[38].mxu0  ;;  %v11095_v24 = vld [vmem:[%s11481_s4 + $0x338] ss:$36 sps:$4 sm:$0xff]  }
 0x3f5   : > { %13756 = vst [vmem:[#allocation39_spill] sm:$0xff] %v12434_v52  ;;  %v5347_v54 = vpop.f32.mrb[167].mxu1  ;;  %v12440_v16 = vadd.f32 %v6179_v36, %v11887_v59  ;;  %v6181_v11 = vpop.f32.mrb[39].mxu0  ;;  %v11094_v36 = vld [vmem:[%s11481_s4 + $0xa80] ss:$36 sps:$4 sm:$0xff]  }
 0x3f6   : > { %v11098_v11 = vld [vmem:[%s11481_s4 + $0x380] ss:$36 sps:$4 sm:$0xff]  }
 0x3f7   : > { %9487 = vmatmul.mubr.msk.bf16.gmra.mrb[16].mxu1 %vm4238_vm1, %v11090_v58  ;;  %6391 = vmatmul.mubr.bf16.gmra.mrb[144].mxu0 %v11089_v28  ;;  %v11096_v28 = vld [vmem:[%s11481_s4 + $0xacc] ss:$36 sps:$4 sm:$0xff]  }
 0x3f8   : > { %9490 = vmatprep.mubr.msk.bf16.mxu1 %vm4238_vm1, %v11093_v43  ;;  %6398 = vmatprep.mubr.bf16.mxu0 %v11091_v19 }
 0x3fa   : > { %v12444_v55 = vpop.f32.mrb[168].mxu1  ;;  %v6184_v42 = vpop.f32.mrb[40].mxu0 }
 0x3fb   : > { %13757 = vst [vmem:[#allocation40_spill] sm:$0xff] %v12444_v55  ;;  %v5352_v33 = vpop.f32.mrb[169].mxu1  ;;  %v12448_v54 = vadd.f32 %v6184_v42, %v11895_v4  ;;  %v6186_v52 = vpop.f32.mrb[41].mxu0 }
 0x3fc   : > { %v12450_v59 = vpop.f32.mrb[170].mxu1  ;;  %v6187_v45 = vpop.f32.mrb[42].mxu0  ;;  %v11100_v33 = vld [vmem:[%s11481_s4 + $0x3c8] ss:$36 sps:$4 sm:$0xff]  }
 0x3fd   : > { %13758 = vst [vmem:[#allocation41_spill] sm:$0xff] %v12450_v59  ;;  %v5355_v58 = vpop.f32.mrb[171].mxu1  ;;  %v12456_v43 = vadd.f32 %v6187_v45, %v11899_v7  ;;  %v6189_v19 = vpop.f32.mrb[43].mxu0  ;;  %v11099_v45 = vld [vmem:[%s11481_s4 + $0xac8] ss:$36 sps:$4 sm:$0xff]  }
 0x3fe   : > { %v11103_v19 = vld [vmem:[%s11481_s4 + $0x410] ss:$36 sps:$4 sm:$0xff]  }
 0x3ff   : > { %9491 = vmatmul.mubr.msk.bf16.gmra.mrb[20].mxu1 %vm4238_vm1, %v11095_v24  ;;  %6399 = vmatmul.mubr.bf16.gmra.mrb[148].mxu0 %v11094_v36  ;;  %v11101_v36 = vld [vmem:[%s11481_s4 + $0xb14] ss:$36 sps:$4 sm:$0xff]  }
 0x400   : > { %9494 = vmatprep.mubr.msk.bf16.mxu1 %vm4238_vm1, %v11098_v11  ;;  %6406 = vmatprep.mubr.bf16.mxu0 %v11096_v28 }
 0x402   : > { %v12460_v4 = vpop.f32.mrb[172].mxu1  ;;  %v6192_v52 = vpop.f32.mrb[44].mxu0 }
 0x403   : > { %13759 = vst [vmem:[#allocation42_spill] sm:$0xff] %v12460_v4  ;;  %v5360_v42 = vpop.f32.mrb[173].mxu1  ;;  %v12464_v58 = vadd.f32 %v6192_v52, %v11904_v14  ;;  %v6194_v59 = vpop.f32.mrb[45].mxu0 }
 0x404   : > { %v12466_v7 = vpop.f32.mrb[174].mxu1  ;;  %v6195_v55 = vpop.f32.mrb[46].mxu0  ;;  %v11105_v42 = vld [vmem:[%s11481_s4 + $0x458] ss:$36 sps:$4 sm:$0xff]  }
 0x405   : > { %13760 = vst [vmem:[#allocation43_spill] sm:$0xff] %v12466_v7  ;;  %v5363_v24 = vpop.f32.mrb[175].mxu1  ;;  %v12472_v11 = vadd.f32 %v6195_v55, %v11907_v18  ;;  %v6197_v28 = vpop.f32.mrb[47].mxu0  ;;  %v11104_v55 = vld [vmem:[%s11481_s4 + $0xb10] ss:$36 sps:$4 sm:$0xff]  }
 0x406   : > { %v11108_v28 = vld [vmem:[%s11481_s4 + $0x4a0] ss:$36 sps:$4 sm:$0xff]  }
 0x407   : > { %9495 = vmatmul.mubr.msk.bf16.gmra.mrb[24].mxu1 %vm4238_vm1, %v11100_v33  ;;  %6407 = vmatmul.mubr.bf16.gmra.mrb[152].mxu0 %v11099_v45  ;;  %v11106_v45 = vld [vmem:[%s11481_s4 + $0xb5c] ss:$36 sps:$4 sm:$0xff]  }
 0x408   : > { %9498 = vmatprep.mubr.msk.bf16.mxu1 %vm4238_vm1, %v11103_v19  ;;  %6414 = vmatprep.mubr.bf16.mxu0 %v11101_v36 }
 0x40a   : > { %v12476_v14 = vpop.f32.mrb[176].mxu1  ;;  %v6200_v59 = vpop.f32.mrb[48].mxu0 }
 0x40b   : > { %13761 = vst [vmem:[#allocation44_spill] sm:$0xff] %v12476_v14  ;;  %v5368_v52 = vpop.f32.mrb[177].mxu1  ;;  %v12480_v24 = vadd.f32 %v6200_v59, %v11912_v25  ;;  %v6202_v7 = vpop.f32.mrb[49].mxu0 }
 0x40c   : > { %v12482_v18 = vpop.f32.mrb[178].mxu1  ;;  %v6203_v4 = vpop.f32.mrb[50].mxu0  ;;  %v11110_v52 = vld [vmem:[%s11481_s4 + $0x4e8] ss:$36 sps:$4 sm:$0xff]  }
 0x40d   : > { %13762 = vst [vmem:[#allocation45_spill] sm:$0xff] %v12482_v18  ;;  %v5371_v33 = vpop.f32.mrb[179].mxu1  ;;  %v12488_v19 = vadd.f32 %v6203_v4, %v11915_v29  ;;  %v6205_v36 = vpop.f32.mrb[51].mxu0  ;;  %v11109_v4 = vld [vmem:[%s11481_s4 + $0xb58] ss:$36 sps:$4 sm:$0xff]  }
 0x40e   : > { %v11113_v36 = vld [vmem:[%s11481_s4 + $0x530] ss:$36 sps:$4 sm:$0xff]  }
 0x40f   : > { %9499 = vmatmul.mubr.msk.bf16.gmra.mrb[28].mxu1 %vm4238_vm1, %v11105_v42  ;;  %6415 = vmatmul.mubr.bf16.gmra.mrb[156].mxu0 %v11104_v55  ;;  %v11111_v55 = vld [vmem:[%s11481_s4 + $0xba4] ss:$36 sps:$4 sm:$0xff]  }
 0x410   : > { %9502 = vmatprep.mubr.msk.bf16.mxu1 %vm4238_vm1, %v11108_v28  ;;  %6422 = vmatprep.mubr.bf16.mxu0 %v11106_v45 }
 0x412   : > { %v12492_v25 = vpop.f32.mrb[180].mxu1  ;;  %v6208_v7 = vpop.f32.mrb[52].mxu0 }
 0x413   : > { %13763 = vst [vmem:[#allocation46_spill] sm:$0xff] %v12492_v25  ;;  %v5376_v59 = vpop.f32.mrb[181].mxu1  ;;  %v12496_v33 = vadd.f32 %v6208_v7, %v11920_v35  ;;  %v6210_v18 = vpop.f32.mrb[53].mxu0 }
 0x414   : > { %v12498_v29 = vpop.f32.mrb[182].mxu1  ;;  %v6211_v14 = vpop.f32.mrb[54].mxu0  ;;  %v11115_v59 = vld [vmem:[%s11481_s4 + $0x578] ss:$36 sps:$4 sm:$0xff]  }
 0x415   : > { %13764 = vst [vmem:[#allocation47_spill] sm:$0xff] %v12498_v29  ;;  %v5379_v42 = vpop.f32.mrb[183].mxu1  ;;  %v12504_v28 = vadd.f32 %v6211_v14, %v11923_v39  ;;  %v6213_v45 = vpop.f32.mrb[55].mxu0  ;;  %v11114_v14 = vld [vmem:[%s11481_s4 + $0xba0] ss:$36 sps:$4 sm:$0xff]  }
 0x416   : > { %v11118_v45 = vld [vmem:[%s11481_s4 + $0x5c0] ss:$36 sps:$4 sm:$0xff]  }
 0x417   : > { %9503 = vmatmul.mubr.msk.bf16.gmra.mrb[32].mxu1 %vm4238_vm1, %v11110_v52  ;;  %6423 = vmatmul.mubr.bf16.gmra.mrb[160].mxu0 %v11109_v4  ;;  %v11116_v4 = vld [vmem:[%s11481_s4 + $0xbec] ss:$36 sps:$4 sm:$0xff]  }
 0x418   : > { %9506 = vmatprep.mubr.msk.bf16.mxu1 %vm4238_vm1, %v11113_v36  ;;  %6430 = vmatprep.mubr.bf16.mxu0 %v11111_v55 }
 0x41a   : > { %v12508_v35 = vpop.f32.mrb[184].mxu1  ;;  %v6216_v18 = vpop.f32.mrb[56].mxu0 }
 0x41b   : > { %13765 = vst [vmem:[#allocation48_spill] sm:$0xff] %v12508_v35  ;;  %v5384_v7 = vpop.f32.mrb[185].mxu1  ;;  %v12512_v42 = vadd.f32 %v6216_v18, %v11931_v50  ;;  %v6218_v29 = vpop.f32.mrb[57].mxu0 }
 0x41c   : > { %v12514_v39 = vpop.f32.mrb[186].mxu1  ;;  %v6219_v25 = vpop.f32.mrb[58].mxu0  ;;  %v11120_v7 = vld [vmem:[%s11481_s4 + $0x608] ss:$36 sps:$4 sm:$0xff]  }
 0x41d   : > { %13766 = vst [vmem:[#allocation49_spill] sm:$0xff] %v12514_v39  ;;  %v5387_v52 = vpop.f32.mrb[187].mxu1  ;;  %v12520_v36 = vadd.f32 %v6219_v25, %v11935_v56  ;;  %v6221_v55 = vpop.f32.mrb[59].mxu0  ;;  %v11119_v25 = vld [vmem:[%s11481_s4 + $0xbe8] ss:$36 sps:$4 sm:$0xff]  }
 0x41e   : > { %v11123_v55 = vld [vmem:[%s11481_s4 + $0x650] ss:$36 sps:$4 sm:$0xff]  }
 0x41f   : > { %9507 = vmatmul.mubr.msk.bf16.gmra.mrb[36].mxu1 %vm4238_vm1, %v11115_v59  ;;  %6431 = vmatmul.mubr.bf16.gmra.mrb[164].mxu0 %v11114_v14  ;;  %v11121_v14 = vld [vmem:[%s11481_s4 + $0xc34] ss:$36 sps:$4 sm:$0xff]  }
 0x420   : > { %9510 = vmatprep.mubr.msk.bf16.mxu1 %vm4238_vm1, %v11118_v45  ;;  %6438 = vmatprep.mubr.bf16.mxu0 %v11116_v4 }
 0x422   : > { %v12524_v50 = vpop.f32.mrb[188].mxu1  ;;  %v6224_v29 = vpop.f32.mrb[60].mxu0 }
 0x423   : > { %13767 = vst [vmem:[#allocation50_spill] sm:$0xff] %v12524_v50  ;;  %v5392_v18 = vpop.f32.mrb[189].mxu1  ;;  %v12528_v52 = vadd.f32 %v6224_v29, %v11940_v0  ;;  %v6226_v39 = vpop.f32.mrb[61].mxu0 }
 0x424   : > { %v12530_v56 = vpop.f32.mrb[190].mxu1  ;;  %v6227_v35 = vpop.f32.mrb[62].mxu0  ;;  %v11125_v18 = vld [vmem:[%s11481_s4 + $0x698] ss:$36 sps:$4 sm:$0xff]  }
 0x425   : > { %13768 = vst [vmem:[#allocation51_spill] sm:$0xff] %v12530_v56  ;;  %v5395_v59 = vpop.f32.mrb[191].mxu1  ;;  %v12536_v45 = vadd.f32 %v6227_v35, %v11943_v6  ;;  %v6229_v4 = vpop.f32.mrb[63].mxu0  ;;  %v11124_v35 = vld [vmem:[%s11481_s4 + $0xc30] ss:$36 sps:$4 sm:$0xff]  }
 0x426   : > { %v11128_v4 = vld [vmem:[%s11481_s4 + $0x6e0] ss:$36 sps:$4 sm:$0xff]  }
 0x427   : > { %9511 = vmatmul.mubr.msk.bf16.gmra.mrb[40].mxu1 %vm4238_vm1, %v11120_v7  ;;  %6439 = vmatmul.mubr.bf16.gmra.mrb[168].mxu0 %v11119_v25  ;;  %v11126_v25 = vld [vmem:[%s11481_s4 + $0xc7c] ss:$36 sps:$4 sm:$0xff]  }
 0x428   : > { %9514 = vmatprep.mubr.msk.bf16.mxu1 %vm4238_vm1, %v11123_v55  ;;  %6446 = vmatprep.mubr.bf16.mxu0 %v11121_v14 }
 0x42a   : > { %v12540_v0 = vpop.f32.mrb[192].mxu1  ;;  %v6232_v39 = vpop.f32.mrb[64].mxu0 }
 0x42b   : > { %13769 = vst [vmem:[#allocation52_spill] sm:$0xff] %v12540_v0  ;;  %v5400_v29 = vpop.f32.mrb[193].mxu1  ;;  %v12544_v59 = vadd.f32 %v6232_v39, %v12165_v31  ;;  %v6234_v56 = vpop.f32.mrb[65].mxu0 }
 0x42c   : > { %v12546_v6 = vpop.f32.mrb[194].mxu1  ;;  %v6235_v50 = vpop.f32.mrb[66].mxu0  ;;  %v11130_v29 = vld [vmem:[%s11481_s4 + $0x728] ss:$36 sps:$4 sm:$0xff]  }
 0x42d   : > { %13770 = vst [vmem:[#allocation53_spill] sm:$0xff] %v12546_v6  ;;  %v5403_v7 = vpop.f32.mrb[195].mxu1  ;;  %v12552_v55 = vadd.f32 %v6235_v50, %v12168_v37  ;;  %v6237_v14 = vpop.f32.mrb[67].mxu0  ;;  %v11129_v50 = vld [vmem:[%s11481_s4 + $0xc78] ss:$36 sps:$4 sm:$0xff]  }
 0x42e   : > { %v11133_v14 = vld [vmem:[%s11481_s4 + $0x770] ss:$36 sps:$4 sm:$0xff]  }
 0x42f   : > { %9515 = vmatmul.mubr.msk.bf16.gmra.mrb[44].mxu1 %vm4238_vm1, %v11125_v18  ;;  %6447 = vmatmul.mubr.bf16.gmra.mrb[172].mxu0 %v11124_v35  ;;  %v11131_v35 = vld [vmem:[%s11481_s4 + $0xcc4] ss:$36 sps:$4 sm:$0xff]  }
 0x430   : > { %9518 = vmatprep.mubr.msk.bf16.mxu1 %vm4238_vm1, %v11128_v4  ;;  %6454 = vmatprep.mubr.bf16.mxu0 %v11126_v25 }
 0x432   : > { %v12556_v31 = vpop.f32.mrb[196].mxu1  ;;  %v6240_v56 = vpop.f32.mrb[68].mxu0 }
 0x433   : > { %13771 = vst [vmem:[#allocation54_spill] sm:$0xff] %v12556_v31  ;;  %v5408_v39 = vpop.f32.mrb[197].mxu1  ;;  %v12560_v7 = vadd.f32 %v6240_v56, %v12173_v47  ;;  %v6242_v6 = vpop.f32.mrb[69].mxu0 }
 0x434   : > { %v12562_v37 = vpop.f32.mrb[198].mxu1  ;;  %v6243_v0 = vpop.f32.mrb[70].mxu0  ;;  %v11135_v39 = vld [vmem:[%s11481_s4 + $0x7b8] ss:$36 sps:$4 sm:$0xff]  }
 0x435   : > { %13772 = vst [vmem:[#allocation55_spill] sm:$0xff] %v12562_v37  ;;  %v5411_v18 = vpop.f32.mrb[199].mxu1  ;;  %v12568_v4 = vadd.f32 %v6243_v0, %v12176_v53  ;;  %v6245_v25 = vpop.f32.mrb[71].mxu0  ;;  %v11134_v0 = vld [vmem:[%s11481_s4 + $0xcc0] ss:$36 sps:$4 sm:$0xff]  }
 0x436   : > { %v11138_v25 = vld [vmem:[%s11481_s4 + $0x800] ss:$36 sps:$4 sm:$0xff]  }
 0x437   : > { %9519 = vmatmul.mubr.msk.bf16.gmra.mrb[48].mxu1 %vm4238_vm1, %v11130_v29  ;;  %6455 = vmatmul.mubr.bf16.gmra.mrb[176].mxu0 %v11129_v50  ;;  %v11136_v50 = vld [vmem:[%s11481_s4 + $0xd0c] ss:$36 sps:$4 sm:$0xff]  }
 0x438   : > { %9522 = vmatprep.mubr.msk.bf16.mxu1 %vm4238_vm1, %v11133_v14  ;;  %6462 = vmatprep.mubr.bf16.mxu0 %v11131_v35 }
 0x43a   : > { %v12572_v47 = vpop.f32.mrb[200].mxu1  ;;  %v6248_v6 = vpop.f32.mrb[72].mxu0 }
 0x43b   : > { %13773 = vst [vmem:[#allocation56_spill] sm:$0xff] %v12572_v47  ;;  %v5416_v56 = vpop.f32.mrb[201].mxu1  ;;  %v12576_v18 = vadd.f32 %v6248_v6, %v12181_v2  ;;  %v6250_v37 = vpop.f32.mrb[73].mxu0 }
 0x43c   : > { %v12578_v53 = vpop.f32.mrb[202].mxu1  ;;  %v6251_v31 = vpop.f32.mrb[74].mxu0  ;;  %v11140_v56 = vld [vmem:[%s11481_s4 + $0x848] ss:$36 sps:$4 sm:$0xff]  }
 0x43d   : > { %13774 = vst [vmem:[#allocation57_spill] sm:$0xff] %v12578_v53  ;;  %v5419_v29 = vpop.f32.mrb[203].mxu1  ;;  %v12584_v14 = vadd.f32 %v6251_v31, %v12184_v12  ;;  %v6253_v35 = vpop.f32.mrb[75].mxu0  ;;  %v11139_v31 = vld [vmem:[%s11481_s4 + $0xd08] ss:$36 sps:$4 sm:$0xff]  }
 0x43e   : > { %v11143_v35 = vld [vmem:[%s11481_s4 + $0x890] ss:$36 sps:$4 sm:$0xff]  }
 0x43f   : > { %9523 = vmatmul.mubr.msk.bf16.gmra.mrb[52].mxu1 %vm4238_vm1, %v11135_v39  ;;  %6463 = vmatmul.mubr.bf16.gmra.mrb[180].mxu0 %v11134_v0  ;;  %v11141_v0 = vld [vmem:[%s11481_s4 + $0xd54] ss:$36 sps:$4 sm:$0xff]  }
 0x440   : > { %9526 = vmatprep.mubr.msk.bf16.mxu1 %vm4238_vm1, %v11138_v25  ;;  %6470 = vmatprep.mubr.bf16.mxu0 %v11136_v50 }
 0x442   : > { %v12588_v2 = vpop.f32.mrb[204].mxu1  ;;  %v6256_v37 = vpop.f32.mrb[76].mxu0 }
 0x443   : > { %13775 = vst [vmem:[#allocation58_spill] sm:$0xff] %v12588_v2  ;;  %v5424_v6 = vpop.f32.mrb[205].mxu1  ;;  %v12592_v29 = vadd.f32 %v6256_v37, %v12189_v21  ;;  %v6258_v53 = vpop.f32.mrb[77].mxu0 }
 0x444   : > { %v12594_v12 = vpop.f32.mrb[206].mxu1  ;;  %v6259_v47 = vpop.f32.mrb[78].mxu0  ;;  %v11145_v6 = vld [vmem:[%s11481_s4 + $0x8d8] ss:$36 sps:$4 sm:$0xff]  }
 0x445   : > { %13776 = vst [vmem:[#allocation59_spill] sm:$0xff] %v12594_v12  ;;  %v5427_v39 = vpop.f32.mrb[207].mxu1  ;;  %v12600_v25 = vadd.f32 %v6259_v47, %v12192_v26  ;;  %v6261_v50 = vpop.f32.mrb[79].mxu0  ;;  %v11144_v47 = vld [vmem:[%s11481_s4 + $0xd50] ss:$36 sps:$4 sm:$0xff]  }
 0x446   : > { %v11148_v50 = vld [vmem:[%s11481_s4 + $0x920] ss:$36 sps:$4 sm:$0xff]  }
 0x447   : > { %9527 = vmatmul.mubr.msk.bf16.gmra.mrb[56].mxu1 %vm4238_vm1, %v11140_v56  ;;  %6471 = vmatmul.mubr.bf16.gmra.mrb[184].mxu0 %v11139_v31  ;;  %v11146_v31 = vld [vmem:[%s11481_s4 + $0xd9c] ss:$36 sps:$4 sm:$0xff]  }
 0x448   : > { %9530 = vmatprep.mubr.msk.bf16.mxu1 %vm4238_vm1, %v11143_v35  ;;  %6478 = vmatprep.mubr.bf16.mxu0 %v11141_v0 }
 0x44a   : > { %v12604_v21 = vpop.f32.mrb[208].mxu1  ;;  %v6264_v53 = vpop.f32.mrb[80].mxu0 }
 0x44b   : > { %13777 = vst [vmem:[#allocation60_spill] sm:$0xff] %v12604_v21  ;;  %v5432_v37 = vpop.f32.mrb[209].mxu1  ;;  %v12608_v39 = vadd.f32 %v6264_v53, %v12197_v32  ;;  %v6266_v12 = vpop.f32.mrb[81].mxu0 }
 0x44c   : > { %v12610_v26 = vpop.f32.mrb[210].mxu1  ;;  %v6267_v2 = vpop.f32.mrb[82].mxu0  ;;  %v11150_v37 = vld [vmem:[%s11481_s4 + $0x968] ss:$36 sps:$4 sm:$0xff]  }
 0x44d   : > { %13778 = vst [vmem:[#allocation61_spill] sm:$0xff] %v12610_v26  ;;  %v5435_v56 = vpop.f32.mrb[211].mxu1  ;;  %v12616_v35 = vadd.f32 %v6267_v2, %v12200_v40  ;;  %v6269_v0 = vpop.f32.mrb[83].mxu0  ;;  %v11149_v2 = vld [vmem:[%s11481_s4 + $0xd98] ss:$36 sps:$4 sm:$0xff]  }
 0x44e   : > { %v11153_v0 = vld [vmem:[%s11481_s4 + $0x9b0] ss:$36 sps:$4 sm:$0xff]  }
 0x44f   : > { %9531 = vmatmul.mubr.msk.bf16.gmra.mrb[60].mxu1 %vm4238_vm1, %v11145_v6  ;;  %6479 = vmatmul.mubr.bf16.gmra.mrb[188].mxu0 %v11144_v47  ;;  %v11151_v47 = vld [vmem:[%s11481_s4 + $0xde4] ss:$36 sps:$4 sm:$0xff]  }
 0x450   : > { %9534 = vmatprep.mubr.msk.bf16.mxu1 %vm4238_vm1, %v11148_v50  ;;  %6486 = vmatprep.mubr.bf16.mxu0 %v11146_v31 }
 0x452   : > { %v12620_v32 = vpop.f32.mrb[212].mxu1  ;;  %v6272_v12 = vpop.f32.mrb[84].mxu0 }
 0x453   : > { %13779 = vst [vmem:[#allocation62_spill] sm:$0xff] %v12620_v32  ;;  %v5440_v53 = vpop.f32.mrb[213].mxu1  ;;  %v12624_v56 = vadd.f32 %v6272_v12, %v12205_v57  ;;  %v6274_v26 = vpop.f32.mrb[85].mxu0 }
 0x454   : > { %v12626_v40 = vpop.f32.mrb[214].mxu1  ;;  %v6275_v21 = vpop.f32.mrb[86].mxu0  ;;  %v11155_v53 = vld [vmem:[%s11481_s4 + $0x9f8] ss:$36 sps:$4 sm:$0xff]  }
 0x455   : > { %13780 = vst [vmem:[#allocation63_spill] sm:$0xff] %v12626_v40  ;;  %v5443_v6 = vpop.f32.mrb[215].mxu1  ;;  %v12632_v50 = vadd.f32 %v6275_v21, %v12208_v62  ;;  %v6277_v31 = vpop.f32.mrb[87].mxu0  ;;  %v11154_v21 = vld [vmem:[%s11481_s4 + $0xde0] ss:$36 sps:$4 sm:$0xff]  }
 0x456   : > { %v11158_v31 = vld [vmem:[%s11481_s4 + $0xa40] ss:$36 sps:$4 sm:$0xff]  }
 0x457   : > { %9535 = vmatmul.mubr.msk.bf16.gmra.mrb[64].mxu1 %vm4238_vm1, %v11150_v37  ;;  %6487 = vmatmul.mubr.bf16.gmra.mrb[192].mxu0 %v11149_v2  ;;  %v11156_v2 = vld [vmem:[%s11481_s4 + $0xe2c] ss:$36 sps:$4 sm:$0xff]  }
 0x458   : > { %9538 = vmatprep.mubr.msk.bf16.mxu1 %vm4238_vm1, %v11153_v0  ;;  %6494 = vmatprep.mubr.bf16.mxu0 %v11151_v47 }
 0x45a   : > { %v12636_v57 = vpop.f32.mrb[216].mxu1  ;;  %v6280_v26 = vpop.f32.mrb[88].mxu0 }
 0x45b   : > { %13781 = vst [vmem:[#allocation64_spill] sm:$0xff] %v12636_v57  ;;  %v5448_v12 = vpop.f32.mrb[217].mxu1  ;;  %v12640_v6 = vadd.f32 %v6280_v26, %v12213_v17  ;;  %v6282_v40 = vpop.f32.mrb[89].mxu0 }
 0x45c   : > { %v12642_v62 = vpop.f32.mrb[218].mxu1  ;;  %v6283_v32 = vpop.f32.mrb[90].mxu0  ;;  %v11160_v12 = vld [vmem:[%s11481_s4 + $0xa88] ss:$36 sps:$4 sm:$0xff]  }
 0x45d   : > { %13782 = vst [vmem:[#allocation65_spill] sm:$0xff] %v12642_v62  ;;  %v5451_v37 = vpop.f32.mrb[219].mxu1  ;;  %v12648_v0 = vadd.f32 %v6283_v32, %v12216_v23  ;;  %v6285_v47 = vpop.f32.mrb[91].mxu0  ;;  %v11159_v32 = vld [vmem:[%s11481_s4 + $0xe28] ss:$36 sps:$4 sm:$0xff]  }
 0x45e   : > { %v11163_v47 = vld [vmem:[%s11481_s4 + $0xad0] ss:$36 sps:$4 sm:$0xff]  }
 0x45f   : > { %9539 = vmatmul.mubr.msk.bf16.gmra.mrb[68].mxu1 %vm4238_vm1, %v11155_v53  ;;  %6495 = vmatmul.mubr.bf16.gmra.mrb[196].mxu0 %v11154_v21  ;;  %v11161_v21 = vld [vmem:[%s11481_s4 + $0xe74] ss:$36 sps:$4 sm:$0xff]  }
 0x460   : > { %9542 = vmatprep.mubr.msk.bf16.mxu1 %vm4238_vm1, %v11158_v31  ;;  %6502 = vmatprep.mubr.bf16.mxu0 %v11156_v2 }
 0x462   : > { %v12652_v17 = vpop.f32.mrb[220].mxu1  ;;  %v6288_v40 = vpop.f32.mrb[92].mxu0 }
 0x463   : > { %13783 = vst [vmem:[#allocation66_spill] sm:$0xff] %v12652_v17  ;;  %v5456_v26 = vpop.f32.mrb[221].mxu1  ;;  %v12656_v37 = vadd.f32 %v6288_v40, %v12221_v34  ;;  %v6290_v62 = vpop.f32.mrb[93].mxu0 }
 0x464   : > { %v12658_v23 = vpop.f32.mrb[222].mxu1  ;;  %v6291_v57 = vpop.f32.mrb[94].mxu0  ;;  %v11165_v26 = vld [vmem:[%s11481_s4 + $0xb18] ss:$36 sps:$4 sm:$0xff]  }
 0x465   : > { %13784 = vst [vmem:[#allocation67_spill] sm:$0xff] %v12658_v23  ;;  %v5459_v53 = vpop.f32.mrb[223].mxu1  ;;  %v12664_v31 = vadd.f32 %v6291_v57, %v12224_v44  ;;  %v6293_v2 = vpop.f32.mrb[95].mxu0  ;;  %v11164_v57 = vld [vmem:[%s11481_s4 + $0xe70] ss:$36 sps:$4 sm:$0xff]  }
 0x466   : > { %v11168_v2 = vld [vmem:[%s11481_s4 + $0xb60] ss:$36 sps:$4 sm:$0xff]  }
 0x467   : > { %9543 = vmatmul.mubr.msk.bf16.gmra.mrb[72].mxu1 %vm4238_vm1, %v11160_v12  ;;  %6503 = vmatmul.mubr.bf16.gmra.mrb[200].mxu0 %v11159_v32  ;;  %v11166_v32 = vld [vmem:[%s11481_s4 + $0xebc] ss:$36 sps:$4 sm:$0xff]  }
 0x468   : > { %9546 = vmatprep.mubr.msk.bf16.mxu1 %vm4238_vm1, %v11163_v47  ;;  %6510 = vmatprep.mubr.bf16.mxu0 %v11161_v21 }
 0x46a   : > { %v12668_v34 = vpop.f32.mrb[224].mxu1  ;;  %v6296_v62 = vpop.f32.mrb[96].mxu0 }
 0x46b   : > { %13785 = vst [vmem:[#allocation68_spill] sm:$0xff] %v12668_v34  ;;  %v5464_v40 = vpop.f32.mrb[225].mxu1  ;;  %v12672_v53 = vadd.f32 %v6296_v62, %v12229_v5  ;;  %v6298_v23 = vpop.f32.mrb[97].mxu0 }
 0x46c   : > { %v12674_v44 = vpop.f32.mrb[226].mxu1  ;;  %v6299_v17 = vpop.f32.mrb[98].mxu0  ;;  %v11170_v40 = vld [vmem:[%s11481_s4 + $0xba8] ss:$36 sps:$4 sm:$0xff]  }
 0x46d   : > { %13786 = vst [vmem:[#allocation69_spill] sm:$0xff] %v12672_v53  ;;  %13787 = vst [vmem:[#allocation70_spill] sm:$0xff] %v12674_v44  ;;  %v5467_v12 = vpop.f32.mrb[227].mxu1  ;;  %v12680_v47 = vadd.f32 %v6299_v17, %v12232_v15  ;;  %v6301_v21 = vpop.f32.mrb[99].mxu0  ;;  %v13790_v44 = vld [vmem:[#allocation6_spill] sm:$0xff] }
 0x46e   : > { %v11169_v17 = vld [vmem:[%s11481_s4 + $0xeb8] ss:$36 sps:$4 sm:$0xff]   ;;  %v11173_v21 = vld [vmem:[%s11481_s4 + $0xbf0] ss:$36 sps:$4 sm:$0xff]  }
 0x46f   : > { %13788 = vst [vmem:[#allocation71_spill] sm:$0xff] %v12680_v47  ;;  %9547 = vmatmul.mubr.msk.bf16.gmra.mrb[76].mxu1 %vm4238_vm1, %v11165_v26  ;;  %6511 = vmatmul.mubr.bf16.gmra.mrb[204].mxu0 %v11164_v57  ;;  %v11171_v57 = vld [vmem:[%s11481_s4 + $0xf04] ss:$36 sps:$4 sm:$0xff]  }
 0x470   : > { %9550 = vmatprep.mubr.msk.bf16.mxu1 %vm4238_vm1, %v11168_v2  ;;  %6518 = vmatprep.mubr.bf16.mxu0 %v11166_v32  ;;  %v13793_v2 = vld [vmem:[#allocation7_spill] sm:$0xff] }
 0x472   : > { %v12684_v5 = vpop.f32.mrb[228].mxu1  ;;  %v6304_v23 = vpop.f32.mrb[100].mxu0 }
 0x473   : > { %13789 = vst [vmem:[#allocation72_spill] sm:$0xff] %v12684_v5  ;;  %v5472_v62 = vpop.f32.mrb[229].mxu1  ;;  %v12688_v12 = vadd.f32 %v6304_v23, %v13790_v44  ;;  %v6306_v34 = vpop.f32.mrb[101].mxu0 }
 0x474   : > { %v12690_v15 = vpop.f32.mrb[230].mxu1  ;;  %v6307_v47 = vpop.f32.mrb[102].mxu0  ;;  %v11175_v62 = vld [vmem:[%s11481_s4 + $0xc38] ss:$36 sps:$4 sm:$0xff]  }
 0x475   : > { %13791 = vst [vmem:[#allocation6_spill] sm:$0xff] %v12688_v12  ;;  %13792 = vst [vmem:[#allocation73_spill] sm:$0xff] %v12690_v15  ;;  %v5475_v26 = vpop.f32.mrb[231].mxu1  ;;  %v12696_v32 = vadd.f32 %v6307_v47, %v13793_v2  ;;  %v6309_v5 = vpop.f32.mrb[103].mxu0  ;;  %v13796_v15 = vld [vmem:[#allocation8_spill] sm:$0xff] }
 0x476   : > { %v11174_v5 = vld [vmem:[%s11481_s4 + $0xf00] ss:$36 sps:$4 sm:$0xff]  }
 0x477   : > { %13794 = vst [vmem:[#allocation7_spill] sm:$0xff] %v12696_v32  ;;  %9551 = vmatmul.mubr.msk.bf16.gmra.mrb[80].mxu1 %vm4238_vm1, %v11170_v40  ;;  %6519 = vmatmul.mubr.bf16.gmra.mrb[208].mxu0 %v11169_v17  ;;  %v11178_v2 = vld [vmem:[%s11481_s4 + $0xc80] ss:$36 sps:$4 sm:$0xff]   ;;  %v11176_v17 = vld [vmem:[%s11481_s4 + $0xf4c] ss:$36 sps:$4 sm:$0xff]  }
 0x478   : > { %9554 = vmatprep.mubr.msk.bf16.mxu1 %vm4238_vm1, %v11173_v21  ;;  %6526 = vmatprep.mubr.bf16.mxu0 %v11171_v57  ;;  %v13799_v21 = vld [vmem:[#allocation9_spill] sm:$0xff] }
 0x47a   : > { %v12700_v34 = vpop.f32.mrb[232].mxu1  ;;  %v6312_v44 = vpop.f32.mrb[104].mxu0 }
 0x47b   : > { %13795 = vst [vmem:[#allocation74_spill] sm:$0xff] %v12700_v34  ;;  %v5480_v23 = vpop.f32.mrb[233].mxu1  ;;  %v12704_v26 = vadd.f32 %v6312_v44, %v13796_v15  ;;  %v6314_v53 = vpop.f32.mrb[105].mxu0 }
 0x47c   : > { %v12706_v47 = vpop.f32.mrb[234].mxu1  ;;  %v6315_v32 = vpop.f32.mrb[106].mxu0  ;;  %v11180_v23 = vld [vmem:[%s11481_s4 + $0xcc8] ss:$36 sps:$4 sm:$0xff]  }
 0x47d   : > { %13797 = vst [vmem:[#allocation8_spill] sm:$0xff] %v12704_v26  ;;  %13798 = vst [vmem:[#allocation75_spill] sm:$0xff] %v12706_v47  ;;  %v5483_v40 = vpop.f32.mrb[235].mxu1  ;;  %v12712_v57 = vadd.f32 %v6315_v32, %v13799_v21  ;;  %v6317_v34 = vpop.f32.mrb[107].mxu0  ;;  %v13802_v47 = vld [vmem:[#allocation10_spill] sm:$0xff] }
 0x47e   : > { %v11179_v34 = vld [vmem:[%s11481_s4 + $0xf48] ss:$36 sps:$4 sm:$0xff]   ;;  %v11183_v21 = vld [vmem:[%s11481_s4 + $0xd10] ss:$36 sps:$4 sm:$0xff]  }
 0x47f   : > { %13800 = vst [vmem:[#allocation9_spill] sm:$0xff] %v12712_v57  ;;  %9555 = vmatmul.mubr.msk.bf16.gmra.mrb[84].mxu1 %vm4238_vm1, %v11175_v62  ;;  %6527 = vmatmul.mubr.bf16.gmra.mrb[212].mxu0 %v11174_v5  ;;  %v11181_v5 = vld [vmem:[%s11481_s4 + $0xf94] ss:$36 sps:$4 sm:$0xff]  }
 0x480   : > { %9558 = vmatprep.mubr.msk.bf16.mxu1 %vm4238_vm1, %v11178_v2  ;;  %6534 = vmatprep.mubr.bf16.mxu0 %v11176_v17  ;;  %v13805_v2 = vld [vmem:[#allocation11_spill] sm:$0xff] }
 0x482   : > { %v12716_v53 = vpop.f32.mrb[236].mxu1  ;;  %v6320_v15 = vpop.f32.mrb[108].mxu0 }
 0x483   : > { %13801 = vst [vmem:[#allocation76_spill] sm:$0xff] %v12716_v53  ;;  %v5488_v44 = vpop.f32.mrb[237].mxu1  ;;  %v12720_v40 = vadd.f32 %v6320_v15, %v13802_v47  ;;  %v6322_v26 = vpop.f32.mrb[109].mxu0 }
 0x484   : > { %v12722_v32 = vpop.f32.mrb[238].mxu1  ;;  %v6323_v57 = vpop.f32.mrb[110].mxu0  ;;  %v11185_v44 = vld [vmem:[%s11481_s4 + $0xd58] ss:$36 sps:$4 sm:$0xff]  }
 0x485   : > { %13803 = vst [vmem:[#allocation10_spill] sm:$0xff] %v12720_v40  ;;  %13804 = vst [vmem:[#allocation77_spill] sm:$0xff] %v12722_v32  ;;  %v5491_v62 = vpop.f32.mrb[239].mxu1  ;;  %v12728_v17 = vadd.f32 %v6323_v57, %v13805_v2  ;;  %v6325_v53 = vpop.f32.mrb[111].mxu0  ;;  %v13808_v32 = vld [vmem:[#allocation12_spill] sm:$0xff] }
 0x486   : > { %v11184_v53 = vld [vmem:[%s11481_s4 + $0xf90] ss:$36 sps:$4 sm:$0xff]   ;;  %v11188_v2 = vld [vmem:[%s11481_s4 + $0xda0] ss:$36 sps:$4 sm:$0xff]  }
 0x487   : > { %13806 = vst [vmem:[#allocation11_spill] sm:$0xff] %v12728_v17  ;;  %9559 = vmatmul.mubr.msk.bf16.gmra.mrb[88].mxu1 %vm4238_vm1, %v11180_v23  ;;  %6535 = vmatmul.mubr.bf16.gmra.mrb[216].mxu0 %v11179_v34  ;;  %v11186_v34 = vld [vmem:[%s11481_s4 + $0xfdc] ss:$36 sps:$4 sm:$0xff]  }
 0x488   : > { %9562 = vmatprep.mubr.msk.bf16.mxu1 %vm4238_vm1, %v11183_v21  ;;  %6542 = vmatprep.mubr.bf16.mxu0 %v11181_v5  ;;  %v13811_v21 = vld [vmem:[#allocation13_spill] sm:$0xff] }
 0x48a   : > { %v12732_v26 = vpop.f32.mrb[240].mxu1  ;;  %v6328_v47 = vpop.f32.mrb[112].mxu0 }
 0x48b   : > { %13807 = vst [vmem:[#allocation78_spill] sm:$0xff] %v12732_v26  ;;  %v5496_v15 = vpop.f32.mrb[241].mxu1  ;;  %v12736_v62 = vadd.f32 %v6328_v47, %v13808_v32  ;;  %v6330_v40 = vpop.f32.mrb[113].mxu0 }
 0x48c   : > { %v12738_v57 = vpop.f32.mrb[242].mxu1  ;;  %v6331_v17 = vpop.f32.mrb[114].mxu0  ;;  %v11190_v15 = vld [vmem:[%s11481_s4 + $0xde8] ss:$36 sps:$4 sm:$0xff]  }
 0x48d   : > { %13809 = vst [vmem:[#allocation12_spill] sm:$0xff] %v12736_v62  ;;  %13810 = vst [vmem:[#allocation79_spill] sm:$0xff] %v12738_v57  ;;  %v5499_v23 = vpop.f32.mrb[243].mxu1  ;;  %v12744_v5 = vadd.f32 %v6331_v17, %v13811_v21  ;;  %v6333_v26 = vpop.f32.mrb[115].mxu0  ;;  %v13814_v57 = vld [vmem:[#allocation14_spill] sm:$0xff] }
 0x48e   : > { %v11189_v26 = vld [vmem:[%s11481_s4 + $0xfd8] ss:$36 sps:$4 sm:$0xff]   ;;  %v11193_v21 = vld [vmem:[%s11481_s4 + $0xe30] ss:$36 sps:$4 sm:$0xff]  }
 0x48f   : > { %13812 = vst [vmem:[#allocation13_spill] sm:$0xff] %v12744_v5  ;;  %9563 = vmatmul.mubr.msk.bf16.gmra.mrb[92].mxu1 %vm4238_vm1, %v11185_v44  ;;  %6543 = vmatmul.mubr.bf16.gmra.mrb[220].mxu0 %v11184_v53  ;;  %v11191_v53 = vld [vmem:[%s11481_s4 + $0x1024] ss:$36 sps:$4 sm:$0xff]  }
 0x490   : > { %9566 = vmatprep.mubr.msk.bf16.mxu1 %vm4238_vm1, %v11188_v2  ;;  %6550 = vmatprep.mubr.bf16.mxu0 %v11186_v34  ;;  %v13817_v2 = vld [vmem:[#allocation15_spill] sm:$0xff] }
 0x492   : > { %v12748_v40 = vpop.f32.mrb[244].mxu1  ;;  %v6336_v32 = vpop.f32.mrb[116].mxu0 }
 0x493   : > { %13813 = vst [vmem:[#allocation80_spill] sm:$0xff] %v12748_v40  ;;  %v5504_v47 = vpop.f32.mrb[245].mxu1  ;;  %v12752_v23 = vadd.f32 %v6336_v32, %v13814_v57  ;;  %v6338_v62 = vpop.f32.mrb[117].mxu0 }
 0x494   : > { %v12754_v17 = vpop.f32.mrb[246].mxu1  ;;  %v6339_v5 = vpop.f32.mrb[118].mxu0  ;;  %v11195_v47 = vld [vmem:[%s11481_s4 + $0xe78] ss:$36 sps:$4 sm:$0xff]  }
 0x495   : > { %13815 = vst [vmem:[#allocation14_spill] sm:$0xff] %v12752_v23  ;;  %13816 = vst [vmem:[#allocation81_spill] sm:$0xff] %v12754_v17  ;;  %v5507_v44 = vpop.f32.mrb[247].mxu1  ;;  %v12760_v34 = vadd.f32 %v6339_v5, %v13817_v2  ;;  %v6341_v40 = vpop.f32.mrb[119].mxu0  ;;  %v13820_v17 = vld [vmem:[#allocation16_spill] sm:$0xff] }
 0x496   : > { %v11194_v40 = vld [vmem:[%s11481_s4 + $0x1020] ss:$36 sps:$4 sm:$0xff]  }
 0x497   : > { %13818 = vst [vmem:[#allocation15_spill] sm:$0xff] %v12760_v34  ;;  %9567 = vmatmul.mubr.msk.bf16.gmra.mrb[96].mxu1 %vm4238_vm1, %v11190_v15  ;;  %6551 = vmatmul.mubr.bf16.gmra.mrb[224].mxu0 %v11189_v26  ;;  %v11198_v2 = vld [vmem:[%s11481_s4 + $0xec0] ss:$36 sps:$4 sm:$0xff]   ;;  %v11196_v26 = vld [vmem:[%s11481_s4 + $0x106c] ss:$36 sps:$4 sm:$0xff]  }
 0x498   : > { %9570 = vmatprep.mubr.msk.bf16.mxu1 %vm4238_vm1, %v11193_v21  ;;  %6558 = vmatprep.mubr.bf16.mxu0 %v11191_v53  ;;  %v13823_v21 = vld [vmem:[#allocation17_spill] sm:$0xff] }
 0x49a   : > { %v12764_v62 = vpop.f32.mrb[248].mxu1  ;;  %v6344_v57 = vpop.f32.mrb[120].mxu0 }
 0x49b   : > { %13819 = vst [vmem:[#allocation82_spill] sm:$0xff] %v12764_v62  ;;  %v5512_v32 = vpop.f32.mrb[249].mxu1  ;;  %v12768_v44 = vadd.f32 %v6344_v57, %v13820_v17  ;;  %v6346_v23 = vpop.f32.mrb[121].mxu0 }
 0x49c   : > { %v12770_v5 = vpop.f32.mrb[250].mxu1  ;;  %v6347_v34 = vpop.f32.mrb[122].mxu0  ;;  %v11200_v32 = vld [vmem:[%s11481_s4 + $0xf08] ss:$36 sps:$4 sm:$0xff]  }
 0x49d   : > { %13821 = vst [vmem:[#allocation16_spill] sm:$0xff] %v12768_v44  ;;  %13822 = vst [vmem:[#allocation83_spill] sm:$0xff] %v12770_v5  ;;  %v5515_v15 = vpop.f32.mrb[251].mxu1  ;;  %v12776_v53 = vadd.f32 %v6347_v34, %v13823_v21  ;;  %v6349_v62 = vpop.f32.mrb[123].mxu0  ;;  %v13826_v5 = vld [vmem:[#allocation18_spill] sm:$0xff] }
 0x49e   : > { %v11199_v34 = vld [vmem:[%s11481_s4 + $0x1068] ss:$36 sps:$4 sm:$0xff]   ;;  %v11203_v62 = vld [vmem:[%s11481_s4 + $0xf50] ss:$36 sps:$4 sm:$0xff]  }
 0x49f   : > { %13824 = vst [vmem:[#allocation17_spill] sm:$0xff] %v12776_v53  ;;  %9571 = vmatmul.mubr.msk.bf16.gmra.mrb[100].mxu1 %vm4238_vm1, %v11195_v47  ;;  %6559 = vmatmul.mubr.bf16.gmra.mrb[228].mxu0 %v11194_v40  ;;  %v11201_v40 = vld [vmem:[%s11481_s4 + $0x10b4] ss:$36 sps:$4 sm:$0xff]   ;;  %v13829_v53 = vld [vmem:[#allocation19_spill] sm:$0xff] }
 0x4a0   : > { %9574 = vmatprep.mubr.msk.bf16.mxu1 %vm4238_vm1, %v11198_v2  ;;  %6566 = vmatprep.mubr.bf16.mxu0 %v11196_v26 }
 0x4a2   : > { %v12780_v23 = vpop.f32.mrb[252].mxu1  ;;  %v6352_v17 = vpop.f32.mrb[124].mxu0 }
 0x4a3   : > { %13825 = vst [vmem:[#allocation84_spill] sm:$0xff] %v12780_v23  ;;  %v5520_v57 = vpop.f32.mrb[253].mxu1  ;;  %v12784_v15 = vadd.f32 %v6352_v17, %v13826_v5  ;;  %v6354_v44 = vpop.f32.mrb[125].mxu0 }
 0x4a4   : > { %v12786_v12 = vpop.f32.mrb[254].mxu1  ;;  %v6355_v21 = vpop.f32.mrb[126].mxu0 }
 0x4a5   : > { %13827 = vst [vmem:[#allocation18_spill] sm:$0xff] %v12784_v15  ;;  %13828 = vst [vmem:[#allocation85_spill] sm:$0xff] %v12786_v12  ;;  %v5523_v47 = vpop.f32.mrb[255].mxu1  ;;  %v12792_v2 = vadd.f32 %v6355_v21, %v13829_v53  ;;  %v6357_v26 = vpop.f32.mrb[127].mxu0  ;;  %v11206_v15 = vld [vmem:[%s11481_s4 + $0x10fc] ss:$36 sps:$4 sm:$0xff]  }
 0x4a6   : > { %v11205_v47 = vld [vmem:[%s11481_s4 + $0xf98] ss:$36 sps:$4 sm:$0xff]   ;;  %v13832_v26 = vld [vmem:[#allocation20_spill] sm:$0xff] }
 0x4a7   : > { %13830 = vst [vmem:[#allocation19_spill] sm:$0xff] %v12792_v2  ;;  %9575 = vmatmul.mubr.msk.bf16.gmra.mrb[104].mxu1 %vm4238_vm1, %v11200_v32  ;;  %6567 = vmatmul.mubr.bf16.gmra.mrb[232].mxu0 %v11199_v34  ;;  %v11204_v32 = vld [vmem:[%s11481_s4 + $0x10b0] ss:$36 sps:$4 sm:$0xff]   ;;  %v11208_v34 = vld [vmem:[%s11481_s4 + $0xfe0] ss:$36 sps:$4 sm:$0xff]  }
 0x4a8   : > { %9578 = vmatprep.mubr.msk.bf16.mxu1 %vm4238_vm1, %v11203_v62  ;;  %6574 = vmatprep.mubr.bf16.mxu0 %v11201_v40 }
 0x4aa   : > { %v9472_v44 = vpop.f32.mrb[0].mxu1  ;;  %v6360_v5 = vpop.f32.mrb[128].mxu0 }
 0x4ab   : > { %v6658_v17 = vadd.f32 %v12311_v13, %v9472_v44  ;;  %v6649_v57 = vpop.f32.mrb[1].mxu1  ;;  %v12799_v53 = vadd.f32 %v6360_v5, %v12293_v61  ;;  %v6362_v21 = vpop.f32.mrb[129].mxu0  ;;  %v13833_v13 = vld [vmem:[#allocation21_spill] sm:$0xff] }
 0x4ac   : > { %v6650_v12 = vadd.f32 %v13832_v26, %v6649_v57  ;;  %v9473_v23 = vpop.f32.mrb[2].mxu1  ;;  %v6363_v62 = vpop.f32.mrb[130].mxu0  ;;  %v11210_v57 = vld [vmem:[%s11481_s4 + $0x1028] ss:$36 sps:$4 sm:$0xff]   ;;  %v13835_v21 = vld [vmem:[#allocation22_spill] sm:$0xff] }
 0x4ad   : > { %13831 = vst [vmem:[#allocation86_spill] sm:$0xff] %v12799_v53  ;;  %7163 = vst.msk [vmem:[#allocation2 + $0x10] sm:$0xff] %vm7160_vm2, %v6658_v17  ;;  %v6661_v40 = vadd.f32 %v12319_v9, %v9473_v23  ;;  %v6652_v2 = vpop.f32.mrb[3].mxu1  ;;  %v12809_v61 = vadd.f32 %v6363_v62, %v13833_v13  ;;  %v6365_v44 = vpop.f32.mrb[131].mxu0  ;;  %v12820_v9 = vld [vmem:[%s13719_s2] ss:$0 sm:$0xff] }
 0x4ae   : > { %7161 = vst.msk [vmem:[#allocation2] sm:$0xff] %vm7160_vm2, %v6650_v12  ;;  %v6653_v5 = vadd.f32 %v12305_v60, %v6652_v2  ;;  %v11209_v17 = vld [vmem:[%s11481_s4 + $0x10f8] ss:$36 sps:$4 sm:$0xff]   ;;  %v11213_v62 = vld [vmem:[%s11481_s4 + $0x1070] ss:$36 sps:$4 sm:$0xff]  }
 0x4af   : > { %13834 = vst [vmem:[#allocation20_spill] sm:$0xff] %v12809_v61  ;;  %7164 = vst.msk [vmem:[#allocation2 + $0x18] sm:$0xff] %vm7160_vm2, %v6661_v40  ;;  %9579 = vmatmul.mubr.msk.bf16.gmra.mrb[108].mxu1 %vm4238_vm1, %v11205_v47  ;;  %6575 = vmatmul.mubr.bf16.gmra.mrb[236].mxu0 %v11204_v32  ;;  %v13838_v61 = vld [vmem:[#allocation26_spill] sm:$0xff] }
 0x4b0   : > { %7162 = vst.msk [vmem:[#allocation2 + $0x8] sm:$0xff] %vm7160_vm2, %v6653_v5  ;;  %9582 = vmatprep.mubr.msk.bf16.mxu1 %vm4238_vm1, %v11208_v34  ;;  %6582 = vmatprep.mubr.bf16.mxu0 %v11206_v15 }
 0x4b2   : > { %v9476_v12 = vpop.f32.mrb[4].mxu1  ;;  %v6368_v60 = vpop.f32.mrb[132].mxu0 }
 0x4b3   : > { %v6674_v23 = vadd.f32 %v12339_v41, %v9476_v12  ;;  %v6665_v2 = vpop.f32.mrb[5].mxu1  ;;  %v12826_v26 = vadd.f32 %v6368_v60, %v13835_v21  ;;  %v6370_v32 = vpop.f32.mrb[133].mxu0  ;;  %v11211_v12 = vld [vmem:[%s11481_s4 + $0x1144] ss:$36 sps:$4 sm:$0xff]  }
 0x4b4   : > { %v7291_v47 = vld [vmem:[#allocation2 + $0x10] sm:$0xff]  ;;  %v6666_v15 = vadd.f32 %v12325_v10, %v6665_v2  ;;  %v9477_v34 = vpop.f32.mrb[6].mxu1  ;;  %v6371_v41 = vpop.f32.mrb[134].mxu0  ;;  %v13837_v10 = vld [vmem:[#allocation23_spill] sm:$0xff] }
 0x4b5   : > { %13836 = vst [vmem:[#allocation21_spill] sm:$0xff] %v12826_v26  ;;  %v7426_v40 = vadd.f32 %v12820_v9, %v7291_v47  ;;  %v7289_v13 = vld [vmem:[#allocation2] sm:$0xff]  ;;  %7167 = vst.msk [vmem:[#allocation2 + $0x30] sm:$0xff] %vm7160_vm2, %v6674_v23  ;;  %v6677_v44 = vadd.f32 %v12347_v38, %v9477_v34  ;;  %v6668_v5 = vpop.f32.mrb[7].mxu1  ;;  %v12841_v2 = vadd.f32 %v6371_v41, %v13837_v10  ;;  %v6373_v32 = vpop.f32.mrb[135].mxu0 }
 0x4b6   : > { %v7424_v60 = vadd.f32 %v12820_v9, %v7289_v13  ;;  %v7292_v21 = vld [vmem:[#allocation2 + $0x18] sm:$0xff]  ;;  %7165 = vst.msk [vmem:[#allocation2 + $0x20] sm:$0xff] %vm7160_vm2, %v6666_v15  ;;  %v6669_v53 = vadd.f32 %v13838_v61, %v6668_v5 }
 0x4b7   : > { %v7554_v47 = vmax.f32 %v7426_v40, 0.0  ;;  %v7427_v26 = vadd.f32 %v12820_v9, %v7292_v21  ;;  %v7290_v23 = vld [vmem:[#allocation2 + $0x8] sm:$0xff]  ;;  %7168 = vst.msk [vmem:[#allocation2 + $0x38] sm:$0xff] %vm7160_vm2, %v6677_v44  ;;  %9583 = vmatmul.mubr.msk.bf16.gmra.mrb[112].mxu1 %vm4238_vm1, %v11210_v57  ;;  %6583 = vmatmul.mubr.bf16.gmra.mrb[240].mxu0 %v11209_v17  ;;  %v11215_v5 = vld [vmem:[%s11481_s4 + $0x10b8] ss:$36 sps:$4 sm:$0xff]  }
 0x4b8   : > { %v7552_v38 = vmax.f32 %v7424_v60, 0.0  ;;  %v7425_v34 = vadd.f32 %v12820_v9, %v7290_v23  ;;  %7166 = vst.msk [vmem:[#allocation2 + $0x28] sm:$0xff] %vm7160_vm2, %v6669_v53  ;;  %9586 = vmatprep.mubr.msk.bf16.mxu1 %vm4238_vm1, %v11213_v62  ;;  %6590 = vmatprep.mubr.bf16.mxu0 %v11211_v12  ;;  %v11214_v62 = vld [vmem:[%s11481_s4 + $0x1140] ss:$36 sps:$4 sm:$0xff]   ;;  %v13839_v60 = vld [vmem:[#allocation24_spill] sm:$0xff] }
 0x4b9   : > { %v9276_v61 = vpack.c.bf16 %v7554_v47, %v7554_v47  ;;  %v7555_v15 = vmax.f32 %v7427_v26, 0.0  ;;  %v11218_v23 = vld [vmem:[%s11481_s4 + $0x1100] ss:$36 sps:$4 sm:$0xff]  }
 0x4ba   : > { %v9274_v40 = vpack.c.bf16 %v7552_v38, %v7552_v38  ;;  %v7553_v13 = vmax.f32 %v7425_v34, 0.0  ;;  %v9480_v41 = vpop.f32.mrb[8].mxu1  ;;  %v6376_v53 = vpop.f32.mrb[136].mxu0 }
 0x4bb   : > { %8195 = vst.msk [vmem:[%s12851_s9 + $0x8] sm:$0xf] %vm8192_vm3, %v9276_v61  ;;  %v9277_v57 = vpack.c.bf16 %v7555_v15, %v7555_v15  ;;  %v6690_v17 = vadd.f32 %v12368_v1, %v9480_v41  ;;  %v6681_v44 = vpop.f32.mrb[9].mxu1  ;;  %v12861_v21 = vadd.f32 %v6376_v53, %v13839_v60  ;;  %v6378_v10 = vpop.f32.mrb[137].mxu0 }
 0x4bc   : > { %8193 = vst.msk [vmem:[%s12851_s9] sm:$0xf] %vm8192_vm3, %v9274_v40  ;;  %v9275_v26 = vpack.c.bf16 %v7553_v13, %v7553_v13  ;;  %v7295_v12 = vld [vmem:[#allocation2 + $0x30] sm:$0xff]  ;;  %v6682_v32 = vadd.f32 %v12353_v49, %v6681_v44  ;;  %v9481_v47 = vpop.f32.mrb[10].mxu1  ;;  %v6379_v34 = vpop.f32.mrb[138].mxu0  ;;  %v13840_v49 = vld [vmem:[#allocation25_spill] sm:$0xff] }
 0x4bd   : > { %8196 = vst.msk [vmem:[%s12851_s9 + $0xc] sm:$0xf] %vm8192_vm3, %v9277_v57  ;;  %v7430_v1 = vadd.f32 %v12820_v9, %v7295_v12  ;;  %v7293_v38 = vld [vmem:[#allocation2 + $0x20] sm:$0xff]  ;;  %v6693_v61 = vadd.f32 %v12376_v30, %v9481_v47  ;;  %v6684_v15 = vpop.f32.mrb[11].mxu1  ;;  %v11216_v40 = vld [vmem:[%s11481_s4 + $0x118c] ss:$36 sps:$4 sm:$0xff]   ;;  %v12876_v53 = vadd.f32 %v6379_v34, %v13840_v49 }
 0x4be   : > { %7171 = vst.msk [vmem:[#allocation2 + $0x50] sm:$0xff] %vm7160_vm2, %v6690_v17  ;;  %v7428_v13 = vadd.f32 %v12820_v9, %v7293_v38  ;;  %v7296_v41 = vld [vmem:[#allocation2 + $0x38] sm:$0xff]  ;;  %7169 = vst.msk [vmem:[#allocation2 + $0x40] sm:$0xff] %vm7160_vm2, %v6682_v32  ;;  %v6381_v57 = vpop.f32.mrb[139].mxu0  ;;  %v6685_v44 = vadd.f32 %v12361_v63, %v6684_v15  ;;  %v11219_v15 = vld [vmem:[%s11481_s4 + $0x1188] ss:$36 sps:$4 sm:$0xff]  }
 0x4bf   : > { %8194 = vst.msk [vmem:[%s12851_s9 + $0x4] sm:$0xf] %vm8192_vm3, %v9275_v26  ;;  %v7558_v12 = vmax.f32 %v7430_v1, 0.0  ;;  %v7431_v17 = vadd.f32 %v12820_v9, %v7296_v41  ;;  %v7294_v30 = vld [vmem:[#allocation2 + $0x28] sm:$0xff]  ;;  %9587 = vmatmul.mubr.msk.bf16.gmra.mrb[116].mxu1 %vm4238_vm1, %v11215_v5  ;;  %6591 = vmatmul.mubr.bf16.gmra.mrb[244].mxu0 %v11214_v62 }
 0x4c0   : > { %7172 = vst.msk [vmem:[#allocation2 + $0x58] sm:$0xff] %vm7160_vm2, %v6693_v61  ;;  %v7556_v26 = vmax.f32 %v7428_v13, 0.0  ;;  %v7429_v60 = vadd.f32 %v12820_v9, %v7294_v30  ;;  %7170 = vst.msk [vmem:[#allocation2 + $0x48] sm:$0xff] %vm7160_vm2, %v6685_v44  ;;  %9590 = vmatprep.mubr.msk.bf16.mxu1 %vm4238_vm1, %v11218_v23  ;;  %6598 = vmatprep.mubr.bf16.mxu0 %v11216_v40  ;;  %v11220_v13 = vld [vmem:[%s11481_s4 + $0x1148] ss:$36 sps:$4 sm:$0xff]  }
 0x4c1   : > { %v9280_v63 = vpack.c.bf16 %v7558_v12, %v7558_v12  ;;  %v7559_v10 = vmax.f32 %v7431_v17, 0.0  ;;  %v13841_v40 = vld [vmem:[#allocation27_spill] sm:$0xff]  ;;  %v11223_v12 = vld [vmem:[%s11481_s4 + $0x1190] ss:$36 sps:$4 sm:$0xff]  }
 0x4c2   : > { %v9278_v32 = vpack.c.bf16 %v7556_v26, %v7556_v26  ;;  %v7557_v47 = vmax.f32 %v7429_v60, 0.0  ;;  %v9484_v1 = vpop.f32.mrb[12].mxu1  ;;  %v6384_v38 = vpop.f32.mrb[140].mxu0 }
 0x4c3   : > { %8199 = vst.msk [vmem:[%s12851_s9 + $0x18] sm:$0xf] %vm8192_vm3, %v9280_v63  ;;  %v9281_v5 = vpack.c.bf16 %v7559_v10, %v7559_v10  ;;  %v6706_v34 = vadd.f32 %v12400_v27, %v9484_v1  ;;  %v6697_v61 = vpop.f32.mrb[13].mxu1  ;;  %v12893_v41 = vadd.f32 %v6384_v38, %v13841_v40  ;;  %v6386_v49 = vpop.f32.mrb[141].mxu0  ;;  %v11221_v63 = vld [vmem:[%s11481_s4 + $0x11d4] ss:$36 sps:$4 sm:$0xff]  }
 0x4c4   : > { %8197 = vst.msk [vmem:[%s12851_s9 + $0x10] sm:$0xf] %vm8192_vm3, %v9278_v32  ;;  %v9279_v62 = vpack.c.bf16 %v7557_v47, %v7557_v47  ;;  %v6698_v57 = vadd.f32 %v12384_v20, %v6697_v61  ;;  %v9485_v44 = vpop.f32.mrb[14].mxu1  ;;  %v6387_v30 = vpop.f32.mrb[142].mxu0  ;;  %v13842_v20 = vld [vmem:[#allocation28_spill] sm:$0xff] }
 0x4c5   : > { %v7299_v23 = vld [vmem:[#allocation2 + $0x50] sm:$0xff]  ;;  %8200 = vst.msk [vmem:[%s12851_s9 + $0x1c] sm:$0xf] %vm8192_vm3, %v9281_v5  ;;  %v7297_v17 = vld [vmem:[#allocation2 + $0x40] sm:$0xff]  ;;  %v6709_v26 = vadd.f32 %v12408_v48, %v9485_v44  ;;  %v6700_v60 = vpop.f32.mrb[15].mxu1  ;;  %v12908_v47 = vadd.f32 %v6387_v30, %v13842_v20  ;;  %v6389_v1 = vpop.f32.mrb[143].mxu0 }
 0x4c6   : > { %v7434_v27 = vadd.f32 %v12820_v9, %v7299_v23  ;;  %7175 = vst.msk [vmem:[#allocation2 + $0x70] sm:$0xff] %vm7160_vm2, %v6706_v34  ;;  %v7432_v10 = vadd.f32 %v12820_v9, %v7297_v17  ;;  %7173 = vst.msk [vmem:[#allocation2 + $0x60] sm:$0xff] %vm7160_vm2, %v6698_v57  ;;  %v6701_v5 = vadd.f32 %v12392_v46, %v6700_v60  ;;  %v11225_v30 = vld [vmem:[%s11481_s4 + $0x11d8] ss:$36 sps:$4 sm:$0xff]  }
 0x4c7   : > { %8198 = vst.msk [vmem:[%s12851_s9 + $0x14] sm:$0xf] %vm8192_vm3, %v9279_v62  ;;  %v7300_v32 = vld [vmem:[#allocation2 + $0x58] sm:$0xff]  ;;  %v7298_v48 = vld [vmem:[#allocation2 + $0x48] sm:$0xff]  ;;  %9591 = vmatmul.mubr.msk.bf16.gmra.mrb[120].mxu1 %vm4238_vm1, %v11220_v13  ;;  %6599 = vmatmul.mubr.bf16.gmra.mrb[248].mxu0 %v11219_v15 }
 0x4c8   : > { %v7562_v38 = vmax.f32 %v7434_v27, 0.0  ;;  %v7435_v34 = vadd.f32 %v12820_v9, %v7300_v32  ;;  %7176 = vst.msk [vmem:[#allocation2 + $0x78] sm:$0xff] %vm7160_vm2, %v6709_v26  ;;  %v7560_v61 = vmax.f32 %v7432_v10, 0.0  ;;  %v7433_v62 = vadd.f32 %v12820_v9, %v7298_v48  ;;  %7174 = vst.msk [vmem:[#allocation2 + $0x68] sm:$0xff] %vm7160_vm2, %v6701_v5  ;;  %9594 = vmatprep.mubr.msk.bf16.mxu1 %vm4238_vm1, %v11223_v12  ;;  %v11224_v32 = vld [vmem:[%s11481_s4 + $0x11d0] ss:$36 sps:$4 sm:$0xff]  }
 0x4c9   : > { %6606 = vmatprep.mubr.bf16.mxu0 %v11221_v63 }
 0x4ca   : > { %v9284_v46 = vpack.c.bf16 %v7562_v38, %v7562_v38  ;;  %v7563_v23 = vmax.f32 %v7435_v34, 0.0  ;;  %v9282_v40 = vpack.c.bf16 %v7560_v61, %v7560_v61  ;;  %v7561_v49 = vmax.f32 %v7433_v62, 0.0  ;;  %v9488_v57 = vpop.f32.mrb[16].mxu1  ;;  %v6392_v44 = vpop.f32.mrb[144].mxu0 }
 0x4cb   : > { %v6722_v27 = vadd.f32 %v12432_v22, %v9488_v57  ;;  %v6713_v17 = vpop.f32.mrb[17].mxu1  ;;  %v12924_v26 = vadd.f32 %v6392_v44, %v12349_v3  ;;  %v6394_v60 = vpop.f32.mrb[145].mxu0 }
 0x4cc   : > { %8203 = vst.msk [vmem:[%s12851_s9 + $0x28] sm:$0xf] %vm8192_vm3, %v9284_v46  ;;  %v9285_v13 = vpack.c.bf16 %v7563_v23, %v7563_v23  ;;  %8201 = vst.msk [vmem:[%s12851_s9 + $0x20] sm:$0xf] %vm8192_vm3, %v9282_v40  ;;  %v9283_v15 = vpack.c.bf16 %v7561_v49, %v7561_v49  ;;  %v6714_v63 = vadd.f32 %v12416_v51, %v6713_v17  ;;  %v9489_v10 = vpop.f32.mrb[18].mxu1  ;;  %v6395_v1 = vpop.f32.mrb[146].mxu0 }
 0x4cd   : > { %v7303_v12 = vld [vmem:[#allocation2 + $0x70] sm:$0xff]  ;;  %v7301_v22 = vld [vmem:[#allocation2 + $0x60] sm:$0xff]  ;;  %7179 = vst.msk [vmem:[#allocation2 + $0x90] sm:$0xff] %vm7160_vm2, %v6722_v27  ;;  %v6725_v5 = vadd.f32 %v12440_v16, %v9489_v10  ;;  %v6716_v38 = vpop.f32.mrb[19].mxu1  ;;  %v13843_v51 = vld [vmem:[#allocation29_spill] sm:$0xff]  ;;  %v6397_v61 = vpop.f32.mrb[147].mxu0 }
 0x4ce   : > { %8204 = vst.msk [vmem:[%s12851_s9 + $0x2c] sm:$0xf] %vm8192_vm3, %v9285_v13  ;;  %v7438_v20 = vadd.f32 %v12820_v9, %v7303_v12  ;;  %8202 = vst.msk [vmem:[%s12851_s9 + $0x24] sm:$0xf] %vm8192_vm3, %v9283_v15  ;;  %v7436_v3 = vadd.f32 %v12820_v9, %v7301_v22  ;;  %v12938_v48 = vadd.f32 %v6395_v1, %v13843_v51  ;;  %v13844_v10 = vld [vmem:[#allocation30_spill] sm:$0xff] }
 0x4cf   : > { %v7304_v34 = vld [vmem:[#allocation2 + $0x78] sm:$0xff]  ;;  %7177 = vst.msk [vmem:[#allocation2 + $0x80] sm:$0xff] %vm7160_vm2, %v6714_v63  ;;  %v6717_v62 = vadd.f32 %v12424_v8, %v6716_v38  ;;  %v7302_v40 = vld [vmem:[#allocation2 + $0x68] sm:$0xff]  ;;  %7180 = vst.msk [vmem:[#allocation2 + $0x98] sm:$0xff] %vm7160_vm2, %v6725_v5  ;;  %9595 = vmatmul.mubr.msk.bf16.gmra.mrb[124].mxu1 %vm4238_vm1, %v11225_v30  ;;  %6607 = vmatmul.mubr.bf16.gmra.mrb[252].mxu0 %v11224_v32 }
 0x4d0   : > { %v7566_v46 = vmax.f32 %v7438_v20, 0.0  ;;  %v7439_v23 = vadd.f32 %v12820_v9, %v7304_v34  ;;  %v7564_v16 = vmax.f32 %v7436_v3, 0.0  ;;  %v7437_v49 = vadd.f32 %v12820_v9, %v7302_v40 }
 0x4d1   : > { %7178 = vst.msk [vmem:[#allocation2 + $0x88] sm:$0xff] %vm7160_vm2, %v6717_v62 }
 0x4d2   : > { %v9288_v57 = vpack.c.bf16 %v7566_v46, %v7566_v46  ;;  %v7567_v13 = vmax.f32 %v7439_v23, 0.0  ;;  %v9286_v44 = vpack.c.bf16 %v7564_v16, %v7564_v16  ;;  %v7565_v8 = vmax.f32 %v7437_v49, 0.0  ;;  %v9492_v27 = vpop.f32.mrb[20].mxu1  ;;  %v6400_v15 = vpop.f32.mrb[148].mxu0 }
 0x4d3   : > { %v6738_v12 = vadd.f32 %v12464_v58, %v9492_v27  ;;  %v6729_v30 = vpop.f32.mrb[21].mxu1  ;;  %v12952_v32 = vadd.f32 %v6400_v15, %v13844_v10  ;;  %v6402_v20 = vpop.f32.mrb[149].mxu0  ;;  %v13846_v10 = vld [vmem:[#allocation32_spill] sm:$0xff] }
 0x4d4   : > { %8207 = vst.msk [vmem:[%s12851_s9 + $0x38] sm:$0xf] %vm8192_vm3, %v9288_v57  ;;  %v9289_v17 = vpack.c.bf16 %v7567_v13, %v7567_v13  ;;  %8205 = vst.msk [vmem:[%s12851_s9 + $0x30] sm:$0xf] %vm8192_vm3, %v9286_v44  ;;  %v9287_v60 = vpack.c.bf16 %v7565_v8, %v7565_v8  ;;  %v7307_v63 = vld [vmem:[#allocation2 + $0x90] sm:$0xff]  ;;  %v6730_v22 = vadd.f32 %v12448_v54, %v6729_v30  ;;  %v9493_v1 = vpop.f32.mrb[22].mxu1 }
 0x4d5   : > { %v7442_v5 = vadd.f32 %v12820_v9, %v7307_v63  ;;  %7183 = vst.msk [vmem:[#allocation2 + $0xb0] sm:$0xff] %vm7160_vm2, %v6738_v12  ;;  %v6403_v58 = vpop.f32.mrb[150].mxu0  ;;  %v6741_v3 = vadd.f32 %v12472_v11, %v9493_v1  ;;  %v6732_v34 = vpop.f32.mrb[23].mxu1  ;;  %v13845_v54 = vld [vmem:[#allocation31_spill] sm:$0xff] }
 0x4d6   : > { %8208 = vst.msk [vmem:[%s12851_s9 + $0x3c] sm:$0xf] %vm8192_vm3, %v9289_v17  ;;  %v7305_v38 = vld [vmem:[#allocation2 + $0x80] sm:$0xff]  ;;  %8206 = vst.msk [vmem:[%s12851_s9 + $0x34] sm:$0xf] %vm8192_vm3, %v9287_v60  ;;  %v7308_v61 = vld [vmem:[#allocation2 + $0x98] sm:$0xff]  ;;  %v12965_v62 = vadd.f32 %v6403_v58, %v13845_v54  ;;  %v6733_v23 = vadd.f32 %v12456_v43, %v6732_v34 }
 0x4d7   : > { %v7440_v51 = vadd.f32 %v12820_v9, %v7305_v38  ;;  %7181 = vst.msk [vmem:[#allocation2 + $0xa0] sm:$0xff] %vm7160_vm2, %v6730_v22  ;;  %v6405_v46 = vpop.f32.mrb[151].mxu0  ;;  %v7570_v40 = vmax.f32 %v7442_v5, 0.0  ;;  %v7443_v16 = vadd.f32 %v12820_v9, %v7308_v61  ;;  %7184 = vst.msk [vmem:[#allocation2 + $0xb8] sm:$0xff] %vm7160_vm2, %v6741_v3 }
 0x4d8   : > { %v7306_v11 = vld [vmem:[#allocation2 + $0x88] sm:$0xff]  ;;  %7182 = vst.msk [vmem:[#allocation2 + $0xa8] sm:$0xff] %vm7160_vm2, %v6733_v23 }
 0x4d9   : > { %v7568_v49 = vmax.f32 %v7440_v51, 0.0  ;;  %v7441_v57 = vadd.f32 %v12820_v9, %v7306_v11  ;;  %v9292_v13 = vpack.c.bf16 %v7570_v40, %v7570_v40  ;;  %v7571_v44 = vmax.f32 %v7443_v16, 0.0 }
 0x4da   : > { %v9496_v17 = vpop.f32.mrb[24].mxu1  ;;  %v6408_v15 = vpop.f32.mrb[152].mxu0 }
 0x4db   : > { %v9290_v8 = vpack.c.bf16 %v7568_v49, %v7568_v49  ;;  %v7569_v27 = vmax.f32 %v7441_v57, 0.0  ;;  %8211 = vst.msk [vmem:[%s12851_s9 + $0x48] sm:$0xf] %vm8192_vm3, %v9292_v13  ;;  %v9293_v43 = vpack.c.bf16 %v7571_v44, %v7571_v44  ;;  %v6754_v12 = vadd.f32 %v12496_v33, %v9496_v17  ;;  %v6745_v30 = vpop.f32.mrb[25].mxu1  ;;  %v6410_v22 = vpop.f32.mrb[153].mxu0 }
 0x4dc   : > { %v7311_v63 = vld [vmem:[#allocation2 + $0xb0] sm:$0xff]  ;;  %v12978_v20 = vadd.f32 %v6408_v15, %v13846_v10  ;;  %v6746_v1 = vadd.f32 %v12480_v24, %v6745_v30  ;;  %v9497_v5 = vpop.f32.mrb[26].mxu1  ;;  %v6411_v33 = vpop.f32.mrb[154].mxu0  ;;  %v13847_v24 = vld [vmem:[#allocation33_spill] sm:$0xff] }
 0x4dd   : > { %8209 = vst.msk [vmem:[%s12851_s9 + $0x40] sm:$0xf] %vm8192_vm3, %v9290_v8  ;;  %v9291_v60 = vpack.c.bf16 %v7569_v27, %v7569_v27  ;;  %8212 = vst.msk [vmem:[%s12851_s9 + $0x4c] sm:$0xf] %vm8192_vm3, %v9293_v43  ;;  %v7446_v38 = vadd.f32 %v12820_v9, %v7311_v63  ;;  %v6757_v3 = vadd.f32 %v12504_v28, %v9497_v5  ;;  %v6748_v34 = vpop.f32.mrb[27].mxu1  ;;  %v6413_v46 = vpop.f32.mrb[155].mxu0 }
 0x4de   : > { %v7309_v58 = vld [vmem:[#allocation2 + $0xa0] sm:$0xff]  ;;  %7187 = vst.msk [vmem:[#allocation2 + $0xd0] sm:$0xff] %vm7160_vm2, %v6754_v12  ;;  %v7312_v61 = vld [vmem:[#allocation2 + $0xb8] sm:$0xff]  ;;  %7185 = vst.msk [vmem:[#allocation2 + $0xc0] sm:$0xff] %vm7160_vm2, %v6746_v1  ;;  %v12991_v54 = vadd.f32 %v6411_v33, %v13847_v24  ;;  %v6749_v23 = vadd.f32 %v12488_v19, %v6748_v34 }
 0x4df   : > { %8210 = vst.msk [vmem:[%s12851_s9 + $0x44] sm:$0xf] %vm8192_vm3, %v9291_v60  ;;  %v7444_v51 = vadd.f32 %v12820_v9, %v7309_v58  ;;  %v7574_v40 = vmax.f32 %v7446_v38, 0.0  ;;  %v7447_v16 = vadd.f32 %v12820_v9, %v7312_v61  ;;  %v7310_v28 = vld [vmem:[#allocation2 + $0xa8] sm:$0xff]  ;;  %v13848_v60 = vld [vmem:[#allocation34_spill] sm:$0xff] }
 0x4e0   : > { %7188 = vst.msk [vmem:[#allocation2 + $0xd8] sm:$0xff] %vm7160_vm2, %v6757_v3  ;;  %v7445_v49 = vadd.f32 %v12820_v9, %v7310_v28  ;;  %7186 = vst.msk [vmem:[#allocation2 + $0xc8] sm:$0xff] %vm7160_vm2, %v6749_v23 }
 0x4e1   : > { %v7572_v11 = vmax.f32 %v7444_v51, 0.0  ;;  %v9296_v57 = vpack.c.bf16 %v7574_v40, %v7574_v40  ;;  %v7575_v13 = vmax.f32 %v7447_v16, 0.0 }
 0x4e2   : > { %v7573_v8 = vmax.f32 %v7445_v49, 0.0  ;;  %v9500_v27 = vpop.f32.mrb[28].mxu1  ;;  %v6416_v17 = vpop.f32.mrb[156].mxu0 }
 0x4e3   : > { %v9294_v44 = vpack.c.bf16 %v7572_v11, %v7572_v11  ;;  %8215 = vst.msk [vmem:[%s12851_s9 + $0x58] sm:$0xf] %vm8192_vm3, %v9296_v57  ;;  %v9297_v19 = vpack.c.bf16 %v7575_v13, %v7575_v13  ;;  %v6770_v43 = vadd.f32 %v12528_v52, %v9500_v27  ;;  %v6761_v15 = vpop.f32.mrb[29].mxu1  ;;  %v13004_v63 = vadd.f32 %v6416_v17, %v13848_v60  ;;  %v6418_v10 = vpop.f32.mrb[157].mxu0 }
 0x4e4   : > { %v9295_v12 = vpack.c.bf16 %v7573_v8, %v7573_v8  ;;  %v6762_v22 = vadd.f32 %v12512_v42, %v6761_v15  ;;  %v9501_v1 = vpop.f32.mrb[30].mxu1  ;;  %v6419_v52 = vpop.f32.mrb[158].mxu0  ;;  %v13849_v42 = vld [vmem:[#allocation35_spill] sm:$0xff] }
 0x4e5   : > { %8213 = vst.msk [vmem:[%s12851_s9 + $0x50] sm:$0xf] %vm8192_vm3, %v9294_v44  ;;  %v7315_v30 = vld [vmem:[#allocation2 + $0xd0] sm:$0xff]  ;;  %8216 = vst.msk [vmem:[%s12851_s9 + $0x5c] sm:$0xf] %vm8192_vm3, %v9297_v19  ;;  %v7313_v38 = vld [vmem:[#allocation2 + $0xc0] sm:$0xff]  ;;  %v6773_v58 = vadd.f32 %v12536_v45, %v9501_v1  ;;  %v13017_v51 = vadd.f32 %v6419_v52, %v13849_v42 }
 0x4e6   : > { %v7450_v5 = vadd.f32 %v12820_v9, %v7315_v30  ;;  %7191 = vst.msk [vmem:[#allocation2 + $0xf0] sm:$0xff] %vm7160_vm2, %v6770_v43  ;;  %v6764_v33 = vpop.f32.mrb[31].mxu1  ;;  %v7448_v3 = vadd.f32 %v12820_v9, %v7313_v38  ;;  %7189 = vst.msk [vmem:[#allocation2 + $0xe0] sm:$0xff] %vm7160_vm2, %v6762_v22  ;;  %v6421_v61 = vpop.f32.mrb[159].mxu0  ;;  %v13850_v43 = vld [vmem:[#allocation36_spill] sm:$0xff] }
 0x4e7   : > { %8214 = vst.msk [vmem:[%s12851_s9 + $0x54] sm:$0xf] %vm8192_vm3, %v9295_v12  ;;  %v7316_v34 = vld [vmem:[#allocation2 + $0xd8] sm:$0xff]  ;;  %v6765_v24 = vadd.f32 %v12520_v36, %v6764_v33  ;;  %v7314_v45 = vld [vmem:[#allocation2 + $0xc8] sm:$0xff] }
 0x4e8   : > { %v7578_v46 = vmax.f32 %v7450_v5, 0.0  ;;  %v7451_v23 = vadd.f32 %v12820_v9, %v7316_v34  ;;  %7192 = vst.msk [vmem:[#allocation2 + $0xf8] sm:$0xff] %vm7160_vm2, %v6773_v58  ;;  %v7576_v40 = vmax.f32 %v7448_v3, 0.0  ;;  %v7449_v16 = vadd.f32 %v12820_v9, %v7314_v45 }
 0x4e9   : > { %7190 = vst.msk [vmem:[#allocation2 + $0xe8] sm:$0xff] %vm7160_vm2, %v6765_v24 }
 0x4ea   : > { %v9300_v28 = vpack.c.bf16 %v7578_v46, %v7578_v46  ;;  %v7579_v11 = vmax.f32 %v7451_v23, 0.0  ;;  %v9298_v49 = vpack.c.bf16 %v7576_v40, %v7576_v40  ;;  %v7577_v57 = vmax.f32 %v7449_v16, 0.0  ;;  %v9504_v13 = vpop.f32.mrb[32].mxu1  ;;  %v6424_v44 = vpop.f32.mrb[160].mxu0 }
 0x4eb   : > { %v6786_v8 = vadd.f32 %v12560_v7, %v9504_v13  ;;  %v6777_v27 = vpop.f32.mrb[33].mxu1  ;;  %v13030_v15 = vadd.f32 %v6424_v44, %v13850_v43  ;;  %v6426_v12 = vpop.f32.mrb[161].mxu0 }
 0x4ec   : > { %8219 = vst.msk [vmem:[%s12851_s9 + $0x68] sm:$0xf] %vm8192_vm3, %v9300_v28  ;;  %v9301_v36 = vpack.c.bf16 %v7579_v11, %v7579_v11  ;;  %8217 = vst.msk [vmem:[%s12851_s9 + $0x60] sm:$0xf] %vm8192_vm3, %v9298_v49  ;;  %v9299_v19 = vpack.c.bf16 %v7577_v57, %v7577_v57  ;;  %v6778_v30 = vadd.f32 %v12544_v59, %v6777_v27  ;;  %v9505_v60 = vpop.f32.mrb[34].mxu1  ;;  %v6427_v7 = vpop.f32.mrb[162].mxu0 }
 0x4ed   : > { %v7319_v17 = vld [vmem:[#allocation2 + $0xf0] sm:$0xff]  ;;  %v7317_v22 = vld [vmem:[#allocation2 + $0xe0] sm:$0xff]  ;;  %7195 = vst.msk [vmem:[#allocation2 + $0x110] sm:$0xff] %vm7160_vm2, %v6786_v8  ;;  %v6789_v1 = vadd.f32 %v12568_v4, %v9505_v60  ;;  %v6780_v5 = vpop.f32.mrb[35].mxu1  ;;  %v13851_v59 = vld [vmem:[#allocation37_spill] sm:$0xff]  ;;  %v6429_v33 = vpop.f32.mrb[163].mxu0 }
 0x4ee   : > { %8220 = vst.msk [vmem:[%s12851_s9 + $0x6c] sm:$0xf] %vm8192_vm3, %v9301_v36  ;;  %v7454_v10 = vadd.f32 %v12820_v9, %v7319_v17  ;;  %8218 = vst.msk [vmem:[%s12851_s9 + $0x64] sm:$0xf] %vm8192_vm3, %v9299_v19  ;;  %v7452_v38 = vadd.f32 %v12820_v9, %v7317_v22  ;;  %v13043_v58 = vadd.f32 %v6427_v7, %v13851_v59  ;;  %v13852_v36 = vld [vmem:[#allocation38_spill] sm:$0xff] }
 0x4ef   : > { %v7320_v52 = vld [vmem:[#allocation2 + $0xf8] sm:$0xff]  ;;  %7193 = vst.msk [vmem:[#allocation2 + $0x100] sm:$0xff] %vm7160_vm2, %v6778_v30  ;;  %v6781_v3 = vadd.f32 %v12552_v55, %v6780_v5  ;;  %7196 = vst.msk [vmem:[#allocation2 + $0x118] sm:$0xff] %vm7160_vm2, %v6789_v1 }
 0x4f0   : > { %v7582_v34 = vmax.f32 %v7454_v10, 0.0  ;;  %v7455_v42 = vadd.f32 %v12820_v9, %v7320_v52  ;;  %v7318_v4 = vld [vmem:[#allocation2 + $0xe8] sm:$0xff]  ;;  %v7580_v61 = vmax.f32 %v7452_v38, 0.0 }
 0x4f1   : > { %v7453_v24 = vadd.f32 %v12820_v9, %v7318_v4  ;;  %7194 = vst.msk [vmem:[#allocation2 + $0x108] sm:$0xff] %vm7160_vm2, %v6781_v3 }
 0x4f2   : > { %v9304_v46 = vpack.c.bf16 %v7582_v34, %v7582_v34  ;;  %v7583_v23 = vmax.f32 %v7455_v42, 0.0  ;;  %v9302_v45 = vpack.c.bf16 %v7580_v61, %v7580_v61  ;;  %v9508_v16 = vpop.f32.mrb[36].mxu1  ;;  %v6432_v28 = vpop.f32.mrb[164].mxu0 }
 0x4f3   : > { %v7581_v40 = vmax.f32 %v7453_v24, 0.0  ;;  %v6802_v11 = vadd.f32 %v12592_v29, %v9508_v16  ;;  %v6793_v49 = vpop.f32.mrb[37].mxu1  ;;  %v13056_v44 = vadd.f32 %v6432_v28, %v13852_v36  ;;  %v6434_v8 = vpop.f32.mrb[165].mxu0 }
 0x4f4   : > { %8223 = vst.msk [vmem:[%s12851_s9 + $0x78] sm:$0xf] %vm8192_vm3, %v9304_v46  ;;  %v9305_v55 = vpack.c.bf16 %v7583_v23, %v7583_v23  ;;  %8221 = vst.msk [vmem:[%s12851_s9 + $0x70] sm:$0xf] %vm8192_vm3, %v9302_v45  ;;  %v7323_v13 = vld [vmem:[#allocation2 + $0x110] sm:$0xff]  ;;  %v6794_v27 = vadd.f32 %v12576_v18, %v6793_v49  ;;  %v9509_v19 = vpop.f32.mrb[38].mxu1 }
 0x4f5   : > { %v9303_v57 = vpack.c.bf16 %v7581_v40, %v7581_v40  ;;  %v7458_v17 = vadd.f32 %v12820_v9, %v7323_v13  ;;  %7199 = vst.msk [vmem:[#allocation2 + $0x130] sm:$0xff] %vm7160_vm2, %v6802_v11  ;;  %v6435_v29 = vpop.f32.mrb[166].mxu0  ;;  %v6805_v12 = vadd.f32 %v12600_v25, %v9509_v19  ;;  %v6796_v30 = vpop.f32.mrb[39].mxu1  ;;  %v13853_v18 = vld [vmem:[#allocation39_spill] sm:$0xff]  ;;  %v13854_v40 = vld [vmem:[#allocation40_spill] sm:$0xff] }
 0x4f6   : > { %8224 = vst.msk [vmem:[%s12851_s9 + $0x7c] sm:$0xf] %vm8192_vm3, %v9305_v55  ;;  %v7321_v43 = vld [vmem:[#allocation2 + $0x100] sm:$0xff]  ;;  %v7324_v10 = vld [vmem:[#allocation2 + $0x118] sm:$0xff]  ;;  %v13069_v22 = vadd.f32 %v6435_v29, %v13853_v18  ;;  %v6437_v7 = vpop.f32.mrb[167].mxu0  ;;  %v6797_v1 = vadd.f32 %v12584_v14, %v6796_v30 }
 0x4f7   : > { %8222 = vst.msk [vmem:[%s12851_s9 + $0x74] sm:$0xf] %vm8192_vm3, %v9303_v57  ;;  %v7456_v60 = vadd.f32 %v12820_v9, %v7321_v43  ;;  %v7586_v5 = vmax.f32 %v7458_v17, 0.0  ;;  %v7459_v38 = vadd.f32 %v12820_v9, %v7324_v10 }
 0x4f8   : > { %7197 = vst.msk [vmem:[#allocation2 + $0x120] sm:$0xff] %vm7160_vm2, %v6794_v27  ;;  %v7322_v25 = vld [vmem:[#allocation2 + $0x108] sm:$0xff]  ;;  %7200 = vst.msk [vmem:[#allocation2 + $0x138] sm:$0xff] %vm7160_vm2, %v6805_v12 }
 0x4f9   : > { %v7584_v52 = vmax.f32 %v7456_v60, 0.0  ;;  %v7457_v59 = vadd.f32 %v12820_v9, %v7322_v25  ;;  %7198 = vst.msk [vmem:[#allocation2 + $0x128] sm:$0xff] %vm7160_vm2, %v6797_v1  ;;  %v9308_v33 = vpack.c.bf16 %v7586_v5, %v7586_v5  ;;  %v7587_v3 = vmax.f32 %v7459_v38, 0.0 }
 0x4fa   : > { %v9512_v4 = vpop.f32.mrb[40].mxu1  ;;  %v6440_v61 = vpop.f32.mrb[168].mxu0 }
 0x4fb   : > { %v9306_v34 = vpack.c.bf16 %v7584_v52, %v7584_v52  ;;  %v7585_v42 = vmax.f32 %v7457_v59, 0.0  ;;  %8227 = vst.msk [vmem:[%s12851_s9 + $0x88] sm:$0xf] %vm8192_vm3, %v9308_v33  ;;  %v9309_v14 = vpack.c.bf16 %v7587_v3, %v7587_v3  ;;  %v6818_v24 = vadd.f32 %v12624_v56, %v9512_v4  ;;  %v6809_v46 = vpop.f32.mrb[41].mxu1  ;;  %v6442_v55 = vpop.f32.mrb[169].mxu0  ;;  %v13856_v3 = vld [vmem:[#allocation42_spill] sm:$0xff] }
 0x4fc   : > { %v7327_v45 = vld [vmem:[#allocation2 + $0x130] sm:$0xff]  ;;  %v13082_v16 = vadd.f32 %v6440_v61, %v13854_v40  ;;  %v6810_v28 = vadd.f32 %v12608_v39, %v6809_v46  ;;  %v9513_v11 = vpop.f32.mrb[42].mxu1  ;;  %v6443_v56 = vpop.f32.mrb[170].mxu0  ;;  %v13855_v39 = vld [vmem:[#allocation41_spill] sm:$0xff] }
 0x4fd   : > { %8225 = vst.msk [vmem:[%s12851_s9 + $0x80] sm:$0xf] %vm8192_vm3, %v9306_v34  ;;  %v9307_v23 = vpack.c.bf16 %v7585_v42, %v7585_v42  ;;  %8228 = vst.msk [vmem:[%s12851_s9 + $0x8c] sm:$0xf] %vm8192_vm3, %v9309_v14  ;;  %v7462_v49 = vadd.f32 %v12820_v9, %v7327_v45  ;;  %v6821_v13 = vadd.f32 %v12632_v50, %v9513_v11  ;;  %v6812_v36 = vpop.f32.mrb[43].mxu1  ;;  %v6445_v17 = vpop.f32.mrb[171].mxu0 }
 0x4fe   : > { %7203 = vst.msk [vmem:[#allocation2 + $0x150] sm:$0xff] %vm7160_vm2, %v6818_v24  ;;  %7201 = vst.msk [vmem:[#allocation2 + $0x140] sm:$0xff] %vm7160_vm2, %v6810_v28  ;;  %v13095_v19 = vadd.f32 %v6443_v56, %v13855_v39  ;;  %v6813_v43 = vadd.f32 %v12616_v35, %v6812_v36 }
 0x4ff   : > { %v7325_v57 = vld [vmem:[#allocation2 + $0x120] sm:$0xff]  ;;  %8226 = vst.msk [vmem:[%s12851_s9 + $0x84] sm:$0xf] %vm8192_vm3, %v9307_v23  ;;  %v7328_v27 = vld [vmem:[#allocation2 + $0x138] sm:$0xff]  ;;  %v7590_v29 = vmax.f32 %v7462_v49, 0.0 }
 0x500   : > { %v7460_v8 = vadd.f32 %v12820_v9, %v7325_v57  ;;  %v7463_v12 = vadd.f32 %v12820_v9, %v7328_v27  ;;  %v7326_v50 = vld [vmem:[#allocation2 + $0x128] sm:$0xff]  ;;  %7204 = vst.msk [vmem:[#allocation2 + $0x158] sm:$0xff] %vm7160_vm2, %v6821_v13  ;;  %7202 = vst.msk [vmem:[#allocation2 + $0x148] sm:$0xff] %vm7160_vm2, %v6813_v43 }
 0x501   : > { %v7461_v60 = vadd.f32 %v12820_v9, %v7326_v50  ;;  %v9312_v10 = vpack.c.bf16 %v7590_v29, %v7590_v29  ;;  %v13858_v29 = vld [vmem:[#allocation6_spill] sm:$0xff] }
 0x502   : > { %v7588_v30 = vmax.f32 %v7460_v8, 0.0  ;;  %v7591_v18 = vmax.f32 %v7463_v12, 0.0  ;;  %v9516_v5 = vpop.f32.mrb[44].mxu1  ;;  %v6448_v38 = vpop.f32.mrb[172].mxu0 }
 0x503   : > { %v7589_v1 = vmax.f32 %v7461_v60, 0.0  ;;  %8231 = vst.msk [vmem:[%s12851_s9 + $0x98] sm:$0xf] %vm8192_vm3, %v9312_v10  ;;  %v6834_v25 = vadd.f32 %v12656_v37, %v9516_v5  ;;  %v6825_v52 = vpop.f32.mrb[45].mxu1  ;;  %v13108_v34 = vadd.f32 %v6448_v38, %v13856_v3  ;;  %v6450_v42 = vpop.f32.mrb[173].mxu0  ;;  %v13859_v10 = vld [vmem:[#allocation44_spill] sm:$0xff] }
 0x504   : > { %v9310_v7 = vpack.c.bf16 %v7588_v30, %v7588_v30  ;;  %v9313_v35 = vpack.c.bf16 %v7591_v18, %v7591_v18  ;;  %v6826_v4 = vadd.f32 %v12640_v6, %v6825_v52  ;;  %v9517_v14 = vpop.f32.mrb[46].mxu1  ;;  %v6451_v37 = vpop.f32.mrb[174].mxu0  ;;  %v13857_v6 = vld [vmem:[#allocation43_spill] sm:$0xff] }
 0x505   : > { %v9311_v59 = vpack.c.bf16 %v7589_v1, %v7589_v1  ;;  %v7331_v33 = vld [vmem:[#allocation2 + $0x150] sm:$0xff]  ;;  %v7329_v24 = vld [vmem:[#allocation2 + $0x140] sm:$0xff]  ;;  %7207 = vst.msk [vmem:[#allocation2 + $0x170] sm:$0xff] %vm7160_vm2, %v6834_v25  ;;  %v6837_v46 = vadd.f32 %v12664_v31, %v9517_v14  ;;  %v6828_v23 = vpop.f32.mrb[47].mxu1  ;;  %v13121_v55 = vadd.f32 %v6451_v37, %v13857_v6  ;;  %v6453_v28 = vpop.f32.mrb[175].mxu0  ;;  %v13860_v1 = vld [vmem:[#allocation69_spill] sm:$0xff] }
 0x506   : > { %8229 = vst.msk [vmem:[%s12851_s9 + $0x90] sm:$0xf] %vm8192_vm3, %v9310_v7  ;;  %8232 = vst.msk [vmem:[%s12851_s9 + $0x9c] sm:$0xf] %vm8192_vm3, %v9313_v35  ;;  %v7466_v61 = vadd.f32 %v12820_v9, %v7331_v33  ;;  %v7464_v45 = vadd.f32 %v12820_v9, %v7329_v24  ;;  %v6829_v11 = vadd.f32 %v12648_v0, %v6828_v23  ;;  %v13862_v14 = vld [vmem:[#allocation45_spill] sm:$0xff]  ;;  %v13863_v37 = vld [vmem:[#allocation71_spill] sm:$0xff] }
 0x507   : > { %8230 = vst.msk [vmem:[%s12851_s9 + $0x94] sm:$0xf] %vm8192_vm3, %v9311_v59  ;;  %v7332_v40 = vld [vmem:[#allocation2 + $0x158] sm:$0xff]  ;;  %v7330_v31 = vld [vmem:[#allocation2 + $0x148] sm:$0xff] }
 0x508   : > { %7205 = vst.msk [vmem:[#allocation2 + $0x160] sm:$0xff] %vm7160_vm2, %v6826_v4  ;;  %v7594_v49 = vmax.f32 %v7466_v61, 0.0  ;;  %v7467_v57 = vadd.f32 %v12820_v9, %v7332_v40  ;;  %7208 = vst.msk [vmem:[#allocation2 + $0x178] sm:$0xff] %vm7160_vm2, %v6837_v46  ;;  %v7592_v56 = vmax.f32 %v7464_v45, 0.0  ;;  %v7465_v13 = vadd.f32 %v12820_v9, %v7330_v31  ;;  %v13861_v59 = vld [vmem:[#allocation7_spill] sm:$0xff] }
 0x509   : > { %7206 = vst.msk [vmem:[#allocation2 + $0x168] sm:$0xff] %vm7160_vm2, %v6829_v11 }
 0x50a   : > { %v9316_v36 = vpack.c.bf16 %v7594_v49, %v7594_v49  ;;  %v7595_v8 = vmax.f32 %v7467_v57, 0.0  ;;  %v9314_v27 = vpack.c.bf16 %v7592_v56, %v7592_v56  ;;  %v7593_v39 = vmax.f32 %v7465_v13, 0.0  ;;  %v9520_v17 = vpop.f32.mrb[48].mxu1  ;;  %v6456_v43 = vpop.f32.mrb[176].mxu0 }
 0x50b   : > { %v6850_v12 = vadd.f32 %v13858_v29, %v9520_v17  ;;  %v6841_v50 = vpop.f32.mrb[49].mxu1  ;;  %v13134_v18 = vadd.f32 %v6456_v43, %v13859_v10  ;;  %v6458_v7 = vpop.f32.mrb[177].mxu0  ;;  %v13865_v43 = vld [vmem:[#allocation46_spill] sm:$0xff] }
 0x50c   : > { %8235 = vst.msk [vmem:[%s12851_s9 + $0xa8] sm:$0xf] %vm8192_vm3, %v9316_v36  ;;  %v9317_v0 = vpack.c.bf16 %v7595_v8, %v7595_v8  ;;  %8233 = vst.msk [vmem:[%s12851_s9 + $0xa0] sm:$0xf] %vm8192_vm3, %v9314_v27  ;;  %v9315_v30 = vpack.c.bf16 %v7593_v39, %v7593_v39  ;;  %v7335_v60 = vld [vmem:[#allocation2 + $0x170] sm:$0xff]  ;;  %v6842_v5 = vadd.f32 %v13860_v1, %v6841_v50  ;;  %v9521_v35 = vpop.f32.mrb[50].mxu1 }
 0x50d   : > { %v7470_v38 = vadd.f32 %v12820_v9, %v7335_v60  ;;  %7211 = vst.msk [vmem:[#allocation2 + $0x190] sm:$0xff] %vm7160_vm2, %v6850_v12  ;;  %v6459_v52 = vpop.f32.mrb[178].mxu0  ;;  %v6853_v33 = vadd.f32 %v13861_v59, %v9521_v35  ;;  %v6844_v3 = vpop.f32.mrb[51].mxu1  ;;  %v13864_v8 = vld [vmem:[#allocation10_spill] sm:$0xff]  ;;  %v13866_v50 = vld [vmem:[#allocation8_spill] sm:$0xff]  ;;  %v13868_v59 = vld [vmem:[#allocation47_spill] sm:$0xff] }
 0x50e   : > { %8236 = vst.msk [vmem:[%s12851_s9 + $0xac] sm:$0xf] %vm8192_vm3, %v9317_v0  ;;  %8234 = vst.msk [vmem:[%s12851_s9 + $0xa4] sm:$0xf] %vm8192_vm3, %v9315_v30  ;;  %v13147_v61 = vadd.f32 %v6459_v52, %v13862_v14  ;;  %v6461_v24 = vpop.f32.mrb[179].mxu0  ;;  %v6845_v46 = vadd.f32 %v13863_v37, %v6844_v3 }
 0x50f   : > { %v7333_v25 = vld [vmem:[#allocation2 + $0x160] sm:$0xff]  ;;  %v7336_v4 = vld [vmem:[#allocation2 + $0x178] sm:$0xff]  ;;  %7209 = vst.msk [vmem:[#allocation2 + $0x180] sm:$0xff] %vm7160_vm2, %v6842_v5  ;;  %v7598_v23 = vmax.f32 %v7470_v38, 0.0  ;;  %7212 = vst.msk [vmem:[#allocation2 + $0x198] sm:$0xff] %vm7160_vm2, %v6853_v33 }
 0x510   : > { %v7468_v42 = vadd.f32 %v12820_v9, %v7333_v25  ;;  %v7471_v45 = vadd.f32 %v12820_v9, %v7336_v4  ;;  %v7334_v40 = vld [vmem:[#allocation2 + $0x168] sm:$0xff]  ;;  %7210 = vst.msk [vmem:[#allocation2 + $0x188] sm:$0xff] %vm7160_vm2, %v6845_v46 }
 0x511   : > { %v7469_v28 = vadd.f32 %v12820_v9, %v7334_v40  ;;  %v9320_v11 = vpack.c.bf16 %v7598_v23, %v7598_v23  ;;  %v13867_v5 = vld [vmem:[#allocation11_spill] sm:$0xff]  ;;  %v13181_v23 = vld [vmem:[%s13719_s2] ss:$0 sm:$0xff] }
 0x512   : > { %v7596_v6 = vmax.f32 %v7468_v42, 0.0  ;;  %v7599_v49 = vmax.f32 %v7471_v45, 0.0  ;;  %v9524_v56 = vpop.f32.mrb[52].mxu1  ;;  %v6464_v36 = vpop.f32.mrb[180].mxu0  ;;  %v13869_v42 = vld [vmem:[#allocation9_spill] sm:$0xff] }
 0x513   : > { %v7597_v31 = vmax.f32 %v7469_v28, 0.0  ;;  %8239 = vst.msk [vmem:[%s12851_s9 + $0xb8] sm:$0xf] %vm8192_vm3, %v9320_v11  ;;  %v6866_v27 = vadd.f32 %v13864_v8, %v9524_v56  ;;  %v6857_v39 = vpop.f32.mrb[53].mxu1  ;;  %v13160_v29 = vadd.f32 %v6464_v36, %v13865_v43  ;;  %v6466_v12 = vpop.f32.mrb[181].mxu0 }
 0x514   : > { %v9318_v57 = vpack.c.bf16 %v7596_v6, %v7596_v6  ;;  %v9321_v13 = vpack.c.bf16 %v7599_v49, %v7599_v49  ;;  %v7339_v0 = vld [vmem:[#allocation2 + $0x190] sm:$0xff]  ;;  %v6858_v30 = vadd.f32 %v13866_v50, %v6857_v39  ;;  %v9525_v60 = vpop.f32.mrb[54].mxu1  ;;  %v6467_v1 = vpop.f32.mrb[182].mxu0 }
 0x515   : > { %v9319_v17 = vpack.c.bf16 %v7597_v31, %v7597_v31  ;;  %v7474_v10 = vadd.f32 %v12820_v9, %v7339_v0  ;;  %7215 = vst.msk [vmem:[#allocation2 + $0x1b0] sm:$0xff] %vm7160_vm2, %v6866_v27  ;;  %v6869_v35 = vadd.f32 %v13867_v5, %v9525_v60  ;;  %v6860_v38 = vpop.f32.mrb[55].mxu1  ;;  %v13173_v33 = vadd.f32 %v6467_v1, %v13868_v59  ;;  %v6469_v3 = vpop.f32.mrb[183].mxu0  ;;  %v13870_v31 = vld [vmem:[#allocation14_spill] sm:$0xff]  ;;  %v13871_v27 = vld [vmem:[#allocation48_spill] sm:$0xff]  ;;  %v13875_v59 = vld [vmem:[#allocation13_spill] sm:$0xff] }
 0x516   : > { %8237 = vst.msk [vmem:[%s12851_s9 + $0xb0] sm:$0xf] %vm8192_vm3, %v9318_v57  ;;  %8240 = vst.msk [vmem:[%s12851_s9 + $0xbc] sm:$0xf] %vm8192_vm3, %v9321_v13  ;;  %v7337_v7 = vld [vmem:[#allocation2 + $0x180] sm:$0xff]  ;;  %v7340_v52 = vld [vmem:[#allocation2 + $0x198] sm:$0xff]  ;;  %v6861_v4 = vadd.f32 %v13869_v42, %v6860_v38 }
 0x517   : > { %8238 = vst.msk [vmem:[%s12851_s9 + $0xb4] sm:$0xf] %vm8192_vm3, %v9319_v17  ;;  %v7472_v25 = vadd.f32 %v12820_v9, %v7337_v7  ;;  %v7602_v14 = vmax.f32 %v7474_v10, 0.0  ;;  %v7475_v24 = vadd.f32 %v12820_v9, %v7340_v52  ;;  %v7338_v37 = vld [vmem:[#allocation2 + $0x188] sm:$0xff]  ;;  %v13872_v0 = vld [vmem:[#allocation12_spill] sm:$0xff]  ;;  %v13874_v38 = vld [vmem:[#allocation49_spill] sm:$0xff] }
 0x518   : > { %7213 = vst.msk [vmem:[#allocation2 + $0x1a0] sm:$0xff] %vm7160_vm2, %v6858_v30  ;;  %7216 = vst.msk [vmem:[#allocation2 + $0x1b8] sm:$0xff] %vm7160_vm2, %v6869_v35  ;;  %v7473_v45 = vadd.f32 %v13181_v23, %v7338_v37  ;;  %v13873_v10 = vld [vmem:[#allocation15_spill] sm:$0xff] }
 0x519   : > { %v7600_v46 = vmax.f32 %v7472_v25, 0.0  ;;  %7214 = vst.msk [vmem:[#allocation2 + $0x1a8] sm:$0xff] %vm7160_vm2, %v6861_v4  ;;  %v9324_v40 = vpack.c.bf16 %v7602_v14, %v7602_v14  ;;  %v7603_v6 = vmax.f32 %v7475_v24, 0.0 }
 0x51a   : > { %v7601_v11 = vmax.f32 %v7473_v45, 0.0  ;;  %v9528_v9 = vpop.f32.mrb[56].mxu1  ;;  %v6472_v57 = vpop.f32.mrb[184].mxu0 }
 0x51b   : > { %v9322_v28 = vpack.c.bf16 %v7600_v46, %v7600_v46  ;;  %8243 = vst.msk [vmem:[%s12851_s9 + $0xc8] sm:$0xf] %vm8192_vm3, %v9324_v40  ;;  %v9325_v49 = vpack.c.bf16 %v7603_v6, %v7603_v6  ;;  %v6882_v56 = vadd.f32 %v13870_v31, %v9528_v9  ;;  %v6873_v13 = vpop.f32.mrb[57].mxu1  ;;  %v13191_v39 = vadd.f32 %v6472_v57, %v13871_v27  ;;  %v6474_v17 = vpop.f32.mrb[185].mxu0 }
 0x51c   : > { %v9323_v36 = vpack.c.bf16 %v7601_v11, %v7601_v11  ;;  %v7343_v8 = vld [vmem:[#allocation2 + $0x1b0] sm:$0xff]  ;;  %v6874_v43 = vadd.f32 %v13872_v0, %v6873_v13  ;;  %v9529_v12 = vpop.f32.mrb[58].mxu1  ;;  %v6475_v60 = vpop.f32.mrb[186].mxu0 }
 0x51d   : > { %8241 = vst.msk [vmem:[%s12851_s9 + $0xc0] sm:$0xf] %vm8192_vm3, %v9322_v28  ;;  %8244 = vst.msk [vmem:[%s12851_s9 + $0xcc] sm:$0xf] %vm8192_vm3, %v9325_v49  ;;  %v7478_v50 = vadd.f32 %v13181_v23, %v7343_v8  ;;  %v6885_v7 = vadd.f32 %v13873_v10, %v9529_v12  ;;  %v6876_v1 = vpop.f32.mrb[59].mxu1  ;;  %v13204_v25 = vadd.f32 %v6475_v60, %v13874_v38  ;;  %v6477_v52 = vpop.f32.mrb[187].mxu0 }
 0x51e   : > { %7219 = vst.msk [vmem:[#allocation2 + $0x1d0] sm:$0xff] %vm7160_vm2, %v6882_v56  ;;  %7217 = vst.msk [vmem:[#allocation2 + $0x1c0] sm:$0xff] %vm7160_vm2, %v6874_v43  ;;  %v6877_v3 = vadd.f32 %v13875_v59, %v6876_v1  ;;  %v13876_v49 = vld [vmem:[#allocation18_spill] sm:$0xff]  ;;  %v13878_v17 = vld [vmem:[#allocation16_spill] sm:$0xff] }
 0x51f   : > { %v7341_v30 = vld [vmem:[#allocation2 + $0x1a0] sm:$0xff]  ;;  %8242 = vst.msk [vmem:[%s12851_s9 + $0xc4] sm:$0xf] %vm8192_vm3, %v9323_v36  ;;  %v7344_v35 = vld [vmem:[#allocation2 + $0x1b8] sm:$0xff]  ;;  %v7606_v42 = vmax.f32 %v7478_v50, 0.0  ;;  %v13879_v60 = vld [vmem:[#allocation19_spill] sm:$0xff] }
 0x520   : > { %v7476_v5 = vadd.f32 %v13181_v23, %v7341_v30  ;;  %v7479_v4 = vadd.f32 %v13181_v23, %v7344_v35  ;;  %v7342_v14 = vld [vmem:[#allocation2 + $0x1a8] sm:$0xff]  ;;  %7220 = vst.msk [vmem:[#allocation2 + $0x1d8] sm:$0xff] %vm7160_vm2, %v6885_v7  ;;  %7218 = vst.msk [vmem:[#allocation2 + $0x1c8] sm:$0xff] %vm7160_vm2, %v6877_v3  ;;  %v13877_v36 = vld [vmem:[#allocation50_spill] sm:$0xff] }
 0x521   : > { %v7477_v37 = vadd.f32 %v13181_v23, %v7342_v14  ;;  %v9328_v46 = vpack.c.bf16 %v7606_v42, %v7606_v42  ;;  %v13880_v35 = vld [vmem:[#allocation51_spill] sm:$0xff]  ;;  %v13881_v59 = vld [vmem:[#allocation17_spill] sm:$0xff] }
 0x522   : > { %v7604_v24 = vmax.f32 %v7476_v5, 0.0  ;;  %v7607_v45 = vmax.f32 %v7479_v4, 0.0  ;;  %v9532_v28 = vpop.f32.mrb[60].mxu1  ;;  %v6480_v9 = vpop.f32.mrb[188].mxu0 }
 0x523   : > { %v7605_v6 = vmax.f32 %v7477_v37, 0.0  ;;  %8247 = vst.msk [vmem:[%s12851_s9 + $0xd8] sm:$0xf] %vm8192_vm3, %v9328_v46  ;;  %v6898_v57 = vadd.f32 %v13876_v49, %v9532_v28  ;;  %v6889_v31 = vpop.f32.mrb[61].mxu1  ;;  %v13217_v8 = vadd.f32 %v6480_v9, %v13877_v36  ;;  %v6482_v27 = vpop.f32.mrb[189].mxu0  ;;  %v13882_v49 = vld [vmem:[#allocation21_spill] sm:$0xff] }
 0x524   : > { %v9326_v40 = vpack.c.bf16 %v7604_v24, %v7604_v24  ;;  %v9329_v11 = vpack.c.bf16 %v7607_v45, %v7607_v45  ;;  %v6890_v0 = vadd.f32 %v13878_v17, %v6889_v31  ;;  %v9533_v43 = vpop.f32.mrb[62].mxu1  ;;  %v6483_v30 = vpop.f32.mrb[190].mxu0  ;;  %v13883_v36 = vld [vmem:[#allocation52_spill] sm:$0xff] }
 0x525   : > { %v9327_v56 = vpack.c.bf16 %v7605_v6, %v7605_v6  ;;  %v7347_v13 = vld [vmem:[#allocation2 + $0x1d0] sm:$0xff]  ;;  %v7345_v50 = vld [vmem:[#allocation2 + $0x1c0] sm:$0xff]  ;;  %7223 = vst.msk [vmem:[#allocation2 + $0x1f0] sm:$0xff] %vm7160_vm2, %v6898_v57  ;;  %v6901_v10 = vadd.f32 %v13879_v60, %v9533_v43  ;;  %v6892_v7 = vpop.f32.mrb[63].mxu1  ;;  %v13230_v38 = vadd.f32 %v6483_v30, %v13880_v35  ;;  %v6485_v52 = vpop.f32.mrb[191].mxu0  ;;  %v13885_v35 = vld [vmem:[#allocation53_spill] sm:$0xff] }
 0x526   : > { %8245 = vst.msk [vmem:[%s12851_s9 + $0xd0] sm:$0xf] %vm8192_vm3, %v9326_v40  ;;  %8248 = vst.msk [vmem:[%s12851_s9 + $0xdc] sm:$0xf] %vm8192_vm3, %v9329_v11  ;;  %v7482_v12 = vadd.f32 %v13181_v23, %v7347_v13  ;;  %v7480_v1 = vadd.f32 %v13181_v23, %v7345_v50  ;;  %v6893_v3 = vadd.f32 %v13881_v59, %v6892_v7 }
 0x527   : > { %8246 = vst.msk [vmem:[%s12851_s9 + $0xd4] sm:$0xf] %vm8192_vm3, %v9327_v56  ;;  %v7348_v5 = vld [vmem:[#allocation2 + $0x1d8] sm:$0xff]  ;;  %v7346_v14 = vld [vmem:[#allocation2 + $0x1c8] sm:$0xff] }
 0x528   : > { %7221 = vst.msk [vmem:[#allocation2 + $0x1e0] sm:$0xff] %vm7160_vm2, %v6890_v0  ;;  %v7610_v42 = vmax.f32 %v7482_v12, 0.0  ;;  %v7483_v4 = vadd.f32 %v13181_v23, %v7348_v5  ;;  %7224 = vst.msk [vmem:[#allocation2 + $0x1f8] sm:$0xff] %vm7160_vm2, %v6901_v10  ;;  %v7608_v24 = vmax.f32 %v7480_v1, 0.0  ;;  %v7481_v37 = vadd.f32 %v13181_v23, %v7346_v14  ;;  %v13884_v0 = vld [vmem:[#allocation86_spill] sm:$0xff] }
 0x529   : > { %7222 = vst.msk [vmem:[#allocation2 + $0x1e8] sm:$0xff] %vm7160_vm2, %v6893_v3  ;;  %v13886_v3 = vld [vmem:[#allocation20_spill] sm:$0xff] }
 0x52a   : > { %v9332_v46 = vpack.c.bf16 %v7610_v42, %v7610_v42  ;;  %v7611_v45 = vmax.f32 %v7483_v4, 0.0  ;;  %v9330_v40 = vpack.c.bf16 %v7608_v24, %v7608_v24  ;;  %v7609_v6 = vmax.f32 %v7481_v37, 0.0  ;;  %v9536_v28 = vpop.f32.mrb[64].mxu1  ;;  %v6488_v9 = vpop.f32.mrb[192].mxu0 }
 0x52b   : > { %v6914_v57 = vadd.f32 %v13882_v49, %v9536_v28  ;;  %v6905_v31 = vpop.f32.mrb[65].mxu1  ;;  %v13243_v27 = vadd.f32 %v6488_v9, %v13883_v36  ;;  %v6490_v17 = vpop.f32.mrb[193].mxu0 }
 0x52c   : > { %8251 = vst.msk [vmem:[%s12851_s9 + $0xe8] sm:$0xf] %vm8192_vm3, %v9332_v46  ;;  %v9333_v11 = vpack.c.bf16 %v7611_v45, %v7611_v45  ;;  %8249 = vst.msk [vmem:[%s12851_s9 + $0xe0] sm:$0xf] %vm8192_vm3, %v9330_v40  ;;  %v9331_v56 = vpack.c.bf16 %v7609_v6, %v7609_v6  ;;  %v7351_v13 = vld [vmem:[#allocation2 + $0x1f0] sm:$0xff]  ;;  %v6906_v43 = vadd.f32 %v13884_v0, %v6905_v31  ;;  %v9537_v12 = vpop.f32.mrb[66].mxu1 }
 0x52d   : > { %v7486_v50 = vadd.f32 %v13181_v23, %v7351_v13  ;;  %7227 = vst.msk [vmem:[#allocation2 + $0x210] sm:$0xff] %vm7160_vm2, %v6914_v57  ;;  %v6491_v60 = vpop.f32.mrb[194].mxu0  ;;  %v6917_v10 = vadd.f32 %v12841_v2, %v9537_v12  ;;  %v6908_v7 = vpop.f32.mrb[67].mxu1  ;;  %v13887_v13 = vld [vmem:[#allocation54_spill] sm:$0xff] }
 0x52e   : > { %8252 = vst.msk [vmem:[%s12851_s9 + $0xec] sm:$0xf] %vm8192_vm3, %v9333_v11  ;;  %8250 = vst.msk [vmem:[%s12851_s9 + $0xe4] sm:$0xf] %vm8192_vm3, %v9331_v56  ;;  %v13256_v52 = vadd.f32 %v6491_v60, %v13885_v35  ;;  %v6493_v59 = vpop.f32.mrb[195].mxu0  ;;  %v6909_v42 = vadd.f32 %v13886_v3, %v6908_v7 }
 0x52f   : > { %v7349_v30 = vld [vmem:[#allocation2 + $0x1e0] sm:$0xff]  ;;  %v7352_v5 = vld [vmem:[#allocation2 + $0x1f8] sm:$0xff]  ;;  %7225 = vst.msk [vmem:[#allocation2 + $0x200] sm:$0xff] %vm7160_vm2, %v6906_v43  ;;  %v7614_v4 = vmax.f32 %v7486_v50, 0.0  ;;  %7228 = vst.msk [vmem:[#allocation2 + $0x218] sm:$0xff] %vm7160_vm2, %v6917_v10 }
 0x530   : > { %v7484_v1 = vadd.f32 %v13181_v23, %v7349_v30  ;;  %v7487_v14 = vadd.f32 %v13181_v23, %v7352_v5  ;;  %v7350_v2 = vld [vmem:[#allocation2 + $0x1e8] sm:$0xff]  ;;  %7226 = vst.msk [vmem:[#allocation2 + $0x208] sm:$0xff] %vm7160_vm2, %v6909_v42 }
 0x531   : > { %v7485_v37 = vadd.f32 %v13181_v23, %v7350_v2  ;;  %v9336_v46 = vpack.c.bf16 %v7614_v4, %v7614_v4 }
 0x532   : > { %v7612_v24 = vmax.f32 %v7484_v1, 0.0  ;;  %v7615_v45 = vmax.f32 %v7487_v14, 0.0  ;;  %v9540_v28 = vpop.f32.mrb[68].mxu1  ;;  %v6496_v9 = vpop.f32.mrb[196].mxu0 }
 0x533   : > { %v7613_v6 = vmax.f32 %v7485_v37, 0.0  ;;  %8255 = vst.msk [vmem:[%s12851_s9 + $0xf8] sm:$0xf] %vm8192_vm3, %v9336_v46  ;;  %v6930_v49 = vadd.f32 %v12893_v41, %v9540_v28  ;;  %v6921_v57 = vpop.f32.mrb[69].mxu1  ;;  %v13269_v36 = vadd.f32 %v6496_v9, %v13887_v13  ;;  %v6498_v17 = vpop.f32.mrb[197].mxu0  ;;  %v13889_v9 = vld [vmem:[#allocation56_spill] sm:$0xff] }
 0x534   : > { %v9334_v40 = vpack.c.bf16 %v7612_v24, %v7612_v24  ;;  %v9337_v11 = vpack.c.bf16 %v7615_v45, %v7615_v45  ;;  %v7355_v56 = vld [vmem:[#allocation2 + $0x210] sm:$0xff]  ;;  %v6922_v0 = vadd.f32 %v12861_v21, %v6921_v57  ;;  %v9541_v43 = vpop.f32.mrb[70].mxu1  ;;  %v6499_v41 = vpop.f32.mrb[198].mxu0  ;;  %v13888_v21 = vld [vmem:[#allocation55_spill] sm:$0xff] }
 0x535   : > { %v9335_v31 = vpack.c.bf16 %v7613_v6, %v7613_v6  ;;  %v7490_v12 = vadd.f32 %v13181_v23, %v7355_v56  ;;  %7231 = vst.msk [vmem:[#allocation2 + $0x230] sm:$0xff] %vm7160_vm2, %v6930_v49  ;;  %v6933_v30 = vadd.f32 %v12908_v47, %v9541_v43  ;;  %v6924_v60 = vpop.f32.mrb[71].mxu1  ;;  %v13282_v1 = vadd.f32 %v6499_v41, %v13888_v21  ;;  %v6501_v5 = vpop.f32.mrb[199].mxu0 }
 0x536   : > { %8253 = vst.msk [vmem:[%s12851_s9 + $0xf0] sm:$0xf] %vm8192_vm3, %v9334_v40  ;;  %8256 = vst.msk [vmem:[%s12851_s9 + $0xfc] sm:$0xf] %vm8192_vm3, %v9337_v11  ;;  %v7353_v50 = vld [vmem:[#allocation2 + $0x200] sm:$0xff]  ;;  %v7356_v7 = vld [vmem:[#allocation2 + $0x218] sm:$0xff]  ;;  %v6925_v35 = vadd.f32 %v12876_v53, %v6924_v60 }
 0x537   : > { %8254 = vst.msk [vmem:[%s12851_s9 + $0xf4] sm:$0xf] %vm8192_vm3, %v9335_v31  ;;  %v7488_v10 = vadd.f32 %v13181_v23, %v7353_v50  ;;  %v7618_v59 = vmax.f32 %v7490_v12, 0.0  ;;  %v7491_v3 = vadd.f32 %v13181_v23, %v7356_v7  ;;  %v7354_v47 = vld [vmem:[#allocation2 + $0x208] sm:$0xff] }
 0x538   : > { %7229 = vst.msk [vmem:[#allocation2 + $0x220] sm:$0xff] %vm7160_vm2, %v6922_v0  ;;  %7232 = vst.msk [vmem:[#allocation2 + $0x238] sm:$0xff] %vm7160_vm2, %v6933_v30  ;;  %v7489_v4 = vadd.f32 %v13181_v23, %v7354_v47 }
 0x539   : > { %v7616_v42 = vmax.f32 %v7488_v10, 0.0  ;;  %7230 = vst.msk [vmem:[#allocation2 + $0x228] sm:$0xff] %vm7160_vm2, %v6925_v35  ;;  %v9340_v14 = vpack.c.bf16 %v7618_v59, %v7618_v59  ;;  %v7619_v2 = vmax.f32 %v7491_v3, 0.0 }
 0x53a   : > { %v7617_v37 = vmax.f32 %v7489_v4, 0.0  ;;  %v9544_v46 = vpop.f32.mrb[72].mxu1  ;;  %v6504_v45 = vpop.f32.mrb[200].mxu0 }
 0x53b   : > { %v9338_v24 = vpack.c.bf16 %v7616_v42, %v7616_v42  ;;  %8259 = vst.msk [vmem:[%s12851_s9 + $0x108] sm:$0xf] %vm8192_vm3, %v9340_v14  ;;  %v9341_v53 = vpack.c.bf16 %v7619_v2, %v7619_v2  ;;  %v6946_v40 = vadd.f32 %v12952_v32, %v9544_v46  ;;  %v6937_v6 = vpop.f32.mrb[73].mxu1  ;;  %v13295_v49 = vadd.f32 %v6504_v45, %v13889_v9  ;;  %v6506_v57 = vpop.f32.mrb[201].mxu0  ;;  %v13891_v46 = vld [vmem:[#allocation58_spill] sm:$0xff] }
 0x53c   : > { %v9339_v28 = vpack.c.bf16 %v7617_v37, %v7617_v37  ;;  %v7359_v11 = vld [vmem:[#allocation2 + $0x230] sm:$0xff]  ;;  %v6938_v31 = vadd.f32 %v12924_v26, %v6937_v6  ;;  %v9545_v56 = vpop.f32.mrb[74].mxu1  ;;  %v6507_v32 = vpop.f32.mrb[202].mxu0  ;;  %v13890_v26 = vld [vmem:[#allocation57_spill] sm:$0xff] }
 0x53d   : > { %8257 = vst.msk [vmem:[%s12851_s9 + $0x100] sm:$0xf] %vm8192_vm3, %v9338_v24  ;;  %8260 = vst.msk [vmem:[%s12851_s9 + $0x10c] sm:$0xf] %vm8192_vm3, %v9341_v53  ;;  %v7494_v13 = vadd.f32 %v13181_v23, %v7359_v11  ;;  %v6949_v0 = vadd.f32 %v12965_v62, %v9545_v56  ;;  %v6940_v43 = vpop.f32.mrb[75].mxu1  ;;  %v13308_v41 = vadd.f32 %v6507_v32, %v13890_v26  ;;  %v6509_v30 = vpop.f32.mrb[203].mxu0 }
 0x53e   : > { %7235 = vst.msk [vmem:[#allocation2 + $0x250] sm:$0xff] %vm7160_vm2, %v6946_v40  ;;  %7233 = vst.msk [vmem:[#allocation2 + $0x240] sm:$0xff] %vm7160_vm2, %v6938_v31  ;;  %v6941_v60 = vadd.f32 %v12938_v48, %v6940_v43 }
 0x53f   : > { %v7357_v17 = vld [vmem:[#allocation2 + $0x220] sm:$0xff]  ;;  %8258 = vst.msk [vmem:[%s12851_s9 + $0x104] sm:$0xf] %vm8192_vm3, %v9339_v28  ;;  %v7360_v50 = vld [vmem:[#allocation2 + $0x238] sm:$0xff]  ;;  %v7622_v10 = vmax.f32 %v7494_v13, 0.0 }
 0x540   : > { %v7492_v12 = vadd.f32 %v13181_v23, %v7357_v17  ;;  %v7495_v7 = vadd.f32 %v13181_v23, %v7360_v50  ;;  %v7358_v62 = vld [vmem:[#allocation2 + $0x228] sm:$0xff]  ;;  %7236 = vst.msk [vmem:[#allocation2 + $0x258] sm:$0xff] %vm7160_vm2, %v6949_v0  ;;  %7234 = vst.msk [vmem:[#allocation2 + $0x248] sm:$0xff] %vm7160_vm2, %v6941_v60 }
 0x541   : > { %v7493_v5 = vadd.f32 %v13181_v23, %v7358_v62  ;;  %v9344_v35 = vpack.c.bf16 %v7622_v10, %v7622_v10 }
 0x542   : > { %v7620_v21 = vmax.f32 %v7492_v12, 0.0  ;;  %v7623_v59 = vmax.f32 %v7495_v7, 0.0  ;;  %v9548_v42 = vpop.f32.mrb[76].mxu1  ;;  %v6512_v4 = vpop.f32.mrb[204].mxu0 }
 0x543   : > { %v7621_v47 = vmax.f32 %v7493_v5, 0.0  ;;  %8263 = vst.msk [vmem:[%s12851_s9 + $0x118] sm:$0xf] %vm8192_vm3, %v9344_v35  ;;  %v6962_v14 = vadd.f32 %v13004_v63, %v9548_v42  ;;  %v6953_v2 = vpop.f32.mrb[77].mxu1  ;;  %v13321_v53 = vadd.f32 %v6512_v4, %v13891_v46  ;;  %v6514_v45 = vpop.f32.mrb[205].mxu0 }
 0x544   : > { %v9342_v3 = vpack.c.bf16 %v7620_v21, %v7620_v21  ;;  %v9345_v48 = vpack.c.bf16 %v7623_v59, %v7623_v59  ;;  %v6954_v40 = vadd.f32 %v12978_v20, %v6953_v2  ;;  %v9549_v6 = vpop.f32.mrb[78].mxu1  ;;  %v6515_v63 = vpop.f32.mrb[206].mxu0  ;;  %v13892_v20 = vld [vmem:[#allocation59_spill] sm:$0xff] }
 0x545   : > { %v9343_v24 = vpack.c.bf16 %v7621_v47, %v7621_v47  ;;  %v7363_v37 = vld [vmem:[#allocation2 + $0x250] sm:$0xff]  ;;  %v7361_v11 = vld [vmem:[#allocation2 + $0x240] sm:$0xff]  ;;  %7239 = vst.msk [vmem:[#allocation2 + $0x270] sm:$0xff] %vm7160_vm2, %v6962_v14  ;;  %v6965_v9 = vadd.f32 %v13017_v51, %v9549_v6  ;;  %v6956_v57 = vpop.f32.mrb[79].mxu1  ;;  %v13334_v13 = vadd.f32 %v6515_v63, %v13892_v20  ;;  %v6517_v17 = vpop.f32.mrb[207].mxu0 }
 0x546   : > { %8261 = vst.msk [vmem:[%s12851_s9 + $0x110] sm:$0xf] %vm8192_vm3, %v9342_v3  ;;  %8264 = vst.msk [vmem:[%s12851_s9 + $0x11c] sm:$0xf] %vm8192_vm3, %v9345_v48  ;;  %v7498_v28 = vadd.f32 %v13181_v23, %v7363_v37  ;;  %v7496_v31 = vadd.f32 %v13181_v23, %v7361_v11  ;;  %v6957_v32 = vadd.f32 %v12991_v54, %v6956_v57  ;;  %v13893_v3 = vld [vmem:[#allocation60_spill] sm:$0xff] }
 0x547   : > { %8262 = vst.msk [vmem:[%s12851_s9 + $0x114] sm:$0xf] %vm8192_vm3, %v9343_v24  ;;  %v7364_v56 = vld [vmem:[#allocation2 + $0x258] sm:$0xff]  ;;  %v7362_v51 = vld [vmem:[#allocation2 + $0x248] sm:$0xff] }
 0x548   : > { %7237 = vst.msk [vmem:[#allocation2 + $0x260] sm:$0xff] %vm7160_vm2, %v6954_v40  ;;  %v7626_v0 = vmax.f32 %v7498_v28, 0.0  ;;  %v7499_v43 = vadd.f32 %v13181_v23, %v7364_v56  ;;  %7240 = vst.msk [vmem:[#allocation2 + $0x278] sm:$0xff] %vm7160_vm2, %v6965_v9  ;;  %v7624_v12 = vmax.f32 %v7496_v31, 0.0  ;;  %v7497_v50 = vadd.f32 %v13181_v23, %v7362_v51 }
 0x549   : > { %7238 = vst.msk [vmem:[#allocation2 + $0x268] sm:$0xff] %vm7160_vm2, %v6957_v32 }
 0x54a   : > { %v9348_v26 = vpack.c.bf16 %v7626_v0, %v7626_v0  ;;  %v7627_v30 = vmax.f32 %v7499_v43, 0.0  ;;  %v9346_v60 = vpack.c.bf16 %v7624_v12, %v7624_v12  ;;  %v7625_v10 = vmax.f32 %v7497_v50, 0.0  ;;  %v9552_v7 = vpop.f32.mrb[80].mxu1  ;;  %v6520_v62 = vpop.f32.mrb[208].mxu0 }
 0x54b   : > { %v6978_v21 = vadd.f32 %v13056_v44, %v9552_v7  ;;  %v6969_v5 = vpop.f32.mrb[81].mxu1  ;;  %v13347_v47 = vadd.f32 %v6520_v62, %v13893_v3  ;;  %v6522_v42 = vpop.f32.mrb[209].mxu0 }
 0x54c   : > { %8267 = vst.msk [vmem:[%s12851_s9 + $0x128] sm:$0xf] %vm8192_vm3, %v9348_v26  ;;  %v9349_v54 = vpack.c.bf16 %v7627_v30, %v7627_v30  ;;  %8265 = vst.msk [vmem:[%s12851_s9 + $0x120] sm:$0xf] %vm8192_vm3, %v9346_v60  ;;  %v9347_v35 = vpack.c.bf16 %v7625_v10, %v7625_v10  ;;  %v7367_v59 = vld [vmem:[#allocation2 + $0x270] sm:$0xff]  ;;  %v6970_v48 = vadd.f32 %v13030_v15, %v6969_v5  ;;  %v9553_v4 = vpop.f32.mrb[82].mxu1 }
 0x54d   : > { %v7502_v14 = vadd.f32 %v13181_v23, %v7367_v59  ;;  %7243 = vst.msk [vmem:[#allocation2 + $0x290] sm:$0xff] %vm7160_vm2, %v6978_v21  ;;  %v6523_v44 = vpop.f32.mrb[210].mxu0  ;;  %v6981_v24 = vadd.f32 %v13069_v22, %v9553_v4  ;;  %v6972_v37 = vpop.f32.mrb[83].mxu1  ;;  %v13894_v15 = vld [vmem:[#allocation61_spill] sm:$0xff]  ;;  %v13895_v26 = vld [vmem:[#allocation62_spill] sm:$0xff] }
 0x54e   : > { %8268 = vst.msk [vmem:[%s12851_s9 + $0x12c] sm:$0xf] %vm8192_vm3, %v9349_v54  ;;  %8266 = vst.msk [vmem:[%s12851_s9 + $0x124] sm:$0xf] %vm8192_vm3, %v9347_v35  ;;  %v13360_v40 = vadd.f32 %v6523_v44, %v13894_v15  ;;  %v6525_v6 = vpop.f32.mrb[211].mxu0  ;;  %v6973_v28 = vadd.f32 %v13043_v58, %v6972_v37 }
 0x54f   : > { %v7365_v2 = vld [vmem:[#allocation2 + $0x260] sm:$0xff]  ;;  %v7368_v45 = vld [vmem:[#allocation2 + $0x278] sm:$0xff]  ;;  %7241 = vst.msk [vmem:[#allocation2 + $0x280] sm:$0xff] %vm7160_vm2, %v6970_v48  ;;  %v7630_v11 = vmax.f32 %v7502_v14, 0.0  ;;  %7244 = vst.msk [vmem:[#allocation2 + $0x298] sm:$0xff] %vm7160_vm2, %v6981_v24 }
 0x550   : > { %v7500_v46 = vadd.f32 %v13181_v23, %v7365_v2  ;;  %v7503_v63 = vadd.f32 %v13181_v23, %v7368_v45  ;;  %v7366_v22 = vld [vmem:[#allocation2 + $0x268] sm:$0xff]  ;;  %7242 = vst.msk [vmem:[#allocation2 + $0x288] sm:$0xff] %vm7160_vm2, %v6973_v28 }
 0x551   : > { %v7501_v57 = vadd.f32 %v13181_v23, %v7366_v22  ;;  %v9352_v31 = vpack.c.bf16 %v7630_v11, %v7630_v11 }
 0x552   : > { %v7628_v9 = vmax.f32 %v7500_v46, 0.0  ;;  %v7631_v56 = vmax.f32 %v7503_v63, 0.0  ;;  %v9556_v32 = vpop.f32.mrb[84].mxu1  ;;  %v6528_v0 = vpop.f32.mrb[212].mxu0 }
 0x553   : > { %v7629_v17 = vmax.f32 %v7501_v57, 0.0  ;;  %8271 = vst.msk [vmem:[%s12851_s9 + $0x138] sm:$0xf] %vm8192_vm3, %v9352_v31  ;;  %v6994_v43 = vadd.f32 %v13108_v34, %v9556_v32  ;;  %v6985_v51 = vpop.f32.mrb[85].mxu1  ;;  %v13373_v30 = vadd.f32 %v6528_v0, %v13895_v26  ;;  %v6530_v60 = vpop.f32.mrb[213].mxu0 }
 0x554   : > { %v9350_v20 = vpack.c.bf16 %v7628_v9, %v7628_v9  ;;  %v9353_v58 = vpack.c.bf16 %v7631_v56, %v7631_v56  ;;  %v7371_v50 = vld [vmem:[#allocation2 + $0x290] sm:$0xff]  ;;  %v6986_v10 = vadd.f32 %v13082_v16, %v6985_v51  ;;  %v9557_v7 = vpop.f32.mrb[86].mxu1  ;;  %v6531_v34 = vpop.f32.mrb[214].mxu0  ;;  %v13896_v16 = vld [vmem:[#allocation63_spill] sm:$0xff] }
 0x555   : > { %v9351_v12 = vpack.c.bf16 %v7629_v17, %v7629_v17  ;;  %v7506_v54 = vadd.f32 %v13181_v23, %v7371_v50  ;;  %7247 = vst.msk [vmem:[#allocation2 + $0x2b0] sm:$0xff] %vm7160_vm2, %v6994_v43  ;;  %v6997_v21 = vadd.f32 %v13121_v55, %v9557_v7  ;;  %v6988_v5 = vpop.f32.mrb[87].mxu1  ;;  %v13386_v3 = vadd.f32 %v6531_v34, %v13896_v16  ;;  %v6533_v42 = vpop.f32.mrb[215].mxu0  ;;  %v13897_v9 = vld [vmem:[#allocation64_spill] sm:$0xff] }
 0x556   : > { %8269 = vst.msk [vmem:[%s12851_s9 + $0x130] sm:$0xf] %vm8192_vm3, %v9350_v20  ;;  %8272 = vst.msk [vmem:[%s12851_s9 + $0x13c] sm:$0xf] %vm8192_vm3, %v9353_v58  ;;  %v7369_v62 = vld [vmem:[#allocation2 + $0x280] sm:$0xff]  ;;  %v7372_v59 = vld [vmem:[#allocation2 + $0x298] sm:$0xff]  ;;  %v6989_v48 = vadd.f32 %v13095_v19, %v6988_v5 }
 0x557   : > { %8270 = vst.msk [vmem:[%s12851_s9 + $0x134] sm:$0xf] %vm8192_vm3, %v9351_v12  ;;  %v7504_v35 = vadd.f32 %v13181_v23, %v7369_v62  ;;  %v7634_v4 = vmax.f32 %v7506_v54, 0.0  ;;  %v7507_v14 = vadd.f32 %v13181_v23, %v7372_v59  ;;  %v7370_v55 = vld [vmem:[#allocation2 + $0x288] sm:$0xff] }
 0x558   : > { %7245 = vst.msk [vmem:[#allocation2 + $0x2a0] sm:$0xff] %vm7160_vm2, %v6986_v10  ;;  %7248 = vst.msk [vmem:[#allocation2 + $0x2b8] sm:$0xff] %vm7160_vm2, %v6997_v21  ;;  %v7505_v44 = vadd.f32 %v13181_v23, %v7370_v55 }
 0x559   : > { %v7632_v2 = vmax.f32 %v7504_v35, 0.0  ;;  %7246 = vst.msk [vmem:[#allocation2 + $0x2a8] sm:$0xff] %vm7160_vm2, %v6989_v48  ;;  %v9356_v24 = vpack.c.bf16 %v7634_v4, %v7634_v4  ;;  %v7635_v37 = vmax.f32 %v7507_v14, 0.0  ;;  %v13899_v14 = vld [vmem:[#allocation66_spill] sm:$0xff] }
 0x55a   : > { %v7633_v45 = vmax.f32 %v7505_v44, 0.0  ;;  %v9560_v15 = vpop.f32.mrb[88].mxu1  ;;  %v6536_v6 = vpop.f32.mrb[216].mxu0 }
 0x55b   : > { %v9354_v46 = vpack.c.bf16 %v7632_v2, %v7632_v2  ;;  %8275 = vst.msk [vmem:[%s12851_s9 + $0x148] sm:$0xf] %vm8192_vm3, %v9356_v24  ;;  %v9357_v19 = vpack.c.bf16 %v7635_v37, %v7635_v37  ;;  %v7010_v28 = vadd.f32 %v13160_v29, %v9560_v15  ;;  %v7001_v11 = vpop.f32.mrb[89].mxu1  ;;  %v13399_v57 = vadd.f32 %v6536_v6, %v13897_v9  ;;  %v6538_v31 = vpop.f32.mrb[217].mxu0 }
 0x55c   : > { %v9355_v63 = vpack.c.bf16 %v7633_v45, %v7633_v45  ;;  %v7375_v22 = vld [vmem:[#allocation2 + $0x2b0] sm:$0xff]  ;;  %v7002_v56 = vadd.f32 %v13134_v18, %v7001_v11  ;;  %v9561_v20 = vpop.f32.mrb[90].mxu1  ;;  %v6539_v29 = vpop.f32.mrb[218].mxu0  ;;  %v13898_v18 = vld [vmem:[#allocation65_spill] sm:$0xff] }
 0x55d   : > { %8273 = vst.msk [vmem:[%s12851_s9 + $0x140] sm:$0xf] %vm8192_vm3, %v9354_v46  ;;  %8276 = vst.msk [vmem:[%s12851_s9 + $0x14c] sm:$0xf] %vm8192_vm3, %v9357_v19  ;;  %v7510_v17 = vadd.f32 %v13181_v23, %v7375_v22  ;;  %v7013_v58 = vadd.f32 %v13173_v33, %v9561_v20  ;;  %v7004_v0 = vpop.f32.mrb[91].mxu1  ;;  %v13412_v12 = vadd.f32 %v6539_v29, %v13898_v18  ;;  %v6541_v50 = vpop.f32.mrb[219].mxu0 }
 0x55e   : > { %7251 = vst.msk [vmem:[#allocation2 + $0x2d0] sm:$0xff] %vm7160_vm2, %v7010_v28  ;;  %7249 = vst.msk [vmem:[#allocation2 + $0x2c0] sm:$0xff] %vm7160_vm2, %v7002_v56  ;;  %v7005_v26 = vadd.f32 %v13147_v61, %v7004_v0 }
 0x55f   : > { %v7373_v32 = vld [vmem:[#allocation2 + $0x2a0] sm:$0xff]  ;;  %8274 = vst.msk [vmem:[%s12851_s9 + $0x144] sm:$0xf] %vm8192_vm3, %v9355_v63  ;;  %v7376_v51 = vld [vmem:[#allocation2 + $0x2b8] sm:$0xff]  ;;  %v7638_v60 = vmax.f32 %v7510_v17, 0.0 }
 0x560   : > { %v7508_v43 = vadd.f32 %v13181_v23, %v7373_v32  ;;  %v7511_v10 = vadd.f32 %v13181_v23, %v7376_v51  ;;  %v7374_v33 = vld [vmem:[#allocation2 + $0x2a8] sm:$0xff]  ;;  %7252 = vst.msk [vmem:[#allocation2 + $0x2d8] sm:$0xff] %vm7160_vm2, %v7013_v58  ;;  %7250 = vst.msk [vmem:[#allocation2 + $0x2c8] sm:$0xff] %vm7160_vm2, %v7005_v26  ;;  %v13901_v26 = vld [vmem:[#allocation68_spill] sm:$0xff] }
 0x561   : > { %v7509_v54 = vadd.f32 %v13181_v23, %v7374_v33  ;;  %v9360_v62 = vpack.c.bf16 %v7638_v60, %v7638_v60 }
 0x562   : > { %v7636_v7 = vmax.f32 %v7508_v43, 0.0  ;;  %v7639_v34 = vmax.f32 %v7511_v10, 0.0  ;;  %v9564_v35 = vpop.f32.mrb[92].mxu1  ;;  %v6544_v59 = vpop.f32.mrb[220].mxu0 }
 0x563   : > { %v7637_v5 = vmax.f32 %v7509_v54, 0.0  ;;  %8279 = vst.msk [vmem:[%s12851_s9 + $0x158] sm:$0xf] %vm8192_vm3, %v9360_v62  ;;  %v7026_v16 = vadd.f32 %v13217_v8, %v9564_v35  ;;  %v7017_v42 = vpop.f32.mrb[93].mxu1  ;;  %v13425_v55 = vadd.f32 %v6544_v59, %v13899_v14  ;;  %v6546_v2 = vpop.f32.mrb[221].mxu0 }
 0x564   : > { %v9358_v21 = vpack.c.bf16 %v7636_v7, %v7636_v7  ;;  %v9361_v61 = vpack.c.bf16 %v7639_v34, %v7639_v34  ;;  %v7018_v44 = vadd.f32 %v13191_v39, %v7017_v42  ;;  %v9565_v24 = vpop.f32.mrb[94].mxu1  ;;  %v6547_v8 = vpop.f32.mrb[222].mxu0  ;;  %v13900_v39 = vld [vmem:[#allocation67_spill] sm:$0xff] }
 0x565   : > { %v9359_v48 = vpack.c.bf16 %v7637_v5, %v7637_v5  ;;  %v7379_v4 = vld [vmem:[#allocation2 + $0x2d0] sm:$0xff]  ;;  %v7377_v46 = vld [vmem:[#allocation2 + $0x2c0] sm:$0xff]  ;;  %7255 = vst.msk [vmem:[#allocation2 + $0x2f0] sm:$0xff] %vm7160_vm2, %v7026_v16  ;;  %v7029_v45 = vadd.f32 %v13230_v38, %v9565_v24  ;;  %v7020_v15 = vpop.f32.mrb[95].mxu1  ;;  %v13438_v28 = vadd.f32 %v6547_v8, %v13900_v39  ;;  %v6549_v11 = vpop.f32.mrb[223].mxu0 }
 0x566   : > { %8277 = vst.msk [vmem:[%s12851_s9 + $0x150] sm:$0xf] %vm8192_vm3, %v9358_v21  ;;  %8280 = vst.msk [vmem:[%s12851_s9 + $0x15c] sm:$0xf] %vm8192_vm3, %v9361_v61  ;;  %v7514_v37 = vadd.f32 %v13181_v23, %v7379_v4  ;;  %v7512_v19 = vadd.f32 %v13181_v23, %v7377_v46  ;;  %v7021_v63 = vadd.f32 %v13204_v25, %v7020_v15  ;;  %v13903_v39 = vld [vmem:[#allocation72_spill] sm:$0xff] }
 0x567   : > { %8278 = vst.msk [vmem:[%s12851_s9 + $0x154] sm:$0xf] %vm8192_vm3, %v9359_v48  ;;  %v7380_v6 = vld [vmem:[#allocation2 + $0x2d8] sm:$0xff]  ;;  %v7378_v38 = vld [vmem:[#allocation2 + $0x2c8] sm:$0xff] }
 0x568   : > { %7253 = vst.msk [vmem:[#allocation2 + $0x2e0] sm:$0xff] %vm7160_vm2, %v7018_v44  ;;  %v7642_v22 = vmax.f32 %v7514_v37, 0.0  ;;  %v7515_v9 = vadd.f32 %v13181_v23, %v7380_v6  ;;  %7256 = vst.msk [vmem:[#allocation2 + $0x2f8] sm:$0xff] %vm7160_vm2, %v7029_v45  ;;  %v7640_v31 = vmax.f32 %v7512_v19, 0.0  ;;  %v7513_v56 = vadd.f32 %v13181_v23, %v7378_v38 }
 0x569   : > { %7254 = vst.msk [vmem:[#allocation2 + $0x2e8] sm:$0xff] %vm7160_vm2, %v7021_v63 }
 0x56a   : > { %v9364_v20 = vpack.c.bf16 %v7642_v22, %v7642_v22  ;;  %v7643_v17 = vmax.f32 %v7515_v9, 0.0  ;;  %v9362_v32 = vpack.c.bf16 %v7640_v31, %v7640_v31  ;;  %v7641_v29 = vmax.f32 %v7513_v56, 0.0  ;;  %v9568_v58 = vpop.f32.mrb[96].mxu1  ;;  %v6552_v0 = vpop.f32.mrb[224].mxu0 }
 0x56b   : > { %v7042_v43 = vadd.f32 %v13269_v36, %v9568_v58  ;;  %v7033_v51 = vpop.f32.mrb[97].mxu1  ;;  %v13451_v60 = vadd.f32 %v6552_v0, %v13901_v26  ;;  %v6554_v10 = vpop.f32.mrb[225].mxu0 }
 0x56c   : > { %8283 = vst.msk [vmem:[%s12851_s9 + $0x168] sm:$0xf] %vm8192_vm3, %v9364_v20  ;;  %v9365_v25 = vpack.c.bf16 %v7643_v17, %v7643_v17  ;;  %8281 = vst.msk [vmem:[%s12851_s9 + $0x160] sm:$0xf] %vm8192_vm3, %v9362_v32  ;;  %v9363_v18 = vpack.c.bf16 %v7641_v29, %v7641_v29  ;;  %v7383_v50 = vld [vmem:[#allocation2 + $0x2f0] sm:$0xff]  ;;  %v7034_v33 = vadd.f32 %v13243_v27, %v7033_v51  ;;  %v9569_v7 = vpop.f32.mrb[98].mxu1 }
 0x56d   : > { %v7518_v54 = vadd.f32 %v13181_v23, %v7383_v50  ;;  %7259 = vst.msk [vmem:[#allocation2 + $0x310] sm:$0xff] %vm7160_vm2, %v7042_v43  ;;  %v6555_v36 = vpop.f32.mrb[226].mxu0  ;;  %v7045_v34 = vadd.f32 %v13282_v1, %v9569_v7  ;;  %v7036_v21 = vpop.f32.mrb[99].mxu1  ;;  %v13902_v27 = vld [vmem:[#allocation70_spill] sm:$0xff] }
 0x56e   : > { %8284 = vst.msk [vmem:[%s12851_s9 + $0x16c] sm:$0xf] %vm8192_vm3, %v9365_v25  ;;  %8282 = vst.msk [vmem:[%s12851_s9 + $0x164] sm:$0xf] %vm8192_vm3, %v9363_v18  ;;  %v13464_v61 = vadd.f32 %v6555_v36, %v13902_v27  ;;  %v6557_v59 = vpop.f32.mrb[227].mxu0  ;;  %v7037_v16 = vadd.f32 %v13256_v52, %v7036_v21 }
 0x56f   : > { %v7381_v62 = vld [vmem:[#allocation2 + $0x2e0] sm:$0xff]  ;;  %v7384_v35 = vld [vmem:[#allocation2 + $0x2f8] sm:$0xff]  ;;  %7257 = vst.msk [vmem:[#allocation2 + $0x300] sm:$0xff] %vm7160_vm2, %v7034_v33  ;;  %v7646_v42 = vmax.f32 %v7518_v54, 0.0  ;;  %7260 = vst.msk [vmem:[#allocation2 + $0x318] sm:$0xff] %vm7160_vm2, %v7045_v34 }
 0x570   : > { %v7516_v5 = vadd.f32 %v13181_v23, %v7381_v62  ;;  %v7519_v48 = vadd.f32 %v13181_v23, %v7384_v35  ;;  %v7382_v1 = vld [vmem:[#allocation2 + $0x2e8] sm:$0xff]  ;;  %7258 = vst.msk [vmem:[#allocation2 + $0x308] sm:$0xff] %vm7160_vm2, %v7037_v16 }
 0x571   : > { %v7517_v14 = vadd.f32 %v13181_v23, %v7382_v1  ;;  %v9368_v2 = vpack.c.bf16 %v7646_v42, %v7646_v42 }
 0x572   : > { %v7644_v4 = vmax.f32 %v7516_v5, 0.0  ;;  %v7647_v44 = vmax.f32 %v7519_v48, 0.0  ;;  %v9572_v46 = vpop.f32.mrb[100].mxu1  ;;  %v6560_v8 = vpop.f32.mrb[228].mxu0  ;;  %v13905_v5 = vld [vmem:[#allocation74_spill] sm:$0xff] }
 0x573   : > { %v7645_v37 = vmax.f32 %v7517_v14, 0.0  ;;  %8287 = vst.msk [vmem:[%s12851_s9 + $0x178] sm:$0xf] %vm8192_vm3, %v9368_v2  ;;  %v7058_v45 = vadd.f32 %v13321_v53, %v9572_v46  ;;  %v7049_v15 = vpop.f32.mrb[101].mxu1  ;;  %v13477_v11 = vadd.f32 %v6560_v8, %v13903_v39  ;;  %v6562_v63 = vpop.f32.mrb[229].mxu0 }
 0x574   : > { %v9366_v24 = vpack.c.bf16 %v7644_v4, %v7644_v4  ;;  %v9369_v52 = vpack.c.bf16 %v7647_v44, %v7647_v44  ;;  %v7387_v6 = vld [vmem:[#allocation2 + $0x310] sm:$0xff]  ;;  %v7050_v22 = vadd.f32 %v13295_v49, %v7049_v15  ;;  %v9573_v9 = vpop.f32.mrb[102].mxu1  ;;  %v6563_v53 = vpop.f32.mrb[230].mxu0  ;;  %v13904_v49 = vld [vmem:[#allocation73_spill] sm:$0xff] }
 0x575   : > { %v9367_v19 = vpack.c.bf16 %v7645_v37, %v7645_v37  ;;  %v7522_v38 = vadd.f32 %v13181_v23, %v7387_v6  ;;  %7263 = vst.msk [vmem:[#allocation2 + $0x330] sm:$0xff] %vm7160_vm2, %v7058_v45  ;;  %v7061_v56 = vadd.f32 %v13334_v13, %v9573_v9  ;;  %v7052_v20 = vpop.f32.mrb[103].mxu1  ;;  %v13490_v29 = vadd.f32 %v6563_v53, %v13904_v49  ;;  %v6565_v58 = vpop.f32.mrb[231].mxu0  ;;  %v13907_v53 = vld [vmem:[#allocation76_spill] sm:$0xff]  ;;  %v13537_v49 = vld [vmem:[%s13719_s2] ss:$0 sm:$0xff] }
 0x576   : > { %8285 = vst.msk [vmem:[%s12851_s9 + $0x170] sm:$0xf] %vm8192_vm3, %v9366_v24  ;;  %8288 = vst.msk [vmem:[%s12851_s9 + $0x17c] sm:$0xf] %vm8192_vm3, %v9369_v52  ;;  %v7385_v31 = vld [vmem:[#allocation2 + $0x300] sm:$0xff]  ;;  %v7388_v32 = vld [vmem:[#allocation2 + $0x318] sm:$0xff]  ;;  %v7053_v25 = vadd.f32 %v13308_v41, %v7052_v20 }
 0x577   : > { %8286 = vst.msk [vmem:[%s12851_s9 + $0x174] sm:$0xf] %vm8192_vm3, %v9367_v19  ;;  %v7520_v17 = vadd.f32 %v13181_v23, %v7385_v31  ;;  %v7650_v0 = vmax.f32 %v7522_v38, 0.0  ;;  %v7523_v43 = vadd.f32 %v13181_v23, %v7388_v32  ;;  %v7386_v13 = vld [vmem:[#allocation2 + $0x308] sm:$0xff] }
 0x578   : > { %7261 = vst.msk [vmem:[#allocation2 + $0x320] sm:$0xff] %vm7160_vm2, %v7050_v22  ;;  %7264 = vst.msk [vmem:[#allocation2 + $0x338] sm:$0xff] %vm7160_vm2, %v7061_v56  ;;  %v7521_v18 = vadd.f32 %v13181_v23, %v7386_v13 }
 0x579   : > { %v7648_v51 = vmax.f32 %v7520_v17, 0.0  ;;  %7262 = vst.msk [vmem:[#allocation2 + $0x328] sm:$0xff] %vm7160_vm2, %v7053_v25  ;;  %v9372_v50 = vpack.c.bf16 %v7650_v0, %v7650_v0  ;;  %v7651_v26 = vmax.f32 %v7523_v43, 0.0 }
 0x57a   : > { %v7649_v33 = vmax.f32 %v7521_v18, 0.0  ;;  %v9576_v7 = vpop.f32.mrb[104].mxu1  ;;  %v6568_v54 = vpop.f32.mrb[232].mxu0 }
 0x57b   : > { %v9370_v10 = vpack.c.bf16 %v7648_v51, %v7648_v51  ;;  %8291 = vst.msk [vmem:[%s12851_s9 + $0x188] sm:$0xf] %vm8192_vm3, %v9372_v50  ;;  %v9373_v41 = vpack.c.bf16 %v7651_v26, %v7651_v26  ;;  %v7074_v62 = vadd.f32 %v13373_v30, %v9576_v7  ;;  %v7065_v36 = vpop.f32.mrb[105].mxu1  ;;  %v13503_v35 = vadd.f32 %v6568_v54, %v13905_v5  ;;  %v6570_v27 = vpop.f32.mrb[233].mxu0  ;;  %v13908_v51 = vld [vmem:[#allocation77_spill] sm:$0xff] }
 0x57c   : > { %v9371_v34 = vpack.c.bf16 %v7649_v33, %v7649_v33  ;;  %v7391_v21 = vld [vmem:[#allocation2 + $0x330] sm:$0xff]  ;;  %v7066_v59 = vadd.f32 %v13347_v47, %v7065_v36  ;;  %v9577_v16 = vpop.f32.mrb[106].mxu1  ;;  %v6571_v30 = vpop.f32.mrb[234].mxu0  ;;  %v13906_v47 = vld [vmem:[#allocation75_spill] sm:$0xff] }
 0x57d   : > { %8289 = vst.msk [vmem:[%s12851_s9 + $0x180] sm:$0xf] %vm8192_vm3, %v9370_v10  ;;  %8292 = vst.msk [vmem:[%s12851_s9 + $0x18c] sm:$0xf] %vm8192_vm3, %v9373_v41  ;;  %v7526_v42 = vadd.f32 %v13181_v23, %v7391_v21  ;;  %v7077_v1 = vadd.f32 %v13386_v3, %v9577_v16  ;;  %v7068_v4 = vpop.f32.mrb[107].mxu1  ;;  %v13516_v44 = vadd.f32 %v6571_v30, %v13906_v47  ;;  %v6573_v24 = vpop.f32.mrb[235].mxu0 }
 0x57e   : > { %7267 = vst.msk [vmem:[#allocation2 + $0x350] sm:$0xff] %vm7160_vm2, %v7074_v62  ;;  %7265 = vst.msk [vmem:[#allocation2 + $0x340] sm:$0xff] %vm7160_vm2, %v7066_v59  ;;  %v7069_v37 = vadd.f32 %v13360_v40, %v7068_v4 }
 0x57f   : > { %v7389_v48 = vld [vmem:[#allocation2 + $0x320] sm:$0xff]  ;;  %8290 = vst.msk [vmem:[%s12851_s9 + $0x184] sm:$0xf] %vm8192_vm3, %v9371_v34  ;;  %v7392_v2 = vld [vmem:[#allocation2 + $0x338] sm:$0xff]  ;;  %v7654_v46 = vmax.f32 %v7526_v42, 0.0 }
 0x580   : > { %v7524_v14 = vadd.f32 %v13181_v23, %v7389_v48  ;;  %v7527_v52 = vadd.f32 %v13181_v23, %v7392_v2  ;;  %v7390_v3 = vld [vmem:[#allocation2 + $0x328] sm:$0xff]  ;;  %7268 = vst.msk [vmem:[#allocation2 + $0x358] sm:$0xff] %vm7160_vm2, %v7077_v1  ;;  %7266 = vst.msk [vmem:[#allocation2 + $0x348] sm:$0xff] %vm7160_vm2, %v7069_v37  ;;  %v13909_v48 = vld [vmem:[#allocation78_spill] sm:$0xff] }
 0x581   : > { %v7525_v45 = vadd.f32 %v13181_v23, %v7390_v3  ;;  %v9376_v15 = vpack.c.bf16 %v7654_v46, %v7654_v46 }
 0x582   : > { %v7652_v8 = vmax.f32 %v7524_v14, 0.0  ;;  %v7655_v19 = vmax.f32 %v7527_v52, 0.0  ;;  %v9580_v63 = vpop.f32.mrb[108].mxu1  ;;  %v6576_v22 = vpop.f32.mrb[236].mxu0 }
 0x583   : > { %v7653_v39 = vmax.f32 %v7525_v45, 0.0  ;;  %8295 = vst.msk [vmem:[%s12851_s9 + $0x198] sm:$0xf] %vm8192_vm3, %v9376_v15  ;;  %v7090_v9 = vadd.f32 %v13425_v55, %v9580_v63  ;;  %v7081_v38 = vpop.f32.mrb[109].mxu1  ;;  %v13529_v56 = vadd.f32 %v6576_v22, %v13907_v53  ;;  %v6578_v20 = vpop.f32.mrb[237].mxu0 }
 0x584   : > { %v9374_v6 = vpack.c.bf16 %v7652_v8, %v7652_v8  ;;  %v9377_v40 = vpack.c.bf16 %v7655_v19, %v7655_v19  ;;  %v7082_v17 = vadd.f32 %v13399_v57, %v7081_v38  ;;  %v9581_v32 = vpop.f32.mrb[110].mxu1  ;;  %v6579_v25 = vpop.f32.mrb[238].mxu0 }
 0x585   : > { %v9375_v31 = vpack.c.bf16 %v7653_v39, %v7653_v39  ;;  %v7395_v23 = vld [vmem:[#allocation2 + $0x350] sm:$0xff]  ;;  %v7393_v58 = vld [vmem:[#allocation2 + $0x340] sm:$0xff]  ;;  %7271 = vst.msk [vmem:[#allocation2 + $0x370] sm:$0xff] %vm7160_vm2, %v7090_v9  ;;  %v7093_v0 = vadd.f32 %v13438_v28, %v9581_v32  ;;  %v7084_v43 = vpop.f32.mrb[111].mxu1  ;;  %v13547_v18 = vadd.f32 %v6579_v25, %v13908_v51  ;;  %v6581_v50 = vpop.f32.mrb[239].mxu0 }
 0x586   : > { %8293 = vst.msk [vmem:[%s12851_s9 + $0x190] sm:$0xf] %vm8192_vm3, %v9374_v6  ;;  %8296 = vst.msk [vmem:[%s12851_s9 + $0x19c] sm:$0xf] %vm8192_vm3, %v9377_v40  ;;  %v7530_v55 = vadd.f32 %v13537_v49, %v7395_v23  ;;  %v7528_v57 = vadd.f32 %v13537_v49, %v7393_v58  ;;  %v7085_v26 = vadd.f32 %v13412_v12, %v7084_v43  ;;  %v13911_v32 = vld [vmem:[#allocation80_spill] sm:$0xff] }
 0x587   : > { %8294 = vst.msk [vmem:[%s12851_s9 + $0x194] sm:$0xf] %vm8192_vm3, %v9375_v31  ;;  %v7396_v13 = vld [vmem:[#allocation2 + $0x358] sm:$0xff]  ;;  %v7394_v28 = vld [vmem:[#allocation2 + $0x348] sm:$0xff] }
 0x588   : > { %7269 = vst.msk [vmem:[#allocation2 + $0x360] sm:$0xff] %vm7160_vm2, %v7082_v17  ;;  %v7658_v10 = vmax.f32 %v7530_v55, 0.0  ;;  %v7531_v33 = vadd.f32 %v13537_v49, %v7396_v13  ;;  %7272 = vst.msk [vmem:[#allocation2 + $0x378] sm:$0xff] %vm7160_vm2, %v7093_v0  ;;  %v7656_v7 = vmax.f32 %v7528_v57, 0.0  ;;  %v7529_v41 = vadd.f32 %v13537_v49, %v7394_v28 }
 0x589   : > { %7270 = vst.msk [vmem:[#allocation2 + $0x368] sm:$0xff] %vm7160_vm2, %v7085_v26 }
 0x58a   : > { %v9380_v54 = vpack.c.bf16 %v7658_v10, %v7658_v10  ;;  %v7659_v62 = vmax.f32 %v7531_v33, 0.0  ;;  %v9378_v36 = vpack.c.bf16 %v7656_v7, %v7656_v7  ;;  %v7657_v34 = vmax.f32 %v7529_v41, 0.0  ;;  %v9584_v21 = vpop.f32.mrb[112].mxu1  ;;  %v6584_v5 = vpop.f32.mrb[240].mxu0 }
 0x58b   : > { %v7106_v27 = vadd.f32 %v13477_v11, %v9584_v21  ;;  %v7097_v59 = vpop.f32.mrb[113].mxu1  ;;  %v13560_v30 = vadd.f32 %v6584_v5, %v13909_v48  ;;  %v6586_v1 = vpop.f32.mrb[241].mxu0 }
 0x58c   : > { %8299 = vst.msk [vmem:[%s12851_s9 + $0x1a8] sm:$0xf] %vm8192_vm3, %v9380_v54  ;;  %v9381_v12 = vpack.c.bf16 %v7659_v62, %v7659_v62  ;;  %8297 = vst.msk [vmem:[%s12851_s9 + $0x1a0] sm:$0xf] %vm8192_vm3, %v9378_v36  ;;  %v9379_v16 = vpack.c.bf16 %v7657_v34, %v7657_v34  ;;  %v7399_v42 = vld [vmem:[#allocation2 + $0x370] sm:$0xff]  ;;  %v7098_v4 = vadd.f32 %v13451_v60, %v7097_v59  ;;  %v9585_v14 = vpop.f32.mrb[114].mxu1 }
 0x58d   : > { %v7534_v2 = vadd.f32 %v13537_v49, %v7399_v42  ;;  %7275 = vst.msk [vmem:[#allocation2 + $0x390] sm:$0xff] %vm7160_vm2, %v7106_v27  ;;  %v6587_v11 = vpop.f32.mrb[242].mxu0  ;;  %v7109_v24 = vadd.f32 %v13490_v29, %v9585_v14  ;;  %v7100_v37 = vpop.f32.mrb[115].mxu1  ;;  %v13910_v60 = vld [vmem:[#allocation79_spill] sm:$0xff]  ;;  %v13913_v1 = vld [vmem:[#allocation82_spill] sm:$0xff] }
 0x58e   : > { %8300 = vst.msk [vmem:[%s12851_s9 + $0x1ac] sm:$0xf] %vm8192_vm3, %v9381_v12  ;;  %8298 = vst.msk [vmem:[%s12851_s9 + $0x1a4] sm:$0xf] %vm8192_vm3, %v9379_v16  ;;  %v13573_v3 = vadd.f32 %v6587_v11, %v13910_v60  ;;  %v6589_v8 = vpop.f32.mrb[243].mxu0  ;;  %v7101_v45 = vadd.f32 %v13464_v61, %v7100_v37 }
 0x58f   : > { %v7397_v47 = vld [vmem:[#allocation2 + $0x360] sm:$0xff]  ;;  %v7400_v52 = vld [vmem:[#allocation2 + $0x378] sm:$0xff]  ;;  %7273 = vst.msk [vmem:[#allocation2 + $0x380] sm:$0xff] %vm7160_vm2, %v7098_v4  ;;  %v7662_v15 = vmax.f32 %v7534_v2, 0.0  ;;  %7276 = vst.msk [vmem:[#allocation2 + $0x398] sm:$0xff] %vm7160_vm2, %v7109_v24 }
 0x590   : > { %v7532_v46 = vadd.f32 %v13537_v49, %v7397_v47  ;;  %v7535_v19 = vadd.f32 %v13537_v49, %v7400_v52  ;;  %v7398_v29 = vld [vmem:[#allocation2 + $0x368] sm:$0xff]  ;;  %7274 = vst.msk [vmem:[#allocation2 + $0x388] sm:$0xff] %vm7160_vm2, %v7101_v45 }
 0x591   : > { %v7533_v39 = vadd.f32 %v13537_v49, %v7398_v29  ;;  %v9384_v63 = vpack.c.bf16 %v7662_v15, %v7662_v15  ;;  %v13914_v45 = vld [vmem:[#allocation83_spill] sm:$0xff] }
 0x592   : > { %v7660_v6 = vmax.f32 %v7532_v46, 0.0  ;;  %v7663_v40 = vmax.f32 %v7535_v19, 0.0  ;;  %v9588_v38 = vpop.f32.mrb[116].mxu1  ;;  %v6592_v31 = vpop.f32.mrb[244].mxu0 }
 0x593   : > { %v7661_v9 = vmax.f32 %v7533_v39, 0.0  ;;  %8303 = vst.msk [vmem:[%s12851_s9 + $0x1b8] sm:$0xf] %vm8192_vm3, %v9384_v63  ;;  %v7122_v23 = vadd.f32 %v13529_v56, %v9588_v38  ;;  %v7113_v53 = vpop.f32.mrb[117].mxu1  ;;  %v9752_v55 = vadd.f32 %v6592_v31, %v13911_v32  ;;  %v6594_v58 = vpop.f32.mrb[245].mxu0  ;;  %v13915_v32 = vld [vmem:[#allocation84_spill] sm:$0xff] }
 0x594   : > { %v9382_v22 = vpack.c.bf16 %v7660_v6, %v7660_v6  ;;  %v9385_v61 = vpack.c.bf16 %v7663_v40, %v7663_v40  ;;  %v7403_v17 = vld [vmem:[#allocation2 + $0x390] sm:$0xff]  ;;  %v7114_v25 = vadd.f32 %v13503_v35, %v7113_v53  ;;  %v9589_v0 = vpop.f32.mrb[118].mxu1  ;;  %v6595_v56 = vpop.f32.mrb[246].mxu0  ;;  %v13912_v35 = vld [vmem:[#allocation81_spill] sm:$0xff] }
 0x595   : > { %v9383_v20 = vpack.c.bf16 %v7661_v9, %v7661_v9  ;;  %v7538_v43 = vadd.f32 %v13537_v49, %v7403_v17  ;;  %7279 = vst.msk [vmem:[#allocation2 + $0x3b0] sm:$0xff] %vm7160_vm2, %v7122_v23  ;;  %v7125_v13 = vadd.f32 %v13547_v18, %v9589_v0  ;;  %v7116_v51 = vpop.f32.mrb[119].mxu1  ;;  %v9753_v10 = vadd.f32 %v6595_v56, %v13912_v35  ;;  %v6597_v33 = vpop.f32.mrb[247].mxu0  ;;  %v13916_v35 = vld [vmem:[#allocation85_spill] sm:$0xff] }
 0x596   : > { %8301 = vst.msk [vmem:[%s12851_s9 + $0x1b0] sm:$0xf] %vm8192_vm3, %v9382_v22  ;;  %8304 = vst.msk [vmem:[%s12851_s9 + $0x1bc] sm:$0xf] %vm8192_vm3, %v9385_v61  ;;  %v7401_v57 = vld [vmem:[#allocation2 + $0x380] sm:$0xff]  ;;  %v7404_v26 = vld [vmem:[#allocation2 + $0x398] sm:$0xff]  ;;  %v7117_v28 = vadd.f32 %v13516_v44, %v7116_v51 }
 0x597   : > { %8302 = vst.msk [vmem:[%s12851_s9 + $0x1b4] sm:$0xf] %vm8192_vm3, %v9383_v20  ;;  %v7536_v50 = vadd.f32 %v13537_v49, %v7401_v57  ;;  %v7666_v7 = vmax.f32 %v7538_v43, 0.0  ;;  %v7539_v41 = vadd.f32 %v13537_v49, %v7404_v26  ;;  %v7402_v54 = vld [vmem:[#allocation2 + $0x388] sm:$0xff] }
 0x598   : > { %7277 = vst.msk [vmem:[#allocation2 + $0x3a0] sm:$0xff] %vm7160_vm2, %v7114_v25  ;;  %7280 = vst.msk [vmem:[#allocation2 + $0x3b8] sm:$0xff] %vm7160_vm2, %v7125_v13  ;;  %v7537_v62 = vadd.f32 %v13537_v49, %v7402_v54 }
 0x599   : > { %v7664_v18 = vmax.f32 %v7536_v50, 0.0  ;;  %7278 = vst.msk [vmem:[#allocation2 + $0x3a8] sm:$0xff] %vm7160_vm2, %v7117_v28  ;;  %v9388_v36 = vpack.c.bf16 %v7666_v7, %v7666_v7  ;;  %v7667_v34 = vmax.f32 %v7539_v41, 0.0 }
 0x59a   : > { %v7665_v12 = vmax.f32 %v7537_v62, 0.0  ;;  %v9592_v5 = vpop.f32.mrb[120].mxu1  ;;  %v6600_v27 = vpop.f32.mrb[248].mxu0 }
 0x59b   : > { %v9386_v21 = vpack.c.bf16 %v7664_v18, %v7664_v18  ;;  %8307 = vst.msk [vmem:[%s12851_s9 + $0x1c8] sm:$0xf] %vm8192_vm3, %v9388_v36  ;;  %v9389_v44 = vpack.c.bf16 %v7667_v34, %v7667_v34  ;;  %v7138_v59 = vadd.f32 %v9752_v55, %v9592_v5  ;;  %v7129_v16 = vpop.f32.mrb[121].mxu1  ;;  %v9754_v4 = vadd.f32 %v6600_v27, %v13913_v1  ;;  %v6602_v14 = vpop.f32.mrb[249].mxu0 }
 0x59c   : > { %v9387_v42 = vpack.c.bf16 %v7665_v12, %v7665_v12  ;;  %v7407_v48 = vld [vmem:[#allocation2 + $0x3b0] sm:$0xff]  ;;  %v7130_v2 = vadd.f32 %v13560_v30, %v7129_v16  ;;  %v9593_v47 = vpop.f32.mrb[122].mxu1  ;;  %v6603_v37 = vpop.f32.mrb[250].mxu0 }
 0x59d   : > { %8305 = vst.msk [vmem:[%s12851_s9 + $0x1c0] sm:$0xf] %vm8192_vm3, %v9386_v21  ;;  %8308 = vst.msk [vmem:[%s12851_s9 + $0x1cc] sm:$0xf] %vm8192_vm3, %v9389_v44  ;;  %v7542_v11 = vadd.f32 %v13537_v49, %v7407_v48  ;;  %v7141_v46 = vadd.f32 %v9753_v10, %v9593_v47  ;;  %v7132_v52 = vpop.f32.mrb[123].mxu1  ;;  %v9755_v30 = vadd.f32 %v6603_v37, %v13914_v45  ;;  %v6605_v15 = vpop.f32.mrb[251].mxu0 }
 0x59e   : > { %7283 = vst.msk [vmem:[#allocation2 + $0x3d0] sm:$0xff] %vm7160_vm2, %v7138_v59  ;;  %7281 = vst.msk [vmem:[#allocation2 + $0x3c0] sm:$0xff] %vm7160_vm2, %v7130_v2  ;;  %v7133_v19 = vadd.f32 %v13573_v3, %v7132_v52 }
 0x59f   : > { %v7405_v24 = vld [vmem:[#allocation2 + $0x3a0] sm:$0xff]  ;;  %8306 = vst.msk [vmem:[%s12851_s9 + $0x1c4] sm:$0xf] %vm8192_vm3, %v9387_v42  ;;  %v7408_v8 = vld [vmem:[#allocation2 + $0x3b8] sm:$0xff]  ;;  %v7670_v29 = vmax.f32 %v7542_v11, 0.0 }
 0x5a0   : > { %v7540_v60 = vadd.f32 %v13537_v49, %v7405_v24  ;;  %v7543_v6 = vadd.f32 %v13537_v49, %v7408_v8  ;;  %v7406_v39 = vld [vmem:[#allocation2 + $0x3a8] sm:$0xff]  ;;  %7284 = vst.msk [vmem:[#allocation2 + $0x3d8] sm:$0xff] %vm7160_vm2, %v7141_v46  ;;  %7282 = vst.msk [vmem:[#allocation2 + $0x3c8] sm:$0xff] %vm7160_vm2, %v7133_v19 }
 0x5a1   : > { %v7541_v40 = vadd.f32 %v13537_v49, %v7406_v39  ;;  %v9392_v22 = vpack.c.bf16 %v7670_v29, %v7670_v29 }
 0x5a2   : > { %v7668_v63 = vmax.f32 %v7540_v60, 0.0  ;;  %v7671_v9 = vmax.f32 %v7543_v6, 0.0  ;;  %v9596_v31 = vpop.f32.mrb[124].mxu1  ;;  %v6608_v23 = vpop.f32.mrb[252].mxu0 }
 0x5a3   : > { %v7669_v61 = vmax.f32 %v7541_v40, 0.0  ;;  %8311 = vst.msk [vmem:[%s12851_s9 + $0x1d8] sm:$0xf] %vm8192_vm3, %v9392_v22  ;;  %v7145_v53 = vpop.f32.mrb[125].mxu1  ;;  %v9756_v55 = vadd.f32 %v6608_v23, %v13915_v32  ;;  %v6610_v58 = vpop.f32.mrb[253].mxu0 }
 0x5a4   : > { %v9390_v38 = vpack.c.bf16 %v7668_v63, %v7668_v63  ;;  %v9393_v3 = vpack.c.bf16 %v7671_v9, %v7671_v9  ;;  %v7146_v25 = vadd.f32 %v9754_v4, %v7145_v53  ;;  %v9597_v0 = vpop.f32.mrb[126].mxu1  ;;  %v6611_v56 = vpop.f32.mrb[254].mxu0 }
 0x5a5   : > { %v9391_v20 = vpack.c.bf16 %v7669_v61, %v7669_v61  ;;  %v7411_v17 = vld [vmem:[#allocation2 + $0x3d0] sm:$0xff]  ;;  %v7409_v57 = vld [vmem:[#allocation2 + $0x3c0] sm:$0xff]  ;;  %v7148_v13 = vpop.f32.mrb[127].mxu1  ;;  %v7154_v26 = vadd.f32 %v9756_v55, %v9596_v31  ;;  %v9757_v10 = vadd.f32 %v6611_v56, %v13916_v35  ;;  %v6613_v33 = vpop.f32.mrb[255].mxu0 }
 0x5a6   : > { %8309 = vst.msk [vmem:[%s12851_s9 + $0x1d0] sm:$0xf] %vm8192_vm3, %v9390_v38  ;;  %8312 = vst.msk [vmem:[%s12851_s9 + $0x1dc] sm:$0xf] %vm8192_vm3, %v9393_v3  ;;  %v7546_v43 = vadd.f32 %v13537_v49, %v7411_v17  ;;  %v7544_v51 = vadd.f32 %v13537_v49, %v7409_v57  ;;  %v7149_v28 = vadd.f32 %v9755_v30, %v7148_v13 }
 0x5a7   : > { %8310 = vst.msk [vmem:[%s12851_s9 + $0x1d4] sm:$0xf] %vm8192_vm3, %v9391_v20  ;;  %v7412_v50 = vld [vmem:[#allocation2 + $0x3d8] sm:$0xff]  ;;  %v7410_v54 = vld [vmem:[#allocation2 + $0x3c8] sm:$0xff]  ;;  %v7157_v36 = vadd.f32 %v9757_v10, %v9597_v0 }
 0x5a8   : > { %7285 = vst.msk [vmem:[#allocation2 + $0x3e0] sm:$0xff] %vm7160_vm2, %v7146_v25  ;;  %v7674_v7 = vmax.f32 %v7546_v43, 0.0  ;;  %v7547_v41 = vadd.f32 %v13537_v49, %v7412_v50  ;;  %v7672_v18 = vmax.f32 %v7544_v51, 0.0  ;;  %v7545_v62 = vadd.f32 %v13537_v49, %v7410_v54  ;;  %7287 = vst.msk [vmem:[#allocation2 + $0x3f0] sm:$0xff] %vm7160_vm2, %v7154_v26 }
 0x5a9   : > { %7286 = vst.msk [vmem:[#allocation2 + $0x3e8] sm:$0xff] %vm7160_vm2, %v7149_v28  ;;  %7288 = vst.msk [vmem:[#allocation2 + $0x3f8] sm:$0xff] %vm7160_vm2, %v7157_v36 }
 0x5aa   : > { %v9396_v34 = vpack.c.bf16 %v7674_v7, %v7674_v7  ;;  %v7675_v21 = vmax.f32 %v7547_v41, 0.0  ;;  %v9394_v12 = vpack.c.bf16 %v7672_v18, %v7672_v18  ;;  %v7673_v5 = vmax.f32 %v7545_v62, 0.0 }
 0x5ac   : > { %8315 = vst.msk [vmem:[%s12851_s9 + $0x1e8] sm:$0xf] %vm8192_vm3, %v9396_v34  ;;  %v9397_v44 = vpack.c.bf16 %v7675_v21, %v7675_v21  ;;  %8313 = vst.msk [vmem:[%s12851_s9 + $0x1e0] sm:$0xf] %vm8192_vm3, %v9394_v12  ;;  %v9395_v27 = vpack.c.bf16 %v7673_v5, %v7673_v5 }
 0x5ae   : > { %8316 = vst.msk [vmem:[%s12851_s9 + $0x1ec] sm:$0xf] %vm8192_vm3, %v9397_v44  ;;  %8314 = vst.msk [vmem:[%s12851_s9 + $0x1e4] sm:$0xf] %vm8192_vm3, %v9395_v27 }
 0x5af   : > { %v7413_v59 = vld [vmem:[#allocation2 + $0x3e0] sm:$0xff]  ;;  %v7415_v42 = vld [vmem:[#allocation2 + $0x3f0] sm:$0xff] }
 0x5b0   : > { %v7548_v16 = vadd.f32 %v13537_v49, %v7413_v59  ;;  %v7414_v48 = vld [vmem:[#allocation2 + $0x3e8] sm:$0xff]  ;;  %v7550_v1 = vadd.f32 %v13537_v49, %v7415_v42  ;;  %v7416_v2 = vld [vmem:[#allocation2 + $0x3f8] sm:$0xff] }
 0x5b1   : > { %v7549_v14 = vadd.f32 %v13537_v49, %v7414_v48  ;;  %v7551_v24 = vadd.f32 %v13537_v49, %v7416_v2 }
 0x5b2   : > { %v7676_v4 = vmax.f32 %v7548_v16, 0.0  ;;  %v7678_v47 = vmax.f32 %v7550_v1, 0.0 }
 0x5b3   : > { %v7677_v37 = vmax.f32 %v7549_v14, 0.0  ;;  %v7679_v52 = vmax.f32 %v7551_v24, 0.0 }
 0x5b4   : > { %v9398_v11 = vpack.c.bf16 %v7676_v4, %v7676_v4  ;;  %v9400_v46 = vpack.c.bf16 %v7678_v47, %v7678_v47 }
 0x5b5   : > { %v9399_v60 = vpack.c.bf16 %v7677_v37, %v7677_v37  ;;  %v9401_v49 = vpack.c.bf16 %v7679_v52, %v7679_v52 }
 0x5b6   : > { %8317 = vst.msk [vmem:[%s12851_s9 + $0x1f0] sm:$0xf] %vm8192_vm3, %v9398_v11  ;;  %8319 = vst.msk [vmem:[%s12851_s9 + $0x1f8] sm:$0xf] %vm8192_vm3, %v9400_v46 }
 0x5b7   : > { %8318 = vst.msk [vmem:[%s12851_s9 + $0x1f4] sm:$0xf] %vm8192_vm3, %v9399_v60  ;;  %8320 = vst.msk [vmem:[%s12851_s9 + $0x1fc] sm:$0xf] %vm8192_vm3, %v9401_v49 }
 0x5b8   : > { %11241 = shalt.err (!%p11238_p3)
}
 0x5b9   : > { %s11242_s5 = scalar_lea.hbm %s13659_s27, 8192  ;;  %s11246_s9 = scalar_lea.hbm %s13720_s3, 32768 }
 0x5ba   : > { %p11243_p5 = scmp.ne.s32.totalorder %s13659_s27, %s11242_s5  ;;  %p11247_p9 = scmp.lt.u32.totalorder %s13659_s27, %s13720_s3 }
 0x5bb   : > { %p11248_p10 = scmp.lt.u32.totalorder %s11246_s9, %s11242_s5  ;;  %p11250_p12 = scmp.lt.u32.totalorder %s11242_s5, %s13659_s27 }
 0x5bc   : > { %p11244_p6 = pnand %p11243_p5, %p11372_p4 }
 0x5bd   : > { %p11249_p11 = por %p11248_p10, %p11247_p9 }
 0x5be   : > { %p11245_p7 = pneg %p11244_p6 }
 0x5bf   : > { %p11251_p13 = por %p11250_p12, %p11249_p11 }
 0x5c1   : > { %p11252_p0 = pnand %p11251_p13, %p11245_p7 }
 0x5c3   : > { %11255 = shalt.err (!%p11252_p0)
}
 0x5c4   : > { %s11310_s11 = smov 64   ;;  %s11311_s18 = smov 4  }
 0x5c5   : > { %10271 = dma.vmem_to_hbm [thread:$0]  (%p11372_p4), %s13661_s21, 8192, %s13659_s27, %s13671_s15, %s11310_s11, %s11310_s11, %s11311_s18  }
 0x5c6 PF: > { %p10277_p1 = scmp.ge.s32.totalorder %s11306_s17, 2  ;;  %s8351_s19 = sand.u32 1, %s11286_s12  }
 0x5c7   : > { %s8352_s23 = scalar_lea.sflag [#allocation4], %s8351_s19 }
 0x5c8   : > { %p10274_p2 = pnand %p10277_p1, %p11379_p8 }
 0x5ca   : > { %11281 = dma.done.wait (!%p10274_p2), %s8352_s23, 8192  }
 0x5cb   : > { %11283 = vsyncadd (!%p10274_p2), %s8352_s23, 4294959104  ;;  %s16_s17 = sadd.s32 1, %s11306_s17   ;;  %s13917_s12 = smov %s11290_s13 }
 0x5cc   : > { %p13_p3 = scmp.ge.s32.totalorder %s16_s17, 6   ;;  %s13918_s13 = smov %s11294_s14 }
 0x5cd   : > { %s13919_s14 = smov %s11385_s25  ;;  %s13920_s15 = smov %s11302_s16 }
 0x5ce   : > { %s13921_s16 = smov %s13923_s20  ;;  %15 = sbr.rel (!%p13_p3) target bundleno = 4 (0x4), region = 71 }
 0x5d5   :  { %8357 = vsyncpa [#allocation4], 1 }
 0x5d6   :  { %8359 = vsyncpa [#allocation4 + $0x1], 1 }

</bundles_post_ra>
